<compile_context>
chip_gen: v7x
topology: tpu7x:2x2x1
jax: 0.10.0
libtpu: 0.0.40
codegen_flags: <defaults>
</compile_context>

<pallas_src>
import math

import jax
import jax.numpy as jnp
from jax.experimental import pallas as pl
from jax.experimental.pallas import tpu as pltpu

# ---------------- configuration (small shapes) ----------------
N_BATCH = 2
D_MODEL = 32
N_HEADS = 4
N_LEVELS = 2
N_POINTS = 4
D_HEAD = D_MODEL // N_HEADS          # 8 (power of 2)
LEN_Q = 8
SPATIAL_SHAPES = ((8, 8), (4, 4))    # per-level (H, W)
LEVEL_START = (0, 64)
LEN_IN = sum(h * w for h, w in SPATIAL_SHAPES)   # 80
LP = N_LEVELS * N_POINTS             # 8
HLP = N_HEADS * LP                   # 32


def _batches_per_grid_step(n_batch):
    """How many batches to process per grid step.

    Single-TensorCore chips (v5e / v6e): fold the whole batch into one grid
    step -- the ~0.35us fixed per-step overhead dominates this tiny compute and
    the dense projections get M = N*Lq sublanes.  Chips exposing two
    TensorCores behind one device (v4 megacore, v7x): keep one batch per grid
    step so dimension_semantics=("parallel",) can shard the grid across cores.
    """
    try:
        kind = jax.devices()[0].device_kind.lower()
    except Exception:
        return 1
    single_tc = any(t in kind for t in
                    ("v5e", "v5 lite", "v5litepod", "v6e", "v6 lite"))
    if single_tc and n_batch > 0:
        return n_batch
    return 1


# ---------------- fused forward kernel ----------------
def _make_fused_kernel(spatial_shapes, level_start, n_heads, n_levels, n_points,
                       n_b, len_q, len_in, d_model, has_padding,
                       sample_dtype=jnp.float32):
    d_head = d_model // n_heads
    lp = n_levels * n_points
    hlp = n_heads * lp
    m_rows = n_b * len_q            # query rows handled per grid step

    def kernel(*refs):
        if has_padding:
            (feat_ref, query_ref, ref_ref, keep_ref,
             value_w_ref, value_b_ref, proj_w_ref, proj_b_ref,
             out_w_ref, out_b_ref, out_ref) = refs
        else:
            (feat_ref, query_ref, ref_ref,
             value_w_ref, value_b_ref, proj_w_ref, proj_b_ref,
             out_w_ref, out_b_ref, out_ref) = refs

        # ---- value projection, batch folded into M: (n_b*Len_in, C)
        feat = feat_ref[...].reshape(n_b * len_in, d_model)
        value = (jnp.dot(feat, value_w_ref[...],
                         preferred_element_type=jnp.float32) + value_b_ref[...])
        if has_padding:
            value = value * keep_ref[...].reshape(n_b * len_in, 1)

        # ---- merged sampling-offset / attention-logit projection: (M, 3*HLP)
        # column layout: [off_x (HLP) | off_y (HLP) | logits (HLP)], each in
        # (head, level, point) order.
        query = query_ref[...].reshape(m_rows, d_model)
        proj = (jnp.dot(query, proj_w_ref[...],
                        preferred_element_type=jnp.float32) + proj_b_ref[...])
        logits = proj[:, 2 * hlp:3 * hlp]                       # (M, HLP)

        # ---- per-point static geometry constants, (1, HLP), (h, l, p) order
        w_parts, h_parts, s_parts = [], [], []
        for _h in range(n_heads):
            for l in range(n_levels):
                hl, wl = spatial_shapes[l]
                w_parts.append(jnp.full((1, n_points), wl, jnp.int32))
                h_parts.append(jnp.full((1, n_points), hl, jnp.int32))
                s_parts.append(jnp.full((1, n_points), level_start[l], jnp.int32))
        w_pp = jnp.concatenate(w_parts, axis=1)   # level width per point
        h_pp = jnp.concatenate(h_parts, axis=1)   # level height per point
        s_pp = jnp.concatenate(s_parts, axis=1)   # level start per point

        # ---- reference points in pixel units, tiled to (M, HLP) for x and y
        ref = ref_ref[...].reshape(m_rows, 2 * n_levels)  # [x0,y0,x1,y1,...]
        per_lvl_x, per_lvl_y = [], []
        for l in range(n_levels):
            hl, wl = spatial_shapes[l]
            rx = ref[:, 2 * l:2 * l + 1] * float(wl)            # (M, 1)
            ry = ref[:, 2 * l + 1:2 * l + 2] * float(hl)
            per_lvl_x.append(jnp.broadcast_to(rx, (m_rows, n_points)))
            per_lvl_y.append(jnp.broadcast_to(ry, (m_rows, n_points)))
        refx_lp = jnp.concatenate(per_lvl_x, axis=1)            # (M, LP)
        refy_lp = jnp.concatenate(per_lvl_y, axis=1)
        refxy = jnp.concatenate([refx_lp] * n_heads + [refy_lp] * n_heads,
                                axis=1)                         # (M, 2*HLP)

        # grid_sample(align_corners=False): pixel = loc * size - 0.5.  The
        # offset normalizer 1/(W,H) cancels against the pixel scale, so
        #   px = ref_x*W + off_x - 0.5,  py = ref_y*H + off_y - 0.5.
        # Geometry runs once on the concatenated [px | py] (M, 2*HLP) slab.
        pxy = proj[:, 0:2 * hlp] + refxy - 0.5
        xy0f = jnp.floor(pxy)
        fxy = pxy - xy0f
        xy0 = xy0f.astype(jnp.int32)
        x0 = xy0[:, 0:hlp]
        y0 = xy0[:, hlp:2 * hlp]
        fx = fxy[:, 0:hlp]
        fy = fxy[:, hlp:2 * hlp]

        # ---- per-head softmax, fully normalized BEFORE the scatter
        # (per-head max avoids cross-head underflow; exact reciprocal on the
        # (M,1) denominators -- negligible cost, no approx error.)
        mx_parts = []
        for h in range(n_heads):
            mh = jnp.max(logits[:, h * lp:(h + 1) * lp], axis=-1, keepdims=True)
            mx_parts.append(jnp.broadcast_to(mh, (m_rows, lp)))
        ex = jnp.exp(logits - jnp.concatenate(mx_parts, axis=1))   # (M, HLP)
        inv_parts = []
        for h in range(n_heads):
            dh = jnp.sum(ex[:, h * lp:(h + 1) * lp], axis=-1, keepdims=True)
            inv_parts.append(jnp.broadcast_to(1.0 / dh, (m_rows, lp)))
        ex_norm = ex * jnp.concatenate(inv_parts, axis=1)          # (M, HLP)

        # ---- vectorized one-hot scatter of (attn * bilinear * valid) weights
        # into a dense (M, HLP, LEN_IN) sampling tensor (4 corners, no per-
        # column loops).  OOB corners contribute zero weight, so a wrapped
        # in-range flat index is harmless (must stay true if clipping changes).
        pos3 = jax.lax.broadcasted_iota(jnp.int32, (m_rows, hlp, len_in), 2)
        wsum = None
        for dx in (0, 1):
            for dy in (0, 1):
                xi = x0 + dx
                yi = y0 + dy
                wx = fx if dx == 1 else 1.0 - fx
                wy = fy if dy == 1 else 1.0 - fy
                valid = (xi >= 0) & (xi < w_pp) & (yi >= 0) & (yi < h_pp)
                idx = s_pp + yi * w_pp + xi                        # (M, HLP)
                w = ex_norm * (wx * wy) * valid.astype(jnp.float32)
                term = jnp.where(idx[:, :, None] == pos3, w[:, :, None], 0.0)
                wsum = term if wsum is None else wsum + term

        # reduce the points of each head: (M, HLP, LEN_IN) -> (M, H, LEN_IN)
        wmat = jnp.sum(wsum.reshape(m_rows, n_heads, lp, len_in), axis=2)

        # ---- ONE sampling matmul per batch:
        #   (Lq, H*LEN_IN)  x  block-diag (H*LEN_IN, d_model)  ->  (Lq, d_model)
        # (32 result lanes per push instead of 8; no per-head output concat).
        col_id = jax.lax.broadcasted_iota(jnp.int32, (1, d_model), 1)
        cores = []
        for b in range(n_b):
            wflat = jnp.concatenate(
                [wmat[b * len_q:(b + 1) * len_q, h, :] for h in range(n_heads)],
                axis=-1)                                          # (Lq, H*LEN_IN)
            v_b = value[b * len_in:(b + 1) * len_in, :]           # (LEN_IN, C)
            vbd = jnp.concatenate(
                [v_b * ((col_id >= h * d_head) &
                        (col_id < (h + 1) * d_head)).astype(jnp.float32)
                 for h in range(n_heads)], axis=0)                # (H*LEN_IN, C)
            cores.append(jnp.dot(wflat.astype(sample_dtype),
                                 vbd.astype(sample_dtype),
                                 preferred_element_type=jnp.float32))
        core = cores[0] if n_b == 1 else jnp.concatenate(cores, axis=0)  # (M, C)

        # ---- fused output projection, (M, d_model) store
        out = (jnp.dot(core, out_w_ref[...], preferred_element_type=jnp.float32)
               + out_b_ref[...])
        out_ref[...] = out.reshape(n_b, len_q, d_model)

    return kernel


def _fused_forward_call(feat, query, ref2, keep, value_w, value_b,
                        proj_w, proj_b, out_w, out_b, n_b):
    n, len_in, c = feat.shape
    len_q = query.shape[1]
    has_padding = keep is not None
    kernel = _make_fused_kernel(SPATIAL_SHAPES, LEVEL_START, N_HEADS, N_LEVELS,
                                N_POINTS, n_b, len_q, len_in, c, has_padding)

    def whole(shape):
        return pl.BlockSpec(shape, lambda g: (0,) * len(shape))

    in_specs = [
        pl.BlockSpec((n_b, len_in, c), lambda g: (g, 0, 0)),           # feat
        pl.BlockSpec((n_b, len_q, c), lambda g: (g, 0, 0)),            # query
        pl.BlockSpec((n_b, len_q, 2 * N_LEVELS), lambda g: (g, 0, 0)),  # ref pts
    ]
    args = [feat, query, ref2]
    if has_padding:
        in_specs.append(pl.BlockSpec((n_b, len_in, 1), lambda g: (g, 0, 0)))
        args.append(keep)
    in_specs += [
        whole((c, c)),            # value_w
        whole((1, c)),            # value_b
        whole((c, 3 * HLP)),      # merged proj_w  [off_x | off_y | logits]
        whole((1, 3 * HLP)),      # merged proj_b
        whole((c, c)),            # out_w
        whole((1, c)),            # out_b
    ]
    args += [value_w, value_b, proj_w, proj_b, out_w, out_b]

    return pl.pallas_call(
        kernel,
        out_shape=jax.ShapeDtypeStruct((n, len_q, c), jnp.float32),
        grid=(n // n_b,),
        in_specs=in_specs,
        out_specs=pl.BlockSpec((n_b, len_q, c), lambda g: (g, 0, 0)),
        compiler_params=pltpu.CompilerParams(
            dimension_semantics=("parallel",)),
    )(*args)


# ---------------- parameter init (matches MSDeformAttn._reset_parameters) ----------------
def init_params(key):
    def xavier_uniform(k, fan_in, fan_out):
        bound = math.sqrt(6.0 / (fan_in + fan_out))
        return jax.random.uniform(k, (fan_in, fan_out), jnp.float32, -bound, bound)

    k1, k2 = jax.random.split(key)
    # sampling_offsets: weight = 0, bias = grid_init
    thetas = jnp.arange(N_HEADS, dtype=jnp.float32) * (2.0 * math.pi / N_HEADS)
    grid = jnp.stack([jnp.cos(thetas), jnp.sin(thetas)], -1)          # (H, 2)
    grid = grid / jnp.max(jnp.abs(grid), axis=-1, keepdims=True)
    grid = jnp.tile(grid[:, None, None, :], (1, N_LEVELS, N_POINTS, 1))  # (H, L, P, 2)
    scale = (jnp.arange(N_POINTS, dtype=jnp.float32) + 1.0).reshape(1, 1, N_POINTS, 1)
    grid = grid * scale
    params = {
        "off_w": jnp.zeros((D_MODEL, N_HEADS * N_LEVELS * N_POINTS * 2), jnp.float32),
        "off_b": grid.reshape(-1),
        "attn_w": jnp.zeros((D_MODEL, N_HEADS * N_LEVELS * N_POINTS), jnp.float32),
        "attn_b": jnp.zeros((N_HEADS * N_LEVELS * N_POINTS,), jnp.float32),
        "value_w": xavier_uniform(k1, D_MODEL, D_MODEL),
        "value_b": jnp.zeros((D_MODEL,), jnp.float32),
        "out_w": xavier_uniform(k2, D_MODEL, D_MODEL),
        "out_b": jnp.zeros((D_MODEL,), jnp.float32),
    }
    return params


# ---------------- full forward (single fused Pallas kernel) ----------------
@jax.jit
def msdeform_attn_forward(params, query, reference_points, input_flatten,
                          input_spatial_shapes, input_level_start_index,
                          input_padding_mask=None):
    n, len_q, c = query.shape
    len_in = input_flatten.shape[1]
    # static config consistency checks (no device->host sync)
    assert len_in == LEN_IN and c == D_MODEL
    assert reference_points.shape[-1] == 2

    # merge sampling_offsets + attention_weights into one projection; permute
    # columns to [off_x | off_y | logits], each group ordered (head, level, point)
    off_w3 = params["off_w"].reshape(c, HLP, 2)
    off_b3 = params["off_b"].reshape(HLP, 2)
    proj_w = jnp.concatenate([off_w3[:, :, 0], off_w3[:, :, 1],
                              params["attn_w"]], axis=1)            # (C, 3*HLP)
    proj_b = jnp.concatenate([off_b3[:, 0], off_b3[:, 1],
                              params["attn_b"]], axis=0).reshape(1, 3 * HLP)

    ref2 = reference_points.reshape(n, len_q, N_LEVELS * 2)
    if input_padding_mask is None:
        keep = None        # padding path specialized out of the kernel
    else:
        keep = jnp.where(input_padding_mask[..., None], 0.0, 1.0).astype(jnp.float32)

    n_b = _batches_per_grid_step(n)
    if n % n_b != 0:
        n_b = 1

    return _fused_forward_call(
        input_flatten, query, ref2, keep,
        params["value_w"], params["value_b"].reshape(1, c),
        proj_w, proj_b,
        params["out_w"], params["out_b"].reshape(1, c), n_b)


# ---------------- pure-JAX reference (for verification) ----------------
def reference_forward(params, query, reference_points, input_flatten,
                      input_spatial_shapes):
    hp = jax.lax.Precision.HIGHEST
    n, lq, c = query.shape
    len_in = input_flatten.shape[1]
    value = jnp.dot(input_flatten, params["value_w"], precision=hp) + params["value_b"]
    value = value.reshape(n, len_in, N_HEADS, D_HEAD)
    off = jnp.dot(query, params["off_w"], precision=hp) + params["off_b"]
    off = off.reshape(n, lq, N_HEADS, N_LEVELS, N_POINTS, 2)
    aw = jnp.dot(query, params["attn_w"], precision=hp) + params["attn_b"]
    aw = jax.nn.softmax(aw.reshape(n, lq, N_HEADS, N_LEVELS * N_POINTS), axis=-1)
    aw = aw.reshape(n, lq, N_HEADS, N_LEVELS, N_POINTS)
    normalizer = jnp.stack([input_spatial_shapes[:, 1],
                            input_spatial_shapes[:, 0]], -1).astype(jnp.float32)
    loc = (reference_points[:, :, None, :, None, :]
           + off / normalizer[None, None, None, :, None, :])

    out = jnp.zeros((n, lq, N_HEADS, D_HEAD), jnp.float32)
    for lvl in range(N_LEVELS):
        h, w = SPATIAL_SHAPES[lvl]
        start = LEVEL_START[lvl]
        v = value[:, start:start + h * w].reshape(n, h, w, N_HEADS, D_HEAD)
        x = loc[:, :, :, lvl, :, 0] * w - 0.5        # (N, Lq, H, P)
        y = loc[:, :, :, lvl, :, 1] * h - 0.5
        x0 = jnp.floor(x)
        y0 = jnp.floor(y)
        for dx, dy in ((0, 0), (1, 0), (0, 1), (1, 1)):
            xi = x0 + dx
            yi = y0 + dy
            cw = (1.0 - jnp.abs(x - xi)) * (1.0 - jnp.abs(y - yi))
            valid = (xi >= 0) & (xi < w) & (yi >= 0) & (yi < h)
            xic = jnp.clip(xi, 0, w - 1).astype(jnp.int32)
            yic = jnp.clip(yi, 0, h - 1).astype(jnp.int32)
            gathered = v[jnp.arange(n)[:, None, None, None], yic, xic,
                         jnp.arange(N_HEADS)[None, None, :, None], :]   # (N,Lq,H,P,D)
            contrib = jnp.where(valid[..., None], cw[..., None], 0.0) * gathered
            out = out + jnp.sum(contrib * aw[:, :, :, lvl, :, None], axis=3)
    core = out.reshape(n, lq, c)
    return jnp.dot(core, params["out_w"], precision=hp) + params["out_b"]


# ---------------- main ----------------
if __name__ == "__main__":
    key = jax.random.PRNGKey(0)
    kp, kq, kf, kr = jax.random.split(key, 4)

    params = init_params(kp)
    query = jax.random.normal(kq, (N_BATCH, LEN_Q, D_MODEL), jnp.float32)
    input_flatten = jax.random.normal(kf, (N_BATCH, LEN_IN, D_MODEL), jnp.float32)
    reference_points = jax.random.uniform(kr, (N_BATCH, LEN_Q, N_LEVELS, 2),
                                          jnp.float32)
    input_spatial_shapes = jnp.array(SPATIAL_SHAPES, dtype=jnp.int32)
    input_level_start_index = jnp.array(LEVEL_START, dtype=jnp.int32)

    out = msdeform_attn_forward(params, query, reference_points, input_flatten,
                                input_spatial_shapes, input_level_start_index,
                                input_padding_mask=None)
    out = jax.block_until_ready(out)
    assert out.shape == (N_BATCH, LEN_Q, D_MODEL)

    ref = reference_forward(params, query, reference_points, input_flatten,
                            input_spatial_shapes)
    ref = jax.block_until_ready(ref)
    if not jnp.allclose(out, ref, rtol=2e-3, atol=2e-3):
        raise AssertionError(
            "mismatch vs reference, max abs diff = %f"
            % float(jnp.max(jnp.abs(out - ref))))

    print("KERNEL_OK")
</pallas_src>

<mosaic_0001>
module attributes {stable_mosaic.version = 11 : i64} {
  func.func @kernel(%arg0: i32, %arg1: memref<1x80x32xf32, #tpu.memory_space<vmem>>, %arg2: memref<1x8x32xf32, #tpu.memory_space<vmem>>, %arg3: memref<1x8x4xf32, #tpu.memory_space<vmem>>, %arg4: memref<32x32xf32, #tpu.memory_space<vmem>>, %arg5: memref<1x32xf32, #tpu.memory_space<vmem>>, %arg6: memref<32x96xf32, #tpu.memory_space<vmem>>, %arg7: memref<1x96xf32, #tpu.memory_space<vmem>>, %arg8: memref<32x32xf32, #tpu.memory_space<vmem>>, %arg9: memref<1x32xf32, #tpu.memory_space<vmem>>, %arg10: memref<1x8x32xf32, #tpu.memory_space<vmem>>) attributes {dimension_semantics = [#tpu.dimension_semantics<parallel>], iteration_bounds = array<i64: 2>, scalar_prefetch = 0 : i64, scratch_operands = 0 : i64, tpu.core_type = #tpu.core_type<tc>, window_params = [{transform_indices = @transform_0, window_bounds = array<i64: 1, 80, 32>}, {transform_indices = @transform_1, window_bounds = array<i64: 1, 8, 32>}, {transform_indices = @transform_2, window_bounds = array<i64: 1, 8, 4>}, {pipeline_mode = #tpu.pipeline_mode<synchronous>, transform_indices = @transform_3, window_bounds = array<i64: 32, 32>}, {pipeline_mode = #tpu.pipeline_mode<synchronous>, transform_indices = @transform_4, window_bounds = array<i64: 1, 32>}, {pipeline_mode = #tpu.pipeline_mode<synchronous>, transform_indices = @transform_5, window_bounds = array<i64: 32, 96>}, {pipeline_mode = #tpu.pipeline_mode<synchronous>, transform_indices = @transform_6, window_bounds = array<i64: 1, 96>}, {pipeline_mode = #tpu.pipeline_mode<synchronous>, transform_indices = @transform_7, window_bounds = array<i64: 32, 32>}, {pipeline_mode = #tpu.pipeline_mode<synchronous>, transform_indices = @transform_8, window_bounds = array<i64: 1, 32>}, {transform_indices = @transform_9, window_bounds = array<i64: 1, 8, 32>}]} {
    %c0 = arith.constant 0 : index
    %c0_0 = arith.constant 0 : index
    %c0_1 = arith.constant 0 : index
    %0 = vector.load %arg1[%c0, %c0_0, %c0_1] : memref<1x80x32xf32, #tpu.memory_space<vmem>>, vector<1x80x32xf32>
    %1 = vector.shape_cast %0 : vector<1x80x32xf32> to vector<80x32xf32>
    %c0_2 = arith.constant 0 : index
    %c0_3 = arith.constant 0 : index
    %2 = vector.load %arg4[%c0_2, %c0_3] : memref<32x32xf32, #tpu.memory_space<vmem>>, vector<32x32xf32>
    %cst = arith.constant dense<0.000000e+00> : vector<80x32xf32>
    %3 = tpu.matmul %1, %2, %cst {dimension_numbers = #tpu.dot_dimension_numbers<[1], [0], [0], [1], [0, 0, 1, 1], [], []>} : vector<80x32xf32>, vector<32x32xf32>, vector<80x32xf32> -> vector<80x32xf32>
    %c0_4 = arith.constant 0 : index
    %c0_5 = arith.constant 0 : index
    %4 = vector.load %arg5[%c0_4, %c0_5] : memref<1x32xf32, #tpu.memory_space<vmem>>, vector<1x32xf32>
    %5 = vector.broadcast %4 : vector<1x32xf32> to vector<80x32xf32>
    %6 = arith.addf %3, %5 : vector<80x32xf32>
    %c0_6 = arith.constant 0 : index
    %c0_7 = arith.constant 0 : index
    %c0_8 = arith.constant 0 : index
    %7 = vector.load %arg2[%c0_6, %c0_7, %c0_8] : memref<1x8x32xf32, #tpu.memory_space<vmem>>, vector<1x8x32xf32>
    %8 = vector.shape_cast %7 : vector<1x8x32xf32> to vector<8x32xf32>
    %c0_9 = arith.constant 0 : index
    %c0_10 = arith.constant 0 : index
    %9 = vector.load %arg6[%c0_9, %c0_10] : memref<32x96xf32, #tpu.memory_space<vmem>>, vector<32x96xf32>
    %cst_11 = arith.constant dense<0.000000e+00> : vector<8x96xf32>
    %10 = tpu.matmul %8, %9, %cst_11 {dimension_numbers = #tpu.dot_dimension_numbers<[1], [0], [0], [1], [0, 0, 1, 1], [], []>} : vector<8x32xf32>, vector<32x96xf32>, vector<8x96xf32> -> vector<8x96xf32>
    %c0_12 = arith.constant 0 : index
    %c0_13 = arith.constant 0 : index
    %11 = vector.load %arg7[%c0_12, %c0_13] : memref<1x96xf32, #tpu.memory_space<vmem>>, vector<1x96xf32>
    %12 = vector.broadcast %11 : vector<1x96xf32> to vector<8x96xf32>
    %13 = arith.addf %10, %12 : vector<8x96xf32>
    %14 = vector.extract_strided_slice %13 {offsets = [0, 64], sizes = [8, 32], strides = [1, 1]} : vector<8x96xf32> to vector<8x32xf32>
    %c8_i32 = arith.constant 8 : i32
    %15 = vector.broadcast %c8_i32 : i32 to vector<1x4xi32>
    %c8_i32_14 = arith.constant 8 : i32
    %16 = vector.broadcast %c8_i32_14 : i32 to vector<1x4xi32>
    %c0_i32 = arith.constant 0 : i32
    %17 = vector.broadcast %c0_i32 : i32 to vector<1x4xi32>
    %c4_i32 = arith.constant 4 : i32
    %18 = vector.broadcast %c4_i32 : i32 to vector<1x4xi32>
    %c4_i32_15 = arith.constant 4 : i32
    %19 = vector.broadcast %c4_i32_15 : i32 to vector<1x4xi32>
    %c64_i32 = arith.constant 64 : i32
    %20 = vector.broadcast %c64_i32 : i32 to vector<1x4xi32>
    %c8_i32_16 = arith.constant 8 : i32
    %21 = vector.broadcast %c8_i32_16 : i32 to vector<1x4xi32>
    %c8_i32_17 = arith.constant 8 : i32
    %22 = vector.broadcast %c8_i32_17 : i32 to vector<1x4xi32>
    %c0_i32_18 = arith.constant 0 : i32
    %23 = vector.broadcast %c0_i32_18 : i32 to vector<1x4xi32>
    %c4_i32_19 = arith.constant 4 : i32
    %24 = vector.broadcast %c4_i32_19 : i32 to vector<1x4xi32>
    %c4_i32_20 = arith.constant 4 : i32
    %25 = vector.broadcast %c4_i32_20 : i32 to vector<1x4xi32>
    %c64_i32_21 = arith.constant 64 : i32
    %26 = vector.broadcast %c64_i32_21 : i32 to vector<1x4xi32>
    %c8_i32_22 = arith.constant 8 : i32
    %27 = vector.broadcast %c8_i32_22 : i32 to vector<1x4xi32>
    %c8_i32_23 = arith.constant 8 : i32
    %28 = vector.broadcast %c8_i32_23 : i32 to vector<1x4xi32>
    %c0_i32_24 = arith.constant 0 : i32
    %29 = vector.broadcast %c0_i32_24 : i32 to vector<1x4xi32>
    %c4_i32_25 = arith.constant 4 : i32
    %30 = vector.broadcast %c4_i32_25 : i32 to vector<1x4xi32>
    %c4_i32_26 = arith.constant 4 : i32
    %31 = vector.broadcast %c4_i32_26 : i32 to vector<1x4xi32>
    %c64_i32_27 = arith.constant 64 : i32
    %32 = vector.broadcast %c64_i32_27 : i32 to vector<1x4xi32>
    %c8_i32_28 = arith.constant 8 : i32
    %33 = vector.broadcast %c8_i32_28 : i32 to vector<1x4xi32>
    %c8_i32_29 = arith.constant 8 : i32
    %34 = vector.broadcast %c8_i32_29 : i32 to vector<1x4xi32>
    %c0_i32_30 = arith.constant 0 : i32
    %35 = vector.broadcast %c0_i32_30 : i32 to vector<1x4xi32>
    %c4_i32_31 = arith.constant 4 : i32
    %36 = vector.broadcast %c4_i32_31 : i32 to vector<1x4xi32>
    %c4_i32_32 = arith.constant 4 : i32
    %37 = vector.broadcast %c4_i32_32 : i32 to vector<1x4xi32>
    %c64_i32_33 = arith.constant 64 : i32
    %38 = vector.broadcast %c64_i32_33 : i32 to vector<1x4xi32>
    %39 = tpu.concatenate %15, %18, %21, %24, %27, %30, %33, %36 in 1 : vector<1x4xi32>, vector<1x4xi32>, vector<1x4xi32>, vector<1x4xi32>, vector<1x4xi32>, vector<1x4xi32>, vector<1x4xi32>, vector<1x4xi32> -> vector<1x32xi32>
    %40 = tpu.concatenate %16, %19, %22, %25, %28, %31, %34, %37 in 1 : vector<1x4xi32>, vector<1x4xi32>, vector<1x4xi32>, vector<1x4xi32>, vector<1x4xi32>, vector<1x4xi32>, vector<1x4xi32>, vector<1x4xi32> -> vector<1x32xi32>
    %41 = tpu.concatenate %17, %20, %23, %26, %29, %32, %35, %38 in 1 : vector<1x4xi32>, vector<1x4xi32>, vector<1x4xi32>, vector<1x4xi32>, vector<1x4xi32>, vector<1x4xi32>, vector<1x4xi32>, vector<1x4xi32> -> vector<1x32xi32>
    %c0_34 = arith.constant 0 : index
    %c0_35 = arith.constant 0 : index
    %c0_36 = arith.constant 0 : index
    %42 = vector.load %arg3[%c0_34, %c0_35, %c0_36] : memref<1x8x4xf32, #tpu.memory_space<vmem>>, vector<1x8x4xf32>
    %43 = vector.shape_cast %42 : vector<1x8x4xf32> to vector<8x4xf32>
    %44 = vector.extract_strided_slice %43 {offsets = [0, 0], sizes = [8, 1], strides = [1, 1]} : vector<8x4xf32> to vector<8x1xf32>
    %cst_37 = arith.constant 8.000000e+00 : f32
    %45 = vector.broadcast %cst_37 : f32 to vector<8x1xf32>
    %46 = arith.mulf %44, %45 : vector<8x1xf32>
    %47 = vector.extract_strided_slice %43 {offsets = [0, 1], sizes = [8, 1], strides = [1, 1]} : vector<8x4xf32> to vector<8x1xf32>
    %cst_38 = arith.constant 8.000000e+00 : f32
    %48 = vector.broadcast %cst_38 : f32 to vector<8x1xf32>
    %49 = arith.mulf %47, %48 : vector<8x1xf32>
    %50 = vector.shape_cast %46 : vector<8x1xf32> to vector<8x1xf32>
    %51 = vector.broadcast %50 : vector<8x1xf32> to vector<8x4xf32>
    %52 = vector.shape_cast %49 : vector<8x1xf32> to vector<8x1xf32>
    %53 = vector.broadcast %52 : vector<8x1xf32> to vector<8x4xf32>
    %54 = vector.extract_strided_slice %43 {offsets = [0, 2], sizes = [8, 1], strides = [1, 1]} : vector<8x4xf32> to vector<8x1xf32>
    %cst_39 = arith.constant 4.000000e+00 : f32
    %55 = vector.broadcast %cst_39 : f32 to vector<8x1xf32>
    %56 = arith.mulf %54, %55 : vector<8x1xf32>
    %57 = vector.extract_strided_slice %43 {offsets = [0, 3], sizes = [8, 1], strides = [1, 1]} : vector<8x4xf32> to vector<8x1xf32>
    %cst_40 = arith.constant 4.000000e+00 : f32
    %58 = vector.broadcast %cst_40 : f32 to vector<8x1xf32>
    %59 = arith.mulf %57, %58 : vector<8x1xf32>
    %60 = vector.shape_cast %56 : vector<8x1xf32> to vector<8x1xf32>
    %61 = vector.broadcast %60 : vector<8x1xf32> to vector<8x4xf32>
    %62 = vector.shape_cast %59 : vector<8x1xf32> to vector<8x1xf32>
    %63 = vector.broadcast %62 : vector<8x1xf32> to vector<8x4xf32>
    %64 = tpu.concatenate %51, %61 in 1 : vector<8x4xf32>, vector<8x4xf32> -> vector<8x8xf32>
    %65 = tpu.concatenate %53, %63 in 1 : vector<8x4xf32>, vector<8x4xf32> -> vector<8x8xf32>
    %66 = tpu.concatenate %64, %64, %64, %64, %65, %65, %65, %65 in 1 : vector<8x8xf32>, vector<8x8xf32>, vector<8x8xf32>, vector<8x8xf32>, vector<8x8xf32>, vector<8x8xf32>, vector<8x8xf32>, vector<8x8xf32> -> vector<8x64xf32>
    %67 = vector.extract_strided_slice %13 {offsets = [0, 0], sizes = [8, 64], strides = [1, 1]} : vector<8x96xf32> to vector<8x64xf32>
    %68 = arith.addf %67, %66 : vector<8x64xf32>
    %cst_41 = arith.constant 5.000000e-01 : f32
    %69 = vector.broadcast %cst_41 : f32 to vector<8x64xf32>
    %70 = arith.subf %68, %69 : vector<8x64xf32>
    %71 = math.floor %70 : vector<8x64xf32>
    %72 = arith.subf %70, %71 : vector<8x64xf32>
    %73 = arith.fptosi %71 : vector<8x64xf32> to vector<8x64xi32>
    %74 = vector.extract_strided_slice %73 {offsets = [0, 0], sizes = [8, 32], strides = [1, 1]} : vector<8x64xi32> to vector<8x32xi32>
    %75 = vector.extract_strided_slice %73 {offsets = [0, 32], sizes = [8, 32], strides = [1, 1]} : vector<8x64xi32> to vector<8x32xi32>
    %76 = vector.extract_strided_slice %72 {offsets = [0, 0], sizes = [8, 32], strides = [1, 1]} : vector<8x64xf32> to vector<8x32xf32>
    %77 = vector.extract_strided_slice %72 {offsets = [0, 32], sizes = [8, 32], strides = [1, 1]} : vector<8x64xf32> to vector<8x32xf32>
    %78 = vector.extract_strided_slice %14 {offsets = [0, 0], sizes = [8, 8], strides = [1, 1]} : vector<8x32xf32> to vector<8x8xf32>
    %cst_42 = arith.constant dense<0xFF800000> : vector<8xf32>
    %79 = vector.multi_reduction <maximumf>, %78, %cst_42 [1] : vector<8x8xf32> to vector<8xf32>
    %80 = vector.shape_cast %79 : vector<8xf32> to vector<8x1xf32>
    %81 = vector.shape_cast %80 : vector<8x1xf32> to vector<8x1xf32>
    %82 = vector.broadcast %81 : vector<8x1xf32> to vector<8x8xf32>
    %83 = vector.extract_strided_slice %14 {offsets = [0, 8], sizes = [8, 8], strides = [1, 1]} : vector<8x32xf32> to vector<8x8xf32>
    %cst_43 = arith.constant dense<0xFF800000> : vector<8xf32>
    %84 = vector.multi_reduction <maximumf>, %83, %cst_43 [1] : vector<8x8xf32> to vector<8xf32>
    %85 = vector.shape_cast %84 : vector<8xf32> to vector<8x1xf32>
    %86 = vector.shape_cast %85 : vector<8x1xf32> to vector<8x1xf32>
    %87 = vector.broadcast %86 : vector<8x1xf32> to vector<8x8xf32>
    %88 = vector.extract_strided_slice %14 {offsets = [0, 16], sizes = [8, 8], strides = [1, 1]} : vector<8x32xf32> to vector<8x8xf32>
    %cst_44 = arith.constant dense<0xFF800000> : vector<8xf32>
    %89 = vector.multi_reduction <maximumf>, %88, %cst_44 [1] : vector<8x8xf32> to vector<8xf32>
    %90 = vector.shape_cast %89 : vector<8xf32> to vector<8x1xf32>
    %91 = vector.shape_cast %90 : vector<8x1xf32> to vector<8x1xf32>
    %92 = vector.broadcast %91 : vector<8x1xf32> to vector<8x8xf32>
    %93 = vector.extract_strided_slice %14 {offsets = [0, 24], sizes = [8, 8], strides = [1, 1]} : vector<8x32xf32> to vector<8x8xf32>
    %cst_45 = arith.constant dense<0xFF800000> : vector<8xf32>
    %94 = vector.multi_reduction <maximumf>, %93, %cst_45 [1] : vector<8x8xf32> to vector<8xf32>
    %95 = vector.shape_cast %94 : vector<8xf32> to vector<8x1xf32>
    %96 = vector.shape_cast %95 : vector<8x1xf32> to vector<8x1xf32>
    %97 = vector.broadcast %96 : vector<8x1xf32> to vector<8x8xf32>
    %98 = tpu.concatenate %82, %87, %92, %97 in 1 : vector<8x8xf32>, vector<8x8xf32>, vector<8x8xf32>, vector<8x8xf32> -> vector<8x32xf32>
    %99 = arith.subf %14, %98 : vector<8x32xf32>
    %100 = math.exp %99 : vector<8x32xf32>
    %101 = vector.extract_strided_slice %100 {offsets = [0, 0], sizes = [8, 8], strides = [1, 1]} : vector<8x32xf32> to vector<8x8xf32>
    %cst_46 = arith.constant dense<0.000000e+00> : vector<8xf32>
    %102 = vector.multi_reduction <add>, %101, %cst_46 [1] : vector<8x8xf32> to vector<8xf32>
    %103 = vector.shape_cast %102 : vector<8xf32> to vector<8x1xf32>
    %cst_47 = arith.constant 1.000000e+00 : f32
    %104 = vector.broadcast %cst_47 : f32 to vector<8x1xf32>
    %105 = arith.divf %104, %103 : vector<8x1xf32>
    %106 = vector.shape_cast %105 : vector<8x1xf32> to vector<8x1xf32>
    %107 = vector.broadcast %106 : vector<8x1xf32> to vector<8x8xf32>
    %108 = vector.extract_strided_slice %100 {offsets = [0, 8], sizes = [8, 8], strides = [1, 1]} : vector<8x32xf32> to vector<8x8xf32>
    %cst_48 = arith.constant dense<0.000000e+00> : vector<8xf32>
    %109 = vector.multi_reduction <add>, %108, %cst_48 [1] : vector<8x8xf32> to vector<8xf32>
    %110 = vector.shape_cast %109 : vector<8xf32> to vector<8x1xf32>
    %cst_49 = arith.constant 1.000000e+00 : f32
    %111 = vector.broadcast %cst_49 : f32 to vector<8x1xf32>
    %112 = arith.divf %111, %110 : vector<8x1xf32>
    %113 = vector.shape_cast %112 : vector<8x1xf32> to vector<8x1xf32>
    %114 = vector.broadcast %113 : vector<8x1xf32> to vector<8x8xf32>
    %115 = vector.extract_strided_slice %100 {offsets = [0, 16], sizes = [8, 8], strides = [1, 1]} : vector<8x32xf32> to vector<8x8xf32>
    %cst_50 = arith.constant dense<0.000000e+00> : vector<8xf32>
    %116 = vector.multi_reduction <add>, %115, %cst_50 [1] : vector<8x8xf32> to vector<8xf32>
    %117 = vector.shape_cast %116 : vector<8xf32> to vector<8x1xf32>
    %cst_51 = arith.constant 1.000000e+00 : f32
    %118 = vector.broadcast %cst_51 : f32 to vector<8x1xf32>
    %119 = arith.divf %118, %117 : vector<8x1xf32>
    %120 = vector.shape_cast %119 : vector<8x1xf32> to vector<8x1xf32>
    %121 = vector.broadcast %120 : vector<8x1xf32> to vector<8x8xf32>
    %122 = vector.extract_strided_slice %100 {offsets = [0, 24], sizes = [8, 8], strides = [1, 1]} : vector<8x32xf32> to vector<8x8xf32>
    %cst_52 = arith.constant dense<0.000000e+00> : vector<8xf32>
    %123 = vector.multi_reduction <add>, %122, %cst_52 [1] : vector<8x8xf32> to vector<8xf32>
    %124 = vector.shape_cast %123 : vector<8xf32> to vector<8x1xf32>
    %cst_53 = arith.constant 1.000000e+00 : f32
    %125 = vector.broadcast %cst_53 : f32 to vector<8x1xf32>
    %126 = arith.divf %125, %124 : vector<8x1xf32>
    %127 = vector.shape_cast %126 : vector<8x1xf32> to vector<8x1xf32>
    %128 = vector.broadcast %127 : vector<8x1xf32> to vector<8x8xf32>
    %129 = tpu.concatenate %107, %114, %121, %128 in 1 : vector<8x8xf32>, vector<8x8xf32>, vector<8x8xf32>, vector<8x8xf32> -> vector<8x32xf32>
    %130 = arith.mulf %100, %129 : vector<8x32xf32>
    %131 = tpu.iota {dimensions = array<i32: 2>} : vector<8x32x80xi32>
    %c0_i32_54 = arith.constant 0 : i32
    %132 = vector.broadcast %c0_i32_54 : i32 to vector<8x32xi32>
    %133 = arith.addi %74, %132 : vector<8x32xi32>
    %c0_i32_55 = arith.constant 0 : i32
    %134 = vector.broadcast %c0_i32_55 : i32 to vector<8x32xi32>
    %135 = arith.addi %75, %134 : vector<8x32xi32>
    %cst_56 = arith.constant 1.000000e+00 : f32
    %136 = vector.broadcast %cst_56 : f32 to vector<8x32xf32>
    %137 = arith.subf %136, %76 : vector<8x32xf32>
    %cst_57 = arith.constant 1.000000e+00 : f32
    %138 = vector.broadcast %cst_57 : f32 to vector<8x32xf32>
    %139 = arith.subf %138, %77 : vector<8x32xf32>
    %c0_i32_58 = arith.constant 0 : i32
    %140 = vector.broadcast %c0_i32_58 : i32 to vector<8x32xi32>
    %141 = arith.cmpi sge, %133, %140 : vector<8x32xi32>
    %142 = vector.broadcast %39 : vector<1x32xi32> to vector<8x32xi32>
    %143 = arith.cmpi slt, %133, %142 : vector<8x32xi32>
    %144 = arith.andi %141, %143 : vector<8x32xi1>
    %c0_i32_59 = arith.constant 0 : i32
    %145 = vector.broadcast %c0_i32_59 : i32 to vector<8x32xi32>
    %146 = arith.cmpi sge, %135, %145 : vector<8x32xi32>
    %147 = arith.andi %144, %146 : vector<8x32xi1>
    %148 = vector.broadcast %40 : vector<1x32xi32> to vector<8x32xi32>
    %149 = arith.cmpi slt, %135, %148 : vector<8x32xi32>
    %150 = arith.andi %147, %149 : vector<8x32xi1>
    %151 = vector.broadcast %39 : vector<1x32xi32> to vector<8x32xi32>
    %152 = arith.muli %135, %151 : vector<8x32xi32>
    %153 = vector.broadcast %41 : vector<1x32xi32> to vector<8x32xi32>
    %154 = arith.addi %153, %152 : vector<8x32xi32>
    %155 = arith.addi %154, %133 : vector<8x32xi32>
    %156 = arith.mulf %137, %139 : vector<8x32xf32>
    %157 = arith.mulf %130, %156 : vector<8x32xf32>
    %158 = arith.extui %150 : vector<8x32xi1> to vector<8x32xi32>
    %159 = arith.sitofp %158 : vector<8x32xi32> to vector<8x32xf32>
    %160 = arith.mulf %157, %159 : vector<8x32xf32>
    %161 = vector.shape_cast %155 : vector<8x32xi32> to vector<8x32x1xi32>
    %162 = vector.broadcast %161 : vector<8x32x1xi32> to vector<8x32x80xi32>
    %163 = arith.cmpi eq, %162, %131 : vector<8x32x80xi32>
    %164 = vector.shape_cast %160 : vector<8x32xf32> to vector<8x32x1xf32>
    %cst_60 = arith.constant 0.000000e+00 : f32
    %165 = vector.shape_cast %164 : vector<8x32x1xf32> to vector<8x32x1xf32>
    %166 = vector.broadcast %165 : vector<8x32x1xf32> to vector<8x32x80xf32>
    %167 = vector.broadcast %cst_60 : f32 to vector<8x32x80xf32>
    %168 = arith.select %163, %166, %167 : vector<8x32x80xi1>, vector<8x32x80xf32>
    %c0_i32_61 = arith.constant 0 : i32
    %169 = vector.broadcast %c0_i32_61 : i32 to vector<8x32xi32>
    %170 = arith.addi %74, %169 : vector<8x32xi32>
    %c1_i32 = arith.constant 1 : i32
    %171 = vector.broadcast %c1_i32 : i32 to vector<8x32xi32>
    %172 = arith.addi %75, %171 : vector<8x32xi32>
    %cst_62 = arith.constant 1.000000e+00 : f32
    %173 = vector.broadcast %cst_62 : f32 to vector<8x32xf32>
    %174 = arith.subf %173, %76 : vector<8x32xf32>
    %c0_i32_63 = arith.constant 0 : i32
    %175 = vector.broadcast %c0_i32_63 : i32 to vector<8x32xi32>
    %176 = arith.cmpi sge, %170, %175 : vector<8x32xi32>
    %177 = vector.broadcast %39 : vector<1x32xi32> to vector<8x32xi32>
    %178 = arith.cmpi slt, %170, %177 : vector<8x32xi32>
    %179 = arith.andi %176, %178 : vector<8x32xi1>
    %c0_i32_64 = arith.constant 0 : i32
    %180 = vector.broadcast %c0_i32_64 : i32 to vector<8x32xi32>
    %181 = arith.cmpi sge, %172, %180 : vector<8x32xi32>
    %182 = arith.andi %179, %181 : vector<8x32xi1>
    %183 = vector.broadcast %40 : vector<1x32xi32> to vector<8x32xi32>
    %184 = arith.cmpi slt, %172, %183 : vector<8x32xi32>
    %185 = arith.andi %182, %184 : vector<8x32xi1>
    %186 = vector.broadcast %39 : vector<1x32xi32> to vector<8x32xi32>
    %187 = arith.muli %172, %186 : vector<8x32xi32>
    %188 = vector.broadcast %41 : vector<1x32xi32> to vector<8x32xi32>
    %189 = arith.addi %188, %187 : vector<8x32xi32>
    %190 = arith.addi %189, %170 : vector<8x32xi32>
    %191 = arith.mulf %174, %77 : vector<8x32xf32>
    %192 = arith.mulf %130, %191 : vector<8x32xf32>
    %193 = arith.extui %185 : vector<8x32xi1> to vector<8x32xi32>
    %194 = arith.sitofp %193 : vector<8x32xi32> to vector<8x32xf32>
    %195 = arith.mulf %192, %194 : vector<8x32xf32>
    %196 = vector.shape_cast %190 : vector<8x32xi32> to vector<8x32x1xi32>
    %197 = vector.broadcast %196 : vector<8x32x1xi32> to vector<8x32x80xi32>
    %198 = arith.cmpi eq, %197, %131 : vector<8x32x80xi32>
    %199 = vector.shape_cast %195 : vector<8x32xf32> to vector<8x32x1xf32>
    %cst_65 = arith.constant 0.000000e+00 : f32
    %200 = vector.shape_cast %199 : vector<8x32x1xf32> to vector<8x32x1xf32>
    %201 = vector.broadcast %200 : vector<8x32x1xf32> to vector<8x32x80xf32>
    %202 = vector.broadcast %cst_65 : f32 to vector<8x32x80xf32>
    %203 = arith.select %198, %201, %202 : vector<8x32x80xi1>, vector<8x32x80xf32>
    %204 = arith.addf %168, %203 : vector<8x32x80xf32>
    %c1_i32_66 = arith.constant 1 : i32
    %205 = vector.broadcast %c1_i32_66 : i32 to vector<8x32xi32>
    %206 = arith.addi %74, %205 : vector<8x32xi32>
    %c0_i32_67 = arith.constant 0 : i32
    %207 = vector.broadcast %c0_i32_67 : i32 to vector<8x32xi32>
    %208 = arith.addi %75, %207 : vector<8x32xi32>
    %cst_68 = arith.constant 1.000000e+00 : f32
    %209 = vector.broadcast %cst_68 : f32 to vector<8x32xf32>
    %210 = arith.subf %209, %77 : vector<8x32xf32>
    %c0_i32_69 = arith.constant 0 : i32
    %211 = vector.broadcast %c0_i32_69 : i32 to vector<8x32xi32>
    %212 = arith.cmpi sge, %206, %211 : vector<8x32xi32>
    %213 = vector.broadcast %39 : vector<1x32xi32> to vector<8x32xi32>
    %214 = arith.cmpi slt, %206, %213 : vector<8x32xi32>
    %215 = arith.andi %212, %214 : vector<8x32xi1>
    %c0_i32_70 = arith.constant 0 : i32
    %216 = vector.broadcast %c0_i32_70 : i32 to vector<8x32xi32>
    %217 = arith.cmpi sge, %208, %216 : vector<8x32xi32>
    %218 = arith.andi %215, %217 : vector<8x32xi1>
    %219 = vector.broadcast %40 : vector<1x32xi32> to vector<8x32xi32>
    %220 = arith.cmpi slt, %208, %219 : vector<8x32xi32>
    %221 = arith.andi %218, %220 : vector<8x32xi1>
    %222 = vector.broadcast %39 : vector<1x32xi32> to vector<8x32xi32>
    %223 = arith.muli %208, %222 : vector<8x32xi32>
    %224 = vector.broadcast %41 : vector<1x32xi32> to vector<8x32xi32>
    %225 = arith.addi %224, %223 : vector<8x32xi32>
    %226 = arith.addi %225, %206 : vector<8x32xi32>
    %227 = arith.mulf %76, %210 : vector<8x32xf32>
    %228 = arith.mulf %130, %227 : vector<8x32xf32>
    %229 = arith.extui %221 : vector<8x32xi1> to vector<8x32xi32>
    %230 = arith.sitofp %229 : vector<8x32xi32> to vector<8x32xf32>
    %231 = arith.mulf %228, %230 : vector<8x32xf32>
    %232 = vector.shape_cast %226 : vector<8x32xi32> to vector<8x32x1xi32>
    %233 = vector.broadcast %232 : vector<8x32x1xi32> to vector<8x32x80xi32>
    %234 = arith.cmpi eq, %233, %131 : vector<8x32x80xi32>
    %235 = vector.shape_cast %231 : vector<8x32xf32> to vector<8x32x1xf32>
    %cst_71 = arith.constant 0.000000e+00 : f32
    %236 = vector.shape_cast %235 : vector<8x32x1xf32> to vector<8x32x1xf32>
    %237 = vector.broadcast %236 : vector<8x32x1xf32> to vector<8x32x80xf32>
    %238 = vector.broadcast %cst_71 : f32 to vector<8x32x80xf32>
    %239 = arith.select %234, %237, %238 : vector<8x32x80xi1>, vector<8x32x80xf32>
    %240 = arith.addf %204, %239 : vector<8x32x80xf32>
    %c1_i32_72 = arith.constant 1 : i32
    %241 = vector.broadcast %c1_i32_72 : i32 to vector<8x32xi32>
    %242 = arith.addi %74, %241 : vector<8x32xi32>
    %c1_i32_73 = arith.constant 1 : i32
    %243 = vector.broadcast %c1_i32_73 : i32 to vector<8x32xi32>
    %244 = arith.addi %75, %243 : vector<8x32xi32>
    %c0_i32_74 = arith.constant 0 : i32
    %245 = vector.broadcast %c0_i32_74 : i32 to vector<8x32xi32>
    %246 = arith.cmpi sge, %242, %245 : vector<8x32xi32>
    %247 = vector.broadcast %39 : vector<1x32xi32> to vector<8x32xi32>
    %248 = arith.cmpi slt, %242, %247 : vector<8x32xi32>
    %249 = arith.andi %246, %248 : vector<8x32xi1>
    %c0_i32_75 = arith.constant 0 : i32
    %250 = vector.broadcast %c0_i32_75 : i32 to vector<8x32xi32>
    %251 = arith.cmpi sge, %244, %250 : vector<8x32xi32>
    %252 = arith.andi %249, %251 : vector<8x32xi1>
    %253 = vector.broadcast %40 : vector<1x32xi32> to vector<8x32xi32>
    %254 = arith.cmpi slt, %244, %253 : vector<8x32xi32>
    %255 = arith.andi %252, %254 : vector<8x32xi1>
    %256 = vector.broadcast %39 : vector<1x32xi32> to vector<8x32xi32>
    %257 = arith.muli %244, %256 : vector<8x32xi32>
    %258 = vector.broadcast %41 : vector<1x32xi32> to vector<8x32xi32>
    %259 = arith.addi %258, %257 : vector<8x32xi32>
    %260 = arith.addi %259, %242 : vector<8x32xi32>
    %261 = arith.mulf %76, %77 : vector<8x32xf32>
    %262 = arith.mulf %130, %261 : vector<8x32xf32>
    %263 = arith.extui %255 : vector<8x32xi1> to vector<8x32xi32>
    %264 = arith.sitofp %263 : vector<8x32xi32> to vector<8x32xf32>
    %265 = arith.mulf %262, %264 : vector<8x32xf32>
    %266 = vector.shape_cast %260 : vector<8x32xi32> to vector<8x32x1xi32>
    %267 = vector.broadcast %266 : vector<8x32x1xi32> to vector<8x32x80xi32>
    %268 = arith.cmpi eq, %267, %131 : vector<8x32x80xi32>
    %269 = vector.shape_cast %265 : vector<8x32xf32> to vector<8x32x1xf32>
    %cst_76 = arith.constant 0.000000e+00 : f32
    %270 = vector.shape_cast %269 : vector<8x32x1xf32> to vector<8x32x1xf32>
    %271 = vector.broadcast %270 : vector<8x32x1xf32> to vector<8x32x80xf32>
    %272 = vector.broadcast %cst_76 : f32 to vector<8x32x80xf32>
    %273 = arith.select %268, %271, %272 : vector<8x32x80xi1>, vector<8x32x80xf32>
    %274 = arith.addf %240, %273 : vector<8x32x80xf32>
    %275 = vector.shape_cast %274 : vector<8x32x80xf32> to vector<8x4x8x80xf32>
    %cst_77 = arith.constant dense<0.000000e+00> : vector<8x4x80xf32>
    %276 = vector.multi_reduction <add>, %275, %cst_77 [2] : vector<8x4x8x80xf32> to vector<8x4x80xf32>
    %277 = tpu.iota {dimensions = array<i32: 1>} : vector<1x32xi32>
    %278 = vector.extract_strided_slice %276 {offsets = [0, 0, 0], sizes = [8, 1, 80], strides = [1, 1, 1]} : vector<8x4x80xf32> to vector<8x1x80xf32>
    %279 = vector.shape_cast %278 : vector<8x1x80xf32> to vector<8x80xf32>
    %280 = vector.extract_strided_slice %276 {offsets = [0, 1, 0], sizes = [8, 1, 80], strides = [1, 1, 1]} : vector<8x4x80xf32> to vector<8x1x80xf32>
    %281 = vector.shape_cast %280 : vector<8x1x80xf32> to vector<8x80xf32>
    %282 = vector.extract_strided_slice %276 {offsets = [0, 2, 0], sizes = [8, 1, 80], strides = [1, 1, 1]} : vector<8x4x80xf32> to vector<8x1x80xf32>
    %283 = vector.shape_cast %282 : vector<8x1x80xf32> to vector<8x80xf32>
    %284 = vector.extract_strided_slice %276 {offsets = [0, 3, 0], sizes = [8, 1, 80], strides = [1, 1, 1]} : vector<8x4x80xf32> to vector<8x1x80xf32>
    %285 = vector.shape_cast %284 : vector<8x1x80xf32> to vector<8x80xf32>
    %286 = tpu.concatenate %279, %281, %283, %285 in 1 : vector<8x80xf32>, vector<8x80xf32>, vector<8x80xf32>, vector<8x80xf32> -> vector<8x320xf32>
    %c0_i32_78 = arith.constant 0 : i32
    %287 = vector.broadcast %c0_i32_78 : i32 to vector<1x32xi32>
    %288 = arith.cmpi sge, %277, %287 : vector<1x32xi32>
    %c8_i32_79 = arith.constant 8 : i32
    %289 = vector.broadcast %c8_i32_79 : i32 to vector<1x32xi32>
    %290 = arith.cmpi slt, %277, %289 : vector<1x32xi32>
    %291 = arith.andi %288, %290 : vector<1x32xi1>
    %292 = arith.extui %291 : vector<1x32xi1> to vector<1x32xi32>
    %293 = arith.sitofp %292 : vector<1x32xi32> to vector<1x32xf32>
    %294 = vector.broadcast %293 : vector<1x32xf32> to vector<80x32xf32>
    %295 = arith.mulf %6, %294 : vector<80x32xf32>
    %c8_i32_80 = arith.constant 8 : i32
    %296 = vector.broadcast %c8_i32_80 : i32 to vector<1x32xi32>
    %297 = arith.cmpi sge, %277, %296 : vector<1x32xi32>
    %c16_i32 = arith.constant 16 : i32
    %298 = vector.broadcast %c16_i32 : i32 to vector<1x32xi32>
    %299 = arith.cmpi slt, %277, %298 : vector<1x32xi32>
    %300 = arith.andi %297, %299 : vector<1x32xi1>
    %301 = arith.extui %300 : vector<1x32xi1> to vector<1x32xi32>
    %302 = arith.sitofp %301 : vector<1x32xi32> to vector<1x32xf32>
    %303 = vector.broadcast %302 : vector<1x32xf32> to vector<80x32xf32>
    %304 = arith.mulf %6, %303 : vector<80x32xf32>
    %c16_i32_81 = arith.constant 16 : i32
    %305 = vector.broadcast %c16_i32_81 : i32 to vector<1x32xi32>
    %306 = arith.cmpi sge, %277, %305 : vector<1x32xi32>
    %c24_i32 = arith.constant 24 : i32
    %307 = vector.broadcast %c24_i32 : i32 to vector<1x32xi32>
    %308 = arith.cmpi slt, %277, %307 : vector<1x32xi32>
    %309 = arith.andi %306, %308 : vector<1x32xi1>
    %310 = arith.extui %309 : vector<1x32xi1> to vector<1x32xi32>
    %311 = arith.sitofp %310 : vector<1x32xi32> to vector<1x32xf32>
    %312 = vector.broadcast %311 : vector<1x32xf32> to vector<80x32xf32>
    %313 = arith.mulf %6, %312 : vector<80x32xf32>
    %c24_i32_82 = arith.constant 24 : i32
    %314 = vector.broadcast %c24_i32_82 : i32 to vector<1x32xi32>
    %315 = arith.cmpi sge, %277, %314 : vector<1x32xi32>
    %c32_i32 = arith.constant 32 : i32
    %316 = vector.broadcast %c32_i32 : i32 to vector<1x32xi32>
    %317 = arith.cmpi slt, %277, %316 : vector<1x32xi32>
    %318 = arith.andi %315, %317 : vector<1x32xi1>
    %319 = arith.extui %318 : vector<1x32xi1> to vector<1x32xi32>
    %320 = arith.sitofp %319 : vector<1x32xi32> to vector<1x32xf32>
    %321 = vector.broadcast %320 : vector<1x32xf32> to vector<80x32xf32>
    %322 = arith.mulf %6, %321 : vector<80x32xf32>
    %323 = tpu.concatenate %295, %304, %313, %322 in 0 : vector<80x32xf32>, vector<80x32xf32>, vector<80x32xf32>, vector<80x32xf32> -> vector<320x32xf32>
    %cst_83 = arith.constant dense<0.000000e+00> : vector<8x32xf32>
    %324 = tpu.matmul %286, %323, %cst_83 {dimension_numbers = #tpu.dot_dimension_numbers<[1], [0], [0], [1], [0, 0, 1, 1], [], []>} : vector<8x320xf32>, vector<320x32xf32>, vector<8x32xf32> -> vector<8x32xf32>
    %c0_84 = arith.constant 0 : index
    %c0_85 = arith.constant 0 : index
    %325 = vector.load %arg8[%c0_84, %c0_85] : memref<32x32xf32, #tpu.memory_space<vmem>>, vector<32x32xf32>
    %cst_86 = arith.constant dense<0.000000e+00> : vector<8x32xf32>
    %326 = tpu.matmul %324, %325, %cst_86 {dimension_numbers = #tpu.dot_dimension_numbers<[1], [0], [0], [1], [0, 0, 1, 1], [], []>} : vector<8x32xf32>, vector<32x32xf32>, vector<8x32xf32> -> vector<8x32xf32>
    %c0_87 = arith.constant 0 : index
    %c0_88 = arith.constant 0 : index
    %327 = vector.load %arg9[%c0_87, %c0_88] : memref<1x32xf32, #tpu.memory_space<vmem>>, vector<1x32xf32>
    %328 = vector.broadcast %327 : vector<1x32xf32> to vector<8x32xf32>
    %329 = arith.addf %326, %328 : vector<8x32xf32>
    %330 = vector.shape_cast %329 : vector<8x32xf32> to vector<1x8x32xf32>
    %c0_89 = arith.constant 0 : index
    %c0_90 = arith.constant 0 : index
    %c0_91 = arith.constant 0 : index
    %331 = vector.load %arg10[%c0_89, %c0_90, %c0_91] : memref<1x8x32xf32, #tpu.memory_space<vmem>>, vector<1x8x32xf32>
    tpu.vector_store %arg10[%c0_89, %c0_90, %c0_91], %330 {strides = array<i32>} : memref<1x8x32xf32, #tpu.memory_space<vmem>>, vector<1x8x32xf32>,
    return
  }
  func.func @transform_0(%arg0: i32) -> (i32, i32, i32) {
    %c0_i32 = arith.constant 0 : i32
    %c0_i32_0 = arith.constant 0 : i32
    %c0_i32_1 = arith.constant 0 : i32
    return %arg0, %c0_i32, %c0_i32_0 : i32, i32, i32
  }
  func.func @transform_1(%arg0: i32) -> (i32, i32, i32) {
    %c0_i32 = arith.constant 0 : i32
    %c0_i32_0 = arith.constant 0 : i32
    %c0_i32_1 = arith.constant 0 : i32
    return %arg0, %c0_i32, %c0_i32_0 : i32, i32, i32
  }
  func.func @transform_2(%arg0: i32) -> (i32, i32, i32) {
    %c0_i32 = arith.constant 0 : i32
    %c0_i32_0 = arith.constant 0 : i32
    %c0_i32_1 = arith.constant 0 : i32
    return %arg0, %c0_i32, %c0_i32_0 : i32, i32, i32
  }
  func.func @transform_3(%arg0: i32) -> (i32, i32) {
    %c0_i32 = arith.constant 0 : i32
    %c0_i32_0 = arith.constant 0 : i32
    %c0_i32_1 = arith.constant 0 : i32
    return %c0_i32, %c0_i32_0 : i32, i32
  }
  func.func @transform_4(%arg0: i32) -> (i32, i32) {
    %c0_i32 = arith.constant 0 : i32
    %c0_i32_0 = arith.constant 0 : i32
    %c0_i32_1 = arith.constant 0 : i32
    return %c0_i32, %c0_i32_0 : i32, i32
  }
  func.func @transform_5(%arg0: i32) -> (i32, i32) {
    %c0_i32 = arith.constant 0 : i32
    %c0_i32_0 = arith.constant 0 : i32
    %c0_i32_1 = arith.constant 0 : i32
    return %c0_i32, %c0_i32_0 : i32, i32
  }
  func.func @transform_6(%arg0: i32) -> (i32, i32) {
    %c0_i32 = arith.constant 0 : i32
    %c0_i32_0 = arith.constant 0 : i32
    %c0_i32_1 = arith.constant 0 : i32
    return %c0_i32, %c0_i32_0 : i32, i32
  }
  func.func @transform_7(%arg0: i32) -> (i32, i32) {
    %c0_i32 = arith.constant 0 : i32
    %c0_i32_0 = arith.constant 0 : i32
    %c0_i32_1 = arith.constant 0 : i32
    return %c0_i32, %c0_i32_0 : i32, i32
  }
  func.func @transform_8(%arg0: i32) -> (i32, i32) {
    %c0_i32 = arith.constant 0 : i32
    %c0_i32_0 = arith.constant 0 : i32
    %c0_i32_1 = arith.constant 0 : i32
    return %c0_i32, %c0_i32_0 : i32, i32
  }
  func.func @transform_9(%arg0: i32) -> (i32, i32, i32) {
    %c0_i32 = arith.constant 0 : i32
    %c0_i32_0 = arith.constant 0 : i32
    %c0_i32_1 = arith.constant 0 : i32
    return %arg0, %c0_i32, %c0_i32_0 : i32, i32, i32
  }
}

</mosaic_0001>

<bundles_post_ra>
// kernel: msdeform_attn_forward.1
= control target key start
LH: loop header
LB: loop body
LE: loop exit
PB: predicated region body
PF: predicated region fallthrough
CT: control target
= control target key end

     0   :  { %14 = vsyncpa [#allocation3], 0  ;;  %s5783_s0 = inlined_call_operand.vmem [shape: f32[2,80,32], index: 0, kind: input, shape index: {}]   ;;  %s5784_s1 = inlined_call_operand.vmem [shape: f32[2,8,32], index: 1, kind: input, shape index: {}]   ;;  %s5785_s2 = inlined_call_operand.vmem [shape: f32[2,8,4], index: 2, kind: input, shape index: {}]   ;;  %s5786_s3 = inlined_call_operand.vmem [shape: f32[32,32], index: 3, kind: input, shape index: {}]   ;;  %s5787_s4 = inlined_call_operand.vmem [shape: f32[1,32], index: 4, kind: input, shape index: {}]   ;;  %s5788_s5 = inlined_call_operand.vmem [shape: f32[32,96], index: 5, kind: input, shape index: {}]   ;;  %s5789_s6 = inlined_call_operand.vmem [shape: f32[1,96], index: 6, kind: input, shape index: {}]   ;;  %s5790_s7 = inlined_call_operand.vmem [shape: f32[32,32], index: 7, kind: input, shape index: {}]   ;;  %s5791_s8 = inlined_call_operand.vmem [shape: f32[1,32], index: 8, kind: input, shape index: {}]   ;;  %s5792_s9 = inlined_call_operand.hbm [shape: f32[2,8,32], index: 9, kind: output, shape index: {}]  }
   0x1   :  { %16 = vsyncpa [#allocation3 + $0x1], 0  ;;  %s3629_s30 = smov 0   ;;  %s3631_s10 = smov 0  }
   0x2   :  { %s3633_s11 = smov 0   ;;  %s3635_s12 = smov 0  }
   0x3 LB: > { %s3650_s13 = sadd.s32 4294967295, %s3556_s12   ;;  %s3175_s14 = sadd.s32 4294967294, %s3556_s12   ;;  %s3556_s12 = sphi %s3635_s12, %s6250_s12   ;;  %s3552_s11 = sphi %s3633_s11, %s6249_s11   ;;  %s3548_s10 = sphi %s3631_s10, %s6248_s10   ;;  %s3544_s30 = sphi %s3629_s30, %s6247_s30  }
   0x4   : > { %s3654_s15 = sadd.s32 1, %s3556_s12   ;;  %s233_s16 = sadd.s32 1, %s3552_s11 }
   0x5   : > { %s230_s17 = ssub.s32 %s3556_s12, %s3654_s15  ;;  %p243_p0 = scmp.ne.s32.totalorder %s3552_s11, %s3548_s10 }
   0x6   : > { %p231_p1 = scmp.eq.s32.totalorder %s230_s17, 0  ;;  %p244_p2 = scmp.eq.s32.totalorder %s3650_s13, 1 }
   0x7   : > { %p249_p3 = scmp.ne.s32.totalorder %s3548_s10, %s3544_s30  ;;  %p250_p4 = scmp.eq.s32.totalorder %s3175_s14, 1 }
   0x8   : > { %s3665_s18 = scalar_select %p231_p1, %s3552_s11, %s233_s16  }
   0x9   : > { %p3667_p5 = por %p244_p2, %p243_p0  ;;  %p3671_p6 = por %p250_p4, %p249_p3 }
   0xa   : > { %p3178_p7 = scmp.ge.s32.totalorder %s3556_s12, 1  ;;  %p308_p8 = scmp.lt.s32.totalorder %s3556_s12, 3 }
   0xc   : > { %p309_p9 = pnand %p3178_p7, %p308_p8 }
   0xe   : > { %312 = sbr.rel (%p309_p9) target bundleno = 1999 (0x7cf), region = 56 }
  0x15   : > { %v533_v0 = vld [vmem:[%s5788_s5] sm:$0xff]  ;;  %v534_v1 = vld [vmem:[%s5788_s5 + $0x8] sm:$0xff]  ;;  %v535_v2 = vld [vmem:[%s5788_s5 + $0x10] sm:$0xff]  ;;  %v5796_v3 = vmov 0.0|0.0   ;;  %v3559_v6 = vmov 0   ;;  %p352_p10 = scmp.lt.s32.totalorder %s3650_s13, 1  ;;  %v5800_v18 = vlaneseq }
  0x16   : > { %3352 = vmatprep.subr.bf16.mxu1 %v5796_v3  ;;  %v3353_v4 = vpack.c.bf16 %v534_v1, %v533_v0  ;;  %v536_v5 = vld [vmem:[%s5788_s5 + $0x18] sm:$0xff]  ;;  %3470 = vset.pattern.permute.xlu1 %v3559_v6  ;;  %vm5793_vm0 = vmmov 0   ;;  %v5798_v7 = vmov 0.0   ;;  %vm617_vm1 = vcmask 31744   ;;  %s3566_s25 = smov 32   ;;  %s3567_s26 = smov 16  }
  0x17   : > { %3311 = vmatprep.mubr.msk.f32.mxu1 %vm5793_vm0, %v5798_v7  ;;  %v3356_v8 = vpack.c.bf16 %v536_v5, %v535_v2  ;;  %s3695_s29 = scalar_select %p352_p10, %s3650_s13, 1  ;;  %v3562_v9 = vmov 3   ;;  %vm619_vm2 = vcmask 64512   ;;  %v3563_v10 = vmov 4   ;;  %v3194_v34 = vld [vmem:[%s5789_s6] ss:$0 sm:$0xff] }
  0x18   : > { %3354 = vmatpush3.bf16.msra.mxu1 %v3353_v4  ;;  %3473 = vset.pattern.permute.xlu0 %v3562_v9  ;;  %v618_v11 = vsel %vm617_vm1, 8, %v3563_v10  ;;  %vm621_vm3 = vcmask 97280   ;;  %vm623_vm4 = vcmask 130048   ;;  %vm5794_vm5 = vcmask 261120   ;;  %s3568_s27 = smov 8   ;;  %s3569_s28 = smov 24  }
  0x19   : > { %3355 = vmatprep.subr.bf16.mxu1 %v5796_v3  ;;  %s3181_s14 = sshll.u32 %s3695_s29, 3  ;;  %v620_v12 = vsel %vm619_vm2, %v618_v11, 8  ;;  %vm625_vm6 = vcmask 162816   ;;  %vm5795_vm7 = vcmask 195584   ;;  %v3715_v21 = vshrl.u32 %v5800_v18, 7  ;;  %s3571_s16 = smov 48  }
  0x1a   : > { %s364_s21 = scalar_lea.vmem %s5785_s2, %s3181_s14  ;;  %s360_s24 = scalar_lea.vmem %s5784_s1, %s3181_s14  ;;  %v622_v13 = vsel %vm621_vm3, %v620_v12, 4  ;;  %v3564_v22 = vmov 2   ;;  %vm629_vm8 = vcmask 228352   ;;  %v3565_v26 = vmov 1  }
  0x1b   : > { %v638_v14 = vld [vmem:[%s364_s21] sm:$0xff]  ;;  %v624_v17 = vsel %vm623_vm4, %v622_v13, 8  ;;  %v3719_v24 = vsub.s32 0, %v3715_v21  ;;  %s3570_s14 = smov 40   ;;  %s3572_s17 = smov 56   ;;  %vm699_vm9 = vcmask 589312  }
  0x1c   : > { %3357 = vmatpush3.bf16.msra.mxu1 %v3356_v8  ;;  %v532_v15 = vld [vmem:[%s360_s24] sm:$0xff]  ;;  %v639_v16 = vmul.f32 8.0, %v638_v14  ;;  %v649_v19 = vmul.f32 4.0, %v638_v14  ;;  %v626_v20 = vsel %vm625_vm6, %v624_v17, 4  ;;  %vm707_vm10 = vcmask 720512   ;;  %s3573_s23 = smov 96  }
  0x1d   : > { %3390 = vmatprep.subr.bf16.mxu1 %v5796_v3  ;;  %v628_v23 = vsel %vm5795_vm7, %v626_v20, 8  ;;  %vm703_vm11 = vcmask 654912   ;;  %vm711_vm12 = vcmask 786112   ;;  %vm688_vm13 = vcmask 326656   ;;  %s3574_s24 = smov 64  }
  0x1e   : > { %642 = vperm.xlu1 %3470, %v639_v16   ;;  %656 = vperm.xlu0 %3473, %v649_v19   ;;  %v630_v25 = vsel %vm629_vm8, %v628_v23, 4  ;;  %vm690_vm14 = vcmask 392192   ;;  %vm692_vm15 = vcmask 457728   ;;  %v3575_v17 = vmov 64  }
  0x1f   : > { %3312 = vmatmul.mubr.msk.f32.vlgmr.msra.gmra.mrb[0].mxu1 %vm5794_vm5, %v532_v15  ;;  %v3723_v27 = vrot.slane %v630_v25, %v3719_v24 }
  0x20   : > { %3330 = vmatprep.mubr.msk.f32.mxu1 %vm5793_vm0, %v5798_v7 }
  0x22   : > { %3471 = vset.pattern.permute.xlu1 %v3564_v22 }
  0x23   : > { %652 = vperm.xlu1 %3471, %v649_v19   ;;  %v631_v19 = vsel %vm617_vm1, 0, %v3575_v17 }
  0x24   : > { %v632_v20 = vsel %vm619_vm2, %v631_v19, 0 }
  0x27   : > { %3472 = vset.pattern.permute.xlu1 %v3565_v26 }
  0x28   : > { %646 = vperm.xlu1 %3472, %v639_v16  }
  0x2c   : > { %781 = vrot.lane.b32.xlu1 %v3723_v27, %s3566_s25 }
  0x9d   : > { %v643_v28 = vpop.permute.xlu1 %642  ;;  %v657_v31 = vpop.permute.xlu0 %656 }
  0xa2   : > { %v653_v29 = vpop.permute.xlu1 %652 }
  0xa3   : > { %v659_v30 = vsel %vm617_vm1, %v643_v28, %v653_v29 }
  0xa4   : > { %665 = vrot.lane.b32.xlu1 %v659_v30, %s3567_s26  ;;  %662 = vrot.lane.b32.xlu0 %v659_v30, %s3568_s27  ;;  %s349_s27 = sand.u32 1, %s3548_s10  }
  0xa7   : > { %v647_v32 = vpop.permute.xlu1 %646 }
  0xa8   : > { %v660_v33 = vsel %vm617_vm1, %v647_v32, %v657_v31  ;;  %668 = vrot.lane.b32.xlu0 %v659_v30, %s3569_s28  ;;  %s3179_s28 = sshll.u32 %s349_s27, 3 }
  0xa9   : > { %672 = vrot.lane.b32.xlu1 %v660_v33, %s3566_s25 }
  0xab   : > { %v782_v42 = vpop.permute.xlu1 %781 }
  0xac   : > { %675 = vrot.lane.b32.xlu0 %v660_v33, %s3570_s14 }
  0xad   : > { %678 = vrot.lane.b32.xlu1 %v660_v33, %s3571_s16 }
  0xb0   : > { %681 = vrot.lane.b32.xlu0 %v660_v33, %s3572_s17 }
  0xf2   : > { %v613_v35 = vpop.f32.mrb[0].mxu1 }
  0xf3   : > { %v3736_v36 = vadd.f32 %v3194_v34, %v613_v35  ;;  %v3313_v37 = vpop.f32.mrb[1].mxu1 }
  0xf5   : > { %v700_v38 = vsel %vm699_vm9, %v3736_v36, -inf  ;;  %v708_v39 = vsel %vm707_vm10, %v3736_v36, -inf  ;;  %v704_v40 = vsel %vm703_vm11, %v3736_v36, -inf  ;;  %v712_v41 = vsel %vm711_vm12, %v3736_v36, -inf }
  0xf6   : > { %701 = vmax.xlane.f32.xlu0 %v700_v38  ;;  %709 = vmax.xlane.f32.xlu1 %v708_v39 }
  0xfa   : > { %705 = vmax.xlane.f32.xlu0 %v704_v40  ;;  %713 = vmax.xlane.f32.xlu1 %v712_v41 }
 0x116   : > { %v663_v43 = vpop.permute.xlu0 %662  ;;  %v666_v44 = vpop.permute.xlu1 %665 }
 0x117   : > { %v684_v45 = vsel %vm619_vm2, %v659_v30, %v663_v43  ;;  %v3800_v43 = vsub.s32 1, %v3715_v21 }
 0x118   : > { %v685_v46 = vsel %vm623_vm4, %v684_v45, %v666_v44 }
 0x11a   : > { %v669_v47 = vpop.permute.xlu0 %668 }
 0x11b   : > { %v686_v48 = vsel %vm5795_vm7, %v685_v46, %v669_v47  ;;  %v673_v49 = vpop.permute.xlu1 %672 }
 0x11c   : > { %v687_v50 = vsel %vm5794_vm5, %v686_v48, %v673_v49 }
 0x11e   : > { %v676_v51 = vpop.permute.xlu0 %675 }
 0x11f   : > { %v689_v52 = vsel %vm688_vm13, %v687_v50, %v676_v51  ;;  %v679_v53 = vpop.permute.xlu1 %678  ;;  %v3811_v51 = vsub.s32 2, %v3715_v21 }
 0x120   : > { %v691_v54 = vsel %vm690_vm14, %v689_v52, %v679_v53  ;;  %v3817_v53 = vsub.s32 3, %v3715_v21 }
 0x122   : > { %v682_v55 = vpop.permute.xlu0 %681 }
 0x123   : > { %v693_v56 = vsel %vm692_vm15, %v691_v54, %v682_v55 }
 0x124   : > { %v694_v57 = vadd.f32 %v693_v56, %v3736_v36 }
 0x126   : > { %v3196_v58 = vadd.f32 -0.5, %v694_v57 }
 0x128   : > { %v696_v59 = vfloor.f32 %v3196_v58 }
 0x12a   : > { %v697_v60 = vsub.f32 %v3196_v58, %v696_v59  ;;  %v3409_v61 = vtrunc.f32 %v696_v59  ;;  %v3831_v58 = vsub.s32 4, %v3715_v21 }
 0x12c   : > { %v3747_v62 = vcvt.f32.s32 %v3409_v61  ;;  %1210 = vrot.lane.b32.xlu1 %v697_v60, %s3573_s23  ;;  %v768_v63 = vsub.f32 1.0, %v697_v60  ;;  %v3841_v61 = vsub.s32 5, %v3715_v21 }
 0x12e   : > { %vm769_vm9 = vcmp.ge.s32.totalorder %v3747_v62, 0  ;;  %vm783_vm10 = vcmp.lt.s32.totalorder %v3747_v62, %v782_v42  ;;  %v3755_v1 = vadd.s32 1, %v3747_v62  ;;  %v789_v2 = vmul.u32 %v3747_v62, %v782_v42 }
 0x12f   : > { %v776_v0 = vsel %vm769_vm9, 1, %v3559_v6  ;;  %v784_v4 = vsel %vm783_vm10, 1, %v3559_v6  ;;  %vm774_vm1 = vcmp.lt.s32.totalorder %v3747_v62, %v3723_v27 }
 0x130   : > { %777 = vrot.lane.b32.xlu0 %v776_v0, %s3573_s23  ;;  %799 = vrot.lane.b32.xlu1 %v768_v63, %s3573_s23  ;;  %vm1192_vm11 = vcmp.ge.s32.totalorder %v3755_v1, 0  ;;  %v1204_v5 = vmul.u32 %v3755_v1, %v782_v42  ;;  %vm1198_vm12 = vcmp.lt.s32.totalorder %v3755_v1, %v782_v42 }
 0x131   : > { %v1193_v8 = vsel %vm1192_vm11, 1, %v3559_v6  ;;  %v1199_v9 = vsel %vm1198_vm12, 1, %v3559_v6  ;;  %v633_v6 = vsel %vm621_vm3, %v632_v20, 64  ;;  %vm1634_vm3 = vcmp.lt.s32.totalorder %v3755_v1, %v3723_v27 }
 0x132   : > { %v634_v22 = vsel %vm623_vm4, %v633_v6, 0  ;;  %vm1635_vm13 = vmand %vm1192_vm11, %vm1634_vm3 }
 0x133   : > { %v635_v23 = vsel %vm625_vm6, %v634_v22, 64 }
 0x134   : > { %785 = vrot.lane.b32.xlu0 %v784_v4, %s3573_s23  ;;  %794 = vrot.lane.b32.xlu1 %v789_v2, %s3573_s23  ;;  %v636_v25 = vsel %vm5795_vm7, %v635_v23, 0  ;;  %v3847_v2 = vsub.s32 6, %v3715_v21 }
 0x135   : > { %v637_v29 = vsel %vm629_vm8, %v636_v25, 64  ;;  %vm775_vm8 = vmand %vm769_vm9, %vm774_vm1 }
 0x136   : > { %v3779_v34 = vrot.slane %v637_v29, %v3719_v24 }
 0x138   : > { %1205 = vrot.lane.b32.xlu0 %v1204_v5, %s3573_s23  ;;  %1194 = vrot.lane.b32.xlu1 %v1193_v8, %s3573_s23  ;;  %v3853_v8 = vsub.s32 7, %v3715_v21 }
 0x13c   : > { %1200 = vrot.lane.b32.xlu1 %v1199_v9, %s3573_s23 }
 0x183   : > { %v702_v10 = vpop.xlane.xlu0 %701  ;;  %v710_v11 = vpop.xlane.xlu1 %709 }
 0x187   : > { %v706_v12 = vpop.xlane.xlu0 %705  ;;  %v714_v13 = vpop.xlane.xlu1 %713 }
 0x188   : > { %v715_v14 = vsel %vm619_vm2, %v702_v10, %v706_v12 }
 0x189   : > { %v716_v15 = vsel %vm623_vm4, %v715_v14, %v710_v11 }
 0x18a   : > { %v717_v16 = vsel %vm5795_vm7, %v716_v15, %v714_v13 }
 0x18b   : > { %719 = vrot.lane.b32.xlu0 %v717_v16, %s3574_s24 }
 0x19e   : > { %v1211_v26 = vpop.permute.xlu1 %1210 }
 0x19f   : > { %v1213_v28 = vmul.f32 %v1211_v26, %v768_v63  ;;  %v2063_v32 = vmul.f32 %v1211_v26, %v697_v60 }
 0x1a1   : > { %1215 = vrot.lane.b32.xlu0 %v1213_v28, %s3574_s24 }
 0x1a2   : > { %v778_v30 = vpop.permute.xlu0 %777  ;;  %v800_v31 = vpop.permute.xlu1 %799 }
 0x1a3   : > { %v802_v33 = vmul.f32 %v800_v31, %v768_v63  ;;  %v1639_v37 = vmul.f32 %v800_v31, %v697_v60  ;;  %vm779_vm6 = vcmp.ne.s32.totalorder %v778_v30, 0 }
 0x1a4   : > { %vm780_vm15 = vmand %vm775_vm8, %vm779_vm6 }
 0x1a5   : > { %804 = vrot.lane.b32.xlu1 %v802_v33, %s3574_s24  ;;  %2065 = vrot.lane.b32.xlu0 %v2063_v32, %s3574_s24  ;;  %vm1636_vm12 = vmand %vm1635_vm13, %vm779_vm6 }
 0x1a6   : > { %v795_v35 = vpop.permute.xlu1 %794  ;;  %v786_v38 = vpop.permute.xlu0 %785 }
 0x1a7   : > { %v796_v39 = vadd.s32 %v795_v35, %v3779_v34  ;;  %vm787_vm14 = vcmp.ne.s32.totalorder %v786_v38, 0 }
 0x1a8   : > { %vm788_vm0 = vmand %vm780_vm15, %vm787_vm14 }
 0x1a9   : > { %v3791_v40 = vadd.s32 %v3747_v62, %v796_v39  ;;  %1641 = vrot.lane.b32.xlu0 %v1639_v37, %s3574_s24  ;;  %v3197_v44 = vsel %vm788_vm0, 1.0, %v5798_v7  ;;  %vm1637_vm3 = vmand %vm1636_vm12, %vm787_vm14  ;;  %v1638_v54 = vadd.s32 %v3755_v1, %v796_v39  ;;  %vm6007_vm0 = vcmask 195584  }
 0x1aa   : > { %v1195_v41 = vpop.permute.xlu1 %1194  ;;  %v3199_v49 = vsel %vm1637_vm3, 1.0, %v5798_v7  ;;  %v1206_v21 = vpop.permute.xlu0 %1205 }
 0x1ab   : > { %vm1196_vm10 = vcmp.ne.s32.totalorder %v1195_v41, 0  ;;  %v818_v27 = vrot.slane %v3791_v40, %v3719_v24  ;;  %v837_v48 = vrot.slane %v3791_v40, %v3800_v43  ;;  %v856_v52 = vrot.slane %v3791_v40, %v3811_v51 }
 0x1ac   : > { %vm1197_vm9 = vmand %vm775_vm8, %vm1196_vm10  ;;  %v3822_v55 = vrot.slane %v3791_v40, %v3817_v53  ;;  %v3826_v56 = vrot.slane %v1638_v54, %v3719_v24  ;;  %v1674_v57 = vrot.slane %v1638_v54, %v3800_v43  ;;  %v894_v59 = vrot.slane %v3791_v40, %v3831_v58 }
 0x1ad   : > { %824 = vbcast.lane.b32.xlu0 %v818_v27, 264  ;;  %vm2060_vm1 = vmand %vm1635_vm13, %vm1196_vm10  ;;  %v1693_v60 = vrot.slane %v1638_v54, %v3811_v51  ;;  %v913_v63 = vrot.slane %v3791_v40, %v3841_v61  ;;  %v1712_v0 = vrot.slane %v1638_v54, %v3817_v53  ;;  %v932_v4 = vrot.slane %v3791_v40, %v3847_v2 }
 0x1ae   : > { %v1201_v42 = vpop.permute.xlu1 %1200  ;;  %v1731_v5 = vrot.slane %v1638_v54, %v3831_v58  ;;  %v951_v9 = vrot.slane %v3791_v40, %v3853_v8  ;;  %v1750_v10 = vrot.slane %v1638_v54, %v3841_v61  ;;  %v1769_v11 = vrot.slane %v1638_v54, %v3847_v2 }
 0x1af   : > { %vm1202_vm5 = vcmp.ne.s32.totalorder %v1201_v42, 0  ;;  %v1788_v13 = vrot.slane %v1638_v54, %v3853_v8  ;;  %v1207_v20 = vadd.s32 %v1206_v21, %v3779_v34 }
 0x1b0   : > { %vm1203_vm7 = vmand %vm1197_vm9, %vm1202_vm5 }
 0x1b1   : > { %v3198_v45 = vsel %vm1203_vm7, 1.0, %v5798_v7  ;;  %vm2061_vm11 = vmand %vm2060_vm1, %vm1202_vm5  ;;  %832 = vbcast.lane.b32.xlu0 %v818_v27, 280  ;;  %v3880_v23 = vadd.s32 %v3747_v62, %v1207_v20 }
 0x1b2   : > { %v3474_v46 = vpack.i.bf16 %v3198_v45, %v3197_v44  ;;  %v3200_v47 = vsel %vm2061_vm11, 1.0, %v5798_v7 }
 0x1b3   : > { %v3479_v50 = vpack.i.bf16 %v3200_v47, %v3199_v49  ;;  %v3890_v29 = vrot.slane %v3880_v23, %v3719_v24  ;;  %v3899_v62 = vrot.slane %v3880_v23, %v3800_v43  ;;  %v3913_v37 = vrot.slane %v3880_v23, %v3811_v51 }
 0x1b4   : > { %3475 = vrot.lane.b32.xlu1 %v3474_v46, %s3574_s24  ;;  %v3922_v40 = vrot.slane %v3880_v23, %v3817_v53  ;;  %v3938_v45 = vrot.slane %v3880_v23, %v3831_v58  ;;  %v3951_v49 = vadd.s32 %v1207_v20, %v3755_v1  ;;  %v4013_v20 = vrot.slane %v3880_v23, %v3853_v8 }
 0x1b5   : > { %843 = vbcast.lane.b32.xlu0 %v837_v48, 264 }
 0x1b6   : > { %v4023_v18 = vrot.slane %v3951_v49, %v3817_v53 }
 0x1b8   : > { %3480 = vrot.lane.b32.xlu1 %v3479_v50, %s3574_s24 }
 0x1b9   : > { %851 = vbcast.lane.b32.xlu0 %v837_v48, 280 }
 0x1bc   : > { %820 = vbcast.lane.b32.xlu1 %v818_v27, 256 }
 0x1bd   : > { %862 = vbcast.lane.b32.xlu0 %v856_v52, 264 }
 0x1c0   : > { %828 = vbcast.lane.b32.xlu1 %v818_v27, 272 }
 0x1c1   : > { %870 = vbcast.lane.b32.xlu0 %v856_v52, 280 }
 0x1c4   : > { %839 = vbcast.lane.b32.xlu1 %v837_v48, 256 }
 0x1c5   : > { %885 = vbcast.lane.b32.xlu0 %v3822_v55, 272 }
 0x1c8   : > { %847 = vbcast.lane.b32.xlu1 %v837_v48, 272 }
 0x1c9   : > { %1661 = vbcast.lane.b32.xlu0 %v3826_v56, 264 }
 0x1cc   : > { %858 = vbcast.lane.b32.xlu1 %v856_v52, 256 }
 0x1cd   : > { %1680 = vbcast.lane.b32.xlu0 %v1674_v57, 264 }
 0x1d0   : > { %866 = vbcast.lane.b32.xlu1 %v856_v52, 272  ;;  %v3957_v52 = vrot.slane %v3880_v23, %v3841_v61 }
 0x1d1   : > { %889 = vbcast.lane.b32.xlu0 %v3822_v55, 280 }
 0x1d4   : > { %881 = vbcast.lane.b32.xlu1 %v3822_v55, 264 }
 0x1d5   : > { %904 = vbcast.lane.b32.xlu0 %v894_v59, 272 }
 0x1d8   : > { %1665 = vbcast.lane.b32.xlu1 %v3826_v56, 272 }
 0x1d9   : > { %1669 = vbcast.lane.b32.xlu0 %v3826_v56, 280 }
 0x1dc   : > { %1684 = vbcast.lane.b32.xlu1 %v1674_v57, 272 }
 0x1dd   : > { %1699 = vbcast.lane.b32.xlu0 %v1693_v60, 264 }
 0x1e0   : > { %900 = vbcast.lane.b32.xlu1 %v894_v59, 264 }
 0x1e1   : > { %908 = vbcast.lane.b32.xlu0 %v894_v59, 280 }
 0x1e4   : > { %1688 = vbcast.lane.b32.xlu1 %v1674_v57, 280 }
 0x1e5   : > { %923 = vbcast.lane.b32.xlu0 %v913_v63, 272 }
 0x1e8   : > { %1703 = vbcast.lane.b32.xlu1 %v1693_v60, 272 }
 0x1e9   : > { %1707 = vbcast.lane.b32.xlu0 %v1693_v60, 280 }
 0x1ec   : > { %919 = vbcast.lane.b32.xlu1 %v913_v63, 264 }
 0x1ed   : > { %1722 = vbcast.lane.b32.xlu0 %v1712_v0, 272 }
 0x1f0   : > { %1718 = vbcast.lane.b32.xlu1 %v1712_v0, 264 }
 0x1f1   : > { %938 = vbcast.lane.b32.xlu0 %v932_v4, 264 }
 0x1f4   : > { %927 = vbcast.lane.b32.xlu1 %v913_v63, 280 }
 0x1f5   : > { %1737 = vbcast.lane.b32.xlu0 %v1731_v5, 264 }
 0x1f8   : > { %942 = vbcast.lane.b32.xlu1 %v932_v4, 272 }
 0x1f9   : > { %957 = vbcast.lane.b32.xlu0 %v951_v9, 264 }
 0x1fc   : > { %1726 = vbcast.lane.b32.xlu1 %v1712_v0, 280 }
 0x1fd   : > { %1756 = vbcast.lane.b32.xlu0 %v1750_v10, 264  ;;  %v3859_v12 = vpop.permute.xlu0 %719 }
 0x200   : > { %1741 = vbcast.lane.b32.xlu1 %v1731_v5, 272 }
 0x201   : > { %965 = vbcast.lane.b32.xlu0 %v951_v9, 280 }
 0x204   : > { %946 = vbcast.lane.b32.xlu1 %v932_v4, 280 }
 0x205   : > { %1764 = vbcast.lane.b32.xlu0 %v1750_v10, 280 }
 0x208   : > { %961 = vbcast.lane.b32.xlu1 %v951_v9, 272 }
 0x209   : > { %1779 = vbcast.lane.b32.xlu0 %v1769_v11, 272 }
 0x20c   : > { %1745 = vbcast.lane.b32.xlu1 %v1731_v5, 280 }
 0x20d   : > { %1783 = vbcast.lane.b32.xlu0 %v1769_v11, 280 }
 0x210   : > { %1760 = vbcast.lane.b32.xlu1 %v1750_v10, 272 }
 0x211   : > { %1798 = vbcast.lane.b32.xlu0 %v1788_v13, 272 }
 0x213   : > { %v3862_v14 = vpop.permute.xlu0 %1215 }
 0x214   : > { %1775 = vbcast.lane.b32.xlu1 %v1769_v11, 264 }
 0x215   : > { %1802 = vbcast.lane.b32.xlu0 %v1788_v13, 280 }
 0x217   : > { %v3864_v15 = vpop.permute.xlu0 %2065  ;;  %v3872_v19 = vpop.permute.xlu1 %804 }
 0x218   : > { %1794 = vbcast.lane.b32.xlu1 %v1788_v13, 264 }
 0x219   : > { %1676 = vbcast.lane.b32.xlu0 %v1674_v57, 256 }
 0x21b   : > { %v3866_v16 = vpop.permute.xlu0 %1641 }
 0x21c   : > { %877 = vbcast.lane.b32.xlu1 %v3822_v55, 256 }
 0x21d   : > { %915 = vbcast.lane.b32.xlu0 %v913_v63, 256 }
 0x21f   : > { %v3869_v17 = vpop.permute.xlu0 %824 }
 0x220   : > { %1657 = vbcast.lane.b32.xlu1 %v3826_v56, 256  ;;  %v3967_v56 = vrot.slane %v3951_v49, %v3719_v24 }
 0x221   : > { %1714 = vbcast.lane.b32.xlu0 %v1712_v0, 256  ;;  %v3987_v0 = vrot.slane %v3880_v23, %v3847_v2 }
 0x223   : > { %v3875_v6 = vpop.permute.xlu0 %832 }
 0x224   : > { %5906 = vst [vmem:[#allocation5_spill] sm:$0xff] %v3875_v6  ;;  %896 = vbcast.lane.b32.xlu1 %v894_v59, 256  ;;  %v3977_v59 = vrot.slane %v3951_v49, %v3800_v43 }
 0x225   : > { %934 = vbcast.lane.b32.xlu0 %v932_v4, 256 }
 0x226   : > { %v3877_v22 = vpop.permute.xlu1 %3475 }
 0x227   : > { %v3882_v25 = vpop.permute.xlu0 %843 }
 0x228   : > { %1695 = vbcast.lane.b32.xlu1 %v1693_v60, 256 }
 0x229   : > { %1733 = vbcast.lane.b32.xlu0 %v1731_v5, 256 }
 0x22a   : > { %v3884_v26 = vpop.permute.xlu1 %3480 }
 0x22b   : > { %v3886_v28 = vpop.permute.xlu0 %851 }
 0x22c   : > { %953 = vbcast.lane.b32.xlu1 %v951_v9, 256 }
 0x22d   : > { %1239 = vbcast.lane.b32.xlu0 %v3890_v29, 272 }
 0x22e   : > { %v3893_v30 = vpop.permute.xlu1 %820 }
 0x22f   : > { %5907 = vst [vmem:[#allocation6_spill] sm:$0xff] %v3893_v30  ;;  %v3895_v31 = vpop.permute.xlu0 %862 }
 0x230   : > { %5908 = vst [vmem:[#allocation7_spill] sm:$0xff] %v3895_v31  ;;  %1752 = vbcast.lane.b32.xlu1 %v1750_v10, 256  ;;  %v3483_v31 = vunpack.i.h.bf16 %v3884_v26 }
 0x231   : > { %1258 = vbcast.lane.b32.xlu0 %v3899_v62, 272 }
 0x232   : > { %v3902_v32 = vpop.permute.xlu1 %828 }
 0x233   : > { %v3904_v33 = vpop.permute.xlu0 %870 }
 0x234   : > { %5909 = vst [vmem:[#allocation8_spill] sm:$0xff] %v3904_v33  ;;  %1771 = vbcast.lane.b32.xlu1 %v1769_v11, 256  ;;  %v4003_v11 = vrot.slane %v3951_v49, %v3811_v51 }
 0x235   : > { %1243 = vbcast.lane.b32.xlu0 %v3890_v29, 280 }
 0x236   : > { %v3907_v34 = vpop.permute.xlu1 %839 }
 0x237   : > { %5910 = vst [vmem:[#allocation9_spill] sm:$0xff] %v3907_v34  ;;  %v3909_v35 = vpop.permute.xlu0 %885 }
 0x238   : > { %5911 = vst [vmem:[#allocation10_spill] sm:$0xff] %v3909_v35  ;;  %1790 = vbcast.lane.b32.xlu1 %v1788_v13, 256 }
 0x239   : > { %1273 = vbcast.lane.b32.xlu0 %v3913_v37, 264 }
 0x23a   : > { %v3916_v38 = vpop.permute.xlu1 %847 }
 0x23b   : > { %v3918_v39 = vpop.permute.xlu0 %1661 }
 0x23c   : > { %1235 = vbcast.lane.b32.xlu1 %v3890_v29, 264 }
 0x23d   : > { %1292 = vbcast.lane.b32.xlu0 %v3922_v40, 264 }
 0x23e   : > { %v3926_v41 = vpop.permute.xlu1 %858 }
 0x23f   : > { %5912 = vst [vmem:[#allocation11_spill] sm:$0xff] %v3926_v41  ;;  %v3928_v27 = vpop.permute.xlu0 %1680 }
 0x240   : > { %1254 = vbcast.lane.b32.xlu1 %v3899_v62, 264 }
 0x241   : > { %1300 = vbcast.lane.b32.xlu0 %v3922_v40, 280 }
 0x242   : > { %v3932_v42 = vpop.permute.xlu1 %866 }
 0x243   : > { %v3934_v44 = vpop.permute.xlu0 %889 }
 0x244   : > { %5913 = vst [vmem:[#allocation12_spill] sm:$0xff] %v3934_v44  ;;  %1262 = vbcast.lane.b32.xlu1 %v3899_v62, 280 }
 0x245   : > { %1315 = vbcast.lane.b32.xlu0 %v3938_v45, 272 }
 0x246   : > { %v3942_v46 = vpop.permute.xlu1 %881 }
 0x247   : > { %5914 = vst [vmem:[#allocation13_spill] sm:$0xff] %v3942_v46  ;;  %v3944_v47 = vpop.permute.xlu0 %904 }
 0x248   : > { %5915 = vst [vmem:[#allocation14_spill] sm:$0xff] %v3944_v47  ;;  %1277 = vbcast.lane.b32.xlu1 %v3913_v37, 272 }
 0x249   : > { %1319 = vbcast.lane.b32.xlu0 %v3938_v45, 280 }
 0x24a   : > { %v3948_v48 = vpop.permute.xlu1 %1665 }
 0x24b   : > { %v3953_v50 = vpop.permute.xlu0 %1669 }
 0x24c   : > { %5916 = vst [vmem:[#allocation15_spill] sm:$0xff] %v3953_v50  ;;  %1281 = vbcast.lane.b32.xlu1 %v3913_v37, 280 }
 0x24d   : > { %1334 = vbcast.lane.b32.xlu0 %v3957_v52, 272 }
 0x24e   : > { %v3961_v54 = vpop.permute.xlu1 %1684 }
 0x24f   : > { %v3963_v55 = vpop.permute.xlu0 %1699 }
 0x250   : > { %5917 = vst [vmem:[#allocation16_spill] sm:$0xff] %v3963_v55  ;;  %1296 = vbcast.lane.b32.xlu1 %v3922_v40, 272 }
 0x251   : > { %2089 = vbcast.lane.b32.xlu0 %v3967_v56, 272 }
 0x252   : > { %v3971_v1 = vpop.permute.xlu1 %900 }
 0x253   : > { %5918 = vst [vmem:[#allocation17_spill] sm:$0xff] %v3971_v1  ;;  %v3973_v57 = vpop.permute.xlu0 %908 }
 0x254   : > { %5919 = vst [vmem:[#allocation18_spill] sm:$0xff] %v3973_v57  ;;  %1311 = vbcast.lane.b32.xlu1 %v3938_v45, 264 }
 0x255   : > { %2108 = vbcast.lane.b32.xlu0 %v3977_v59, 272 }
 0x256   : > { %v3981_v60 = vpop.permute.xlu1 %1688 }
 0x257   : > { %v3983_v63 = vpop.permute.xlu0 %923 }
 0x258   : > { %5920 = vst [vmem:[#allocation19_spill] sm:$0xff] %v3983_v63  ;;  %1330 = vbcast.lane.b32.xlu1 %v3957_v52, 264 }
 0x259   : > { %1349 = vbcast.lane.b32.xlu0 %v3987_v0, 264 }
 0x25a   : > { %v3991_v4 = vpop.permute.xlu1 %1703 }
 0x25b   : > { %5921 = vst [vmem:[#allocation20_spill] sm:$0xff] %v3991_v4  ;;  %v3993_v5 = vpop.permute.xlu0 %1707 }
 0x25c   : > { %5922 = vst [vmem:[#allocation21_spill] sm:$0xff] %v3993_v5  ;;  %2085 = vbcast.lane.b32.xlu1 %v3967_v56, 264 }
 0x25d   : > { %2112 = vbcast.lane.b32.xlu0 %v3977_v59, 280 }
 0x25e   : > { %v3997_v9 = vpop.permute.xlu1 %919 }
 0x25f   : > { %v3999_v10 = vpop.permute.xlu0 %1722 }
 0x260   : > { %5923 = vst [vmem:[#allocation22_spill] sm:$0xff] %v3999_v10  ;;  %2104 = vbcast.lane.b32.xlu1 %v3977_v59, 264  ;;  %v4045_v10 = vrot.slane %v3951_v49, %v3831_v58 }
 0x261   : > { %2127 = vbcast.lane.b32.xlu0 %v4003_v11, 272 }
 0x262   : > { %v4007_v21 = vpop.permute.xlu1 %1718 }
 0x263   : > { %5924 = vst [vmem:[#allocation23_spill] sm:$0xff] %v4007_v21  ;;  %v4009_v13 = vpop.permute.xlu0 %938 }
 0x264   : > { %1338 = vbcast.lane.b32.xlu1 %v3957_v52, 280 }
 0x265   : > { %1368 = vbcast.lane.b32.xlu0 %v4013_v20, 264 }
 0x266   : > { %v4017_v3 = vpop.permute.xlu1 %927 }
 0x267   : > { %v4019_v7 = vpop.permute.xlu0 %1737 }
 0x268   : > { %5925 = vst [vmem:[#allocation24_spill] sm:$0xff] %v4019_v7  ;;  %1353 = vbcast.lane.b32.xlu1 %v3987_v0, 272 }
 0x269   : > { %2142 = vbcast.lane.b32.xlu0 %v4023_v18, 264 }
 0x26a   : > { %v4027_v41 = vpop.permute.xlu1 %942 }
 0x26b   : > { %5926 = vst [vmem:[#allocation25_spill] sm:$0xff] %v4027_v41  ;;  %v4029_v23 = vpop.permute.xlu0 %957 }
 0x26c   : > { %5927 = vst [vmem:[#allocation26_spill] sm:$0xff] %v4029_v23  ;;  %2093 = vbcast.lane.b32.xlu1 %v3967_v56, 280 }
 0x26d   : > { %1376 = vbcast.lane.b32.xlu0 %v4013_v20, 280 }
 0x26e   : > { %v4033_v30 = vpop.permute.xlu1 %1726 }
 0x26f   : > { %5928 = vst [vmem:[#allocation27_spill] sm:$0xff] %v4033_v30  ;;  %v4035_v34 = vpop.permute.xlu0 %1756 }
 0x270   : > { %5929 = vst [vmem:[#allocation28_spill] sm:$0xff] %v4035_v34  ;;  %2123 = vbcast.lane.b32.xlu1 %v4003_v11, 264 }
 0x271   : > { %2150 = vbcast.lane.b32.xlu0 %v4023_v18, 280 }
 0x272   : > { %v4039_v7 = vpop.permute.xlu1 %1741 }
 0x273   : > { %5930 = vst [vmem:[#allocation29_spill] sm:$0xff] %v4039_v7  ;;  %v4041_v21 = vpop.permute.xlu0 %965 }
 0x274   : > { %5931 = vst [vmem:[#allocation30_spill] sm:$0xff] %v4041_v21  ;;  %1357 = vbcast.lane.b32.xlu1 %v3987_v0, 280  ;;  %v4061_v21 = vrot.slane %v3951_v49, %v3841_v61 }
 0x275   : > { %2165 = vbcast.lane.b32.xlu0 %v4045_v10, 272 }
 0x276   : > { %v4049_v23 = vpop.permute.xlu1 %946 }
 0x277   : > { %5932 = vst [vmem:[#allocation31_spill] sm:$0xff] %v4049_v23  ;;  %v4051_v30 = vpop.permute.xlu0 %1764 }
 0x278   : > { %5933 = vst [vmem:[#allocation32_spill] sm:$0xff] %v4051_v30  ;;  %1372 = vbcast.lane.b32.xlu1 %v4013_v20, 272 }
 0x279   : > { %2169 = vbcast.lane.b32.xlu0 %v4045_v10, 280 }
 0x27a   : > { %v4055_v34 = vpop.permute.xlu1 %961 }
 0x27b   : > { %5934 = vst [vmem:[#allocation33_spill] sm:$0xff] %v4055_v34  ;;  %v4057_v7 = vpop.permute.xlu0 %1779 }
 0x27c   : > { %5935 = vst [vmem:[#allocation34_spill] sm:$0xff] %v4057_v7  ;;  %2131 = vbcast.lane.b32.xlu1 %v4003_v11, 280  ;;  %v4077_v7 = vrot.slane %v3951_v49, %v3847_v2 }
 0x27d   : > { %2184 = vbcast.lane.b32.xlu0 %v4061_v21, 272 }
 0x27e   : > { %v4065_v5 = vpop.permute.xlu1 %1745 }
 0x27f   : > { %5936 = vst [vmem:[#allocation35_spill] sm:$0xff] %v4065_v5  ;;  %v4067_v23 = vpop.permute.xlu0 %1783 }
 0x280   : > { %5937 = vst [vmem:[#allocation36_spill] sm:$0xff] %v4067_v23  ;;  %2146 = vbcast.lane.b32.xlu1 %v4023_v18, 272  ;;  %v4087_v23 = vrot.slane %v3951_v49, %v3853_v8  ;;  %v722_v49 = vsub.f32 %v3736_v36, %v3859_v12 }
 0x281   : > { %2188 = vbcast.lane.b32.xlu0 %v4061_v21, 280 }
 0x282   : > { %v4071_v30 = vpop.permute.xlu1 %1760 }
 0x283   : > { %5938 = vst [vmem:[#allocation37_spill] sm:$0xff] %v4071_v30  ;;  %v4073_v34 = vpop.permute.xlu0 %1798 }
 0x284   : > { %5939 = vst [vmem:[#allocation38_spill] sm:$0xff] %v4073_v34  ;;  %2161 = vbcast.lane.b32.xlu1 %v4045_v10, 264 }
 0x285   : > { %2203 = vbcast.lane.b32.xlu0 %v4077_v7, 272 }
 0x286   : > { %v4081_v63 = vpop.permute.xlu1 %1775 }
 0x287   : > { %5940 = vst [vmem:[#allocation39_spill] sm:$0xff] %v4081_v63  ;;  %v4083_v5 = vpop.permute.xlu0 %1802 }
 0x288   : > { %5941 = vst [vmem:[#allocation40_spill] sm:$0xff] %v4083_v5  ;;  %2180 = vbcast.lane.b32.xlu1 %v4061_v21, 264 }
 0x289   : > { %2218 = vbcast.lane.b32.xlu0 %v4087_v23, 264 }
 0x28a   : > { %v4091_v30 = vpop.permute.xlu1 %1794 }
 0x28b   : > { %5942 = vst [vmem:[#allocation41_spill] sm:$0xff] %v4091_v30  ;;  %v4093_v34 = vpop.permute.xlu0 %1676 }
 0x28c   : > { %5943 = vst [vmem:[#allocation42_spill] sm:$0xff] %v4093_v34  ;;  %2199 = vbcast.lane.b32.xlu1 %v4077_v7, 264 }
 0x28d   : > { %1231 = vbcast.lane.b32.xlu0 %v3890_v29, 256  ;;  %v723_v29 = vmul.f32 1.442695, %v722_v49 }
 0x28e   : > { %v4097_v57 = vpop.permute.xlu1 %877 }
 0x28f   : > { %5944 = vst [vmem:[#allocation43_spill] sm:$0xff] %v4097_v57  ;;  %v4099_v63 = vpop.permute.xlu0 %915  ;;  %3484 = vpow2.f32 %v723_v29 }
 0x290   : > { %5945 = vst [vmem:[#allocation44_spill] sm:$0xff] %v4099_v63  ;;  %2207 = vbcast.lane.b32.xlu1 %v4077_v7, 280 }
 0x291   : > { %1269 = vbcast.lane.b32.xlu0 %v3913_v37, 256 }
 0x292   : > { %v4105_v5 = vpop.permute.xlu1 %1657 }
 0x293   : > { %5946 = vst [vmem:[#allocation45_spill] sm:$0xff] %v4105_v5  ;;  %v4107_v30 = vpop.permute.xlu0 %1714 }
 0x294   : > { %5947 = vst [vmem:[#allocation46_spill] sm:$0xff] %v4107_v30  ;;  %2222 = vbcast.lane.b32.xlu1 %v4087_v23, 272 }
 0x295   : > { %1326 = vbcast.lane.b32.xlu0 %v3957_v52, 256 }
 0x296   : > { %v4111_v34 = vpop.permute.xlu1 %896 }
 0x297   : > { %5948 = vst [vmem:[#allocation47_spill] sm:$0xff] %v4111_v34  ;;  %v4113_v57 = vpop.permute.xlu0 %934 }
 0x298   : > { %5949 = vst [vmem:[#allocation48_spill] sm:$0xff] %v4113_v57  ;;  %2226 = vbcast.lane.b32.xlu1 %v4087_v23, 280 }
 0x299   : > { %2081 = vbcast.lane.b32.xlu0 %v3967_v56, 256  ;;  %v4133_v29 = vpop.eup %3484 }
 0x29a   : > { %v4117_v37 = vpop.permute.xlu1 %1695 }
 0x29b   : > { %5950 = vst [vmem:[#allocation49_spill] sm:$0xff] %v4117_v37  ;;  %v4119_v36 = vpop.permute.xlu0 %1733 }
 0x29c   : > { %5951 = vst [vmem:[#allocation50_spill] sm:$0xff] %v4119_v36  ;;  %1250 = vbcast.lane.b32.xlu1 %v3899_v62, 256 }
 0x29d   : > { %1345 = vbcast.lane.b32.xlu0 %v3987_v0, 256 }
 0x29e   : > { %v4123_v12 = vpop.permute.xlu1 %953 }
 0x29f   : > { %5952 = vst [vmem:[#allocation51_spill] sm:$0xff] %v4123_v12  ;;  %v4125_v52 = vpop.permute.xlu0 %1239 }
 0x2a0   : > { %1288 = vbcast.lane.b32.xlu1 %v3922_v40, 256 }
 0x2a1   : > { %2119 = vbcast.lane.b32.xlu0 %v4003_v11, 256 }
 0x2a2   : > { %v4129_v49 = vpop.permute.xlu1 %1752 }
 0x2a3   : > { %5953 = vst [vmem:[#allocation52_spill] sm:$0xff] %v4129_v49  ;;  %v4131_v56 = vpop.permute.xlu0 %1258 }
 0x2a4   : > { %1307 = vbcast.lane.b32.xlu1 %v3938_v45, 256 }
 0x2a5   : > { %742 = vrot.lane.b32.xlu0 %v4133_v29, %s3571_s16  ;;  %s3408_s16 = smul.u32 80, %s3695_s29  ;;  %s3079_s29 = scalar_lea.sflag [#allocation3], %s349_s27 }
 0x2a6   : > { %v4138_v62 = vpop.permute.xlu1 %1771 }
 0x2a7   : > { %5954 = vst [vmem:[#allocation53_spill] sm:$0xff] %v4138_v62  ;;  %v4140_v0 = vpop.permute.xlu0 %1243  ;;  %s4331_s26 = scalar_lea.vmem %s5783_s0, %s3408_s16  ;;  %s3209_s16 = sshll.u32 %s3650_s13, 7 }
 0x2a8   : > { %5955 = vst [vmem:[#allocation54_spill] sm:$0xff] %v4140_v0  ;;  %2100 = vbcast.lane.b32.xlu1 %v3977_v59, 256  ;;  %s3578_s13 = smov [#allocation2]  }
 0x2aa   : > { %v4143_v40 = vpop.permute.xlu1 %1790 }
 0x2ab   : > { %5956 = vst [vmem:[#allocation55_spill] sm:$0xff] %v4143_v40  ;;  %v4145_v11 = vpop.permute.xlu0 %1273 }
 0x2ac   : > { %5957 = vst [vmem:[#allocation56_spill] sm:$0xff] %v4145_v11  ;;  %1364 = vbcast.lane.b32.xlu1 %v4013_v20, 256 }
 0x2ae   : > { %v4148_v12 = vpop.permute.xlu1 %1235 }
 0x2af   : > { %v4150_v49 = vpop.permute.xlu0 %1292 }
 0x2b0   : > { %5958 = vst [vmem:[#allocation57_spill] sm:$0xff] %v4150_v49  ;;  %2138 = vbcast.lane.b32.xlu1 %v4023_v18, 256 }
 0x2b2   : > { %v4153_v45 = vpop.permute.xlu1 %1254 }
 0x2b3   : > { %v4155_v36 = vpop.permute.xlu0 %1300 }
 0x2b4   : > { %5959 = vst [vmem:[#allocation58_spill] sm:$0xff] %v4155_v36  ;;  %2157 = vbcast.lane.b32.xlu1 %v4045_v10, 256 }
 0x2b6   : > { %v4158_v62 = vpop.permute.xlu1 %1262 }
 0x2b7   : > { %v4160_v59 = vpop.permute.xlu0 %1315 }
 0x2b8   : > { %5960 = vst [vmem:[#allocation59_spill] sm:$0xff] %v4160_v59  ;;  %726 = vrot.lane.b32.xlu1 %v4133_v29, %s3574_s24 }
 0x2ba   : > { %v4164_v20 = vpop.permute.xlu1 %1277 }
 0x2bb   : > { %5961 = vst [vmem:[#allocation60_spill] sm:$0xff] %v4164_v20  ;;  %v4166_v40 = vpop.permute.xlu0 %1319 }
 0x2bc   : > { %5962 = vst [vmem:[#allocation61_spill] sm:$0xff] %v4166_v40  ;;  %734 = vrot.lane.b32.xlu1 %v4133_v29, %s3572_s17  ;;  %s351_s17 = scalar_lea.vmem [#allocation2], %s3179_s28  ;;  %s3498_s28 = sshll.u32 %s3578_s13, 4  ;;  %s3499_s28 = int_to_ptr.vmem [resolvable:$false] %s3498_s28 }
 0x2bd   : > { %s3092_s21 = sshll.u32 %s351_s17, 4  ;;  %s5742_s21 = int_to_ptr.vmem [resolvable:$true] %s3092_s21 }
 0x2be   : > { %v4170_v18 = vpop.permute.xlu1 %1281  ;;  %p3501_p0 = scmp.lt.s32.totalorder %s5742_s21, %s3499_s28 }
 0x2bf   : > { %5963 = vst [vmem:[#allocation62_spill] sm:$0xff] %v4170_v18  ;;  %v4172_v57 = vpop.permute.xlu0 %1334 }
 0x2c0   : > { %5964 = vst [vmem:[#allocation63_spill] sm:$0xff] %v4172_v57  ;;  %750 = vrot.lane.b32.xlu1 %v4133_v29, %s3570_s14  ;;  %s3576_s14 = smov 80  }
 0x2c2   : > { %v4176_v10 = vpop.permute.xlu1 %1296 }
 0x2c3   : > { %5965 = vst [vmem:[#allocation64_spill] sm:$0xff] %v4176_v10  ;;  %v4178_v30 = vpop.permute.xlu0 %2089 }
 0x2c6   : > { %v4180_v34 = vpop.permute.xlu1 %1311 }
 0x2c7   : > { %5966 = vst [vmem:[#allocation65_spill] sm:$0xff] %v4180_v34  ;;  %v4182_v63 = vpop.permute.xlu0 %2108 }
 0x2ca   : > { %v4184_v37 = vpop.permute.xlu1 %1330 }
 0x2cb   : > { %v4186_v5 = vpop.permute.xlu0 %1349 }
 0x2cc   : > { %5967 = vst [vmem:[#allocation66_spill] sm:$0xff] %v4186_v5 }
 0x2ce   : > { %v4188_v47 = vpop.permute.xlu1 %2085 }
 0x2cf   : > { %v4190_v40 = vpop.permute.xlu0 %2112 }
 0x2d0   : > { %5968 = vst [vmem:[#allocation67_spill] sm:$0xff] %v4190_v40 }
 0x2d2   : > { %v4192_v57 = vpop.permute.xlu1 %2104 }
 0x2d3   : > { %v4194_v59 = vpop.permute.xlu0 %2127 }
 0x2d4   : > { %5969 = vst [vmem:[#allocation68_spill] sm:$0xff] %v4194_v59 }
 0x2d6   : > { %v4196_v36 = vpop.permute.xlu1 %1338 }
 0x2d7   : > { %5970 = vst [vmem:[#allocation69_spill] sm:$0xff] %v4196_v36  ;;  %v4198_v10 = vpop.permute.xlu0 %1368 }
 0x2d8   : > { %5971 = vst [vmem:[#allocation70_spill] sm:$0xff] %v4198_v10 }
 0x2da   : > { %v4200_v18 = vpop.permute.xlu1 %1353 }
 0x2db   : > { %5972 = vst [vmem:[#allocation71_spill] sm:$0xff] %v4200_v18  ;;  %v4202_v34 = vpop.permute.xlu0 %2142 }
 0x2dc   : > { %5973 = vst [vmem:[#allocation72_spill] sm:$0xff] %v4202_v34 }
 0x2de   : > { %v4204_v1 = vpop.permute.xlu1 %2093 }
 0x2df   : > { %5974 = vst [vmem:[#allocation73_spill] sm:$0xff] %v4204_v1  ;;  %v4206_v44 = vpop.permute.xlu0 %1376 }
 0x2e0   : > { %5975 = vst [vmem:[#allocation74_spill] sm:$0xff] %v4206_v44 }
 0x2e2   : > { %v4208_v49 = vpop.permute.xlu1 %2123 }
 0x2e3   : > { %5976 = vst [vmem:[#allocation75_spill] sm:$0xff] %v4208_v49  ;;  %v4210_v55 = vpop.permute.xlu0 %2150 }
 0x2e4   : > { %5977 = vst [vmem:[#allocation76_spill] sm:$0xff] %v4210_v55 }
 0x2e6   : > { %v4212_v35 = vpop.permute.xlu1 %1357 }
 0x2e7   : > { %5978 = vst [vmem:[#allocation77_spill] sm:$0xff] %v4212_v35  ;;  %v4214_v40 = vpop.permute.xlu0 %2165 }
 0x2e8   : > { %5979 = vst [vmem:[#allocation78_spill] sm:$0xff] %v4214_v40 }
 0x2ea   : > { %v4216_v59 = vpop.permute.xlu1 %1372 }
 0x2eb   : > { %5980 = vst [vmem:[#allocation79_spill] sm:$0xff] %v4216_v59  ;;  %v4218_v11 = vpop.permute.xlu0 %2169 }
 0x2ec   : > { %5981 = vst [vmem:[#allocation80_spill] sm:$0xff] %v4218_v11 }
 0x2ee   : > { %v4220_v10 = vpop.permute.xlu1 %2131 }
 0x2ef   : > { %5982 = vst [vmem:[#allocation81_spill] sm:$0xff] %v4220_v10  ;;  %v4222_v0 = vpop.permute.xlu0 %2184 }
 0x2f0   : > { %5983 = vst [vmem:[#allocation82_spill] sm:$0xff] %v4222_v0 }
 0x2f2   : > { %v4224_v34 = vpop.permute.xlu1 %2146 }
 0x2f3   : > { %5984 = vst [vmem:[#allocation83_spill] sm:$0xff] %v4224_v34  ;;  %v4226_v1 = vpop.permute.xlu0 %2188 }
 0x2f4   : > { %5985 = vst [vmem:[#allocation84_spill] sm:$0xff] %v4226_v1 }
 0x2f6   : > { %v4228_v44 = vpop.permute.xlu1 %2161 }
 0x2f7   : > { %5986 = vst [vmem:[#allocation85_spill] sm:$0xff] %v4228_v44  ;;  %v4232_v55 = vpop.permute.xlu0 %2203 }
 0x2f8   : > { %5988 = vst [vmem:[#allocation87_spill] sm:$0xff] %v4232_v55 }
 0x2fa   : > { %v4230_v49 = vpop.permute.xlu1 %2180 }
 0x2fb   : > { %5987 = vst [vmem:[#allocation86_spill] sm:$0xff] %v4230_v49  ;;  %v4236_v40 = vpop.permute.xlu0 %2218 }
 0x2fc   : > { %5990 = vst [vmem:[#allocation89_spill] sm:$0xff] %v4236_v40 }
 0x2fe   : > { %v4234_v35 = vpop.permute.xlu1 %2199 }
 0x2ff   : > { %5989 = vst [vmem:[#allocation88_spill] sm:$0xff] %v4234_v35  ;;  %v4242_v10 = vpop.permute.xlu0 %1231 }
 0x300   : > { %5993 = vst [vmem:[#allocation92_spill] sm:$0xff] %v4242_v10 }
 0x302   : > { %v4238_v59 = vpop.permute.xlu1 %2207 }
 0x303   : > { %5991 = vst [vmem:[#allocation90_spill] sm:$0xff] %v4238_v59  ;;  %v4246_v34 = vpop.permute.xlu0 %1269 }
 0x304   : > { %5995 = vst [vmem:[#allocation94_spill] sm:$0xff] %v4246_v34 }
 0x306   : > { %v4240_v11 = vpop.permute.xlu1 %2222 }
 0x307   : > { %5992 = vst [vmem:[#allocation91_spill] sm:$0xff] %v4240_v11  ;;  %v4252_v49 = vpop.permute.xlu0 %1326 }
 0x308   : > { %5998 = vst [vmem:[#allocation97_spill] sm:$0xff] %v4252_v49 }
 0x30a   : > { %v4244_v0 = vpop.permute.xlu1 %2226 }
 0x30b   : > { %5994 = vst [vmem:[#allocation93_spill] sm:$0xff] %v4244_v0  ;;  %v4256_v35 = vpop.permute.xlu0 %2081 }
 0x30c   : > { %6000 = vst [vmem:[#allocation99_spill] sm:$0xff] %v4256_v35 }
 0x30e   : > { %v4248_v1 = vpop.permute.xlu1 %1250 }
 0x30f   : > { %5996 = vst [vmem:[#allocation95_spill] sm:$0xff] %v4248_v1  ;;  %v4262_v11 = vpop.permute.xlu0 %1345 }
 0x310   : > { %6003 = vst [vmem:[#allocation102_spill] sm:$0xff] %v4262_v11 }
 0x312   : > { %v4250_v44 = vpop.permute.xlu1 %1288 }
 0x313   : > { %5997 = vst [vmem:[#allocation96_spill] sm:$0xff] %v4250_v44  ;;  %v4266_v0 = vpop.permute.xlu0 %2119 }
 0x314   : > { %6005 = vst [vmem:[#allocation104_spill] sm:$0xff] %v4266_v0 }
 0x316   : > { %v4254_v55 = vpop.permute.xlu1 %1307 }
 0x317   : > { %5999 = vst [vmem:[#allocation98_spill] sm:$0xff] %v4254_v55  ;;  %v743_v49 = vpop.permute.xlu0 %742 }
 0x31a   : > { %v4258_v40 = vpop.permute.xlu1 %2100 }
 0x31b   : > { %6001 = vst [vmem:[#allocation100_spill] sm:$0xff] %v4258_v40  ;;  %v745_v40 = vsel %vm619_vm2, %v743_v49, 0.0 }
 0x31e   : > { %v4260_v59 = vpop.permute.xlu1 %1364 }
 0x31f   : > { %6002 = vst [vmem:[#allocation101_spill] sm:$0xff] %v4260_v59 }
 0x322   : > { %v4264_v10 = vpop.permute.xlu1 %2138 }
 0x323   : > { %6004 = vst [vmem:[#allocation103_spill] sm:$0xff] %v4264_v10 }
 0x326   : > { %v4268_v34 = vpop.permute.xlu1 %2157 }
 0x327   : > { %6006 = vst [vmem:[#allocation105_spill] sm:$0xff] %v4268_v34 }
 0x32a   : > { %v727_v1 = vpop.permute.xlu1 %726 }
 0x32b   : > { %v729_v44 = vsel %vm619_vm2, %v727_v1, 0.0 }
 0x32c   : > { %730 = vadd.xlane.f32.xlu0 %v729_v44 }
 0x32e   : > { %v735_v55 = vpop.permute.xlu1 %734 }
 0x32f   : > { %v737_v35 = vsel %vm619_vm2, %v735_v55, 0.0 }
 0x330   : > { %738 = vadd.xlane.f32.xlu1 %v737_v35  ;;  %746 = vadd.xlane.f32.xlu0 %v745_v40 }
 0x332   : > { %v751_v59 = vpop.permute.xlu1 %750 }
 0x333   : > { %v753_v11 = vsel %vm619_vm2, %v751_v59, 0.0 }
 0x334   : > { %754 = vadd.xlane.f32.xlu0 %v753_v11 }
 0x3b9   : > { %v731_v10 = vpop.xlane.xlu0 %730 }
 0x3ba   : > { %3486 = vrcp.f32 %v731_v10 }
 0x3bd   : > { %v739_v0 = vpop.xlane.xlu1 %738  ;;  %v747_v34 = vpop.xlane.xlu0 %746 }
 0x3be   : > { %3488 = vrcp.f32 %v739_v0 }
 0x3bf   : > { %3490 = vrcp.f32 %v747_v34  ;;  %v3477_v34 = vunpack.i.l.bf16 %v3877_v22 }
 0x3c1   : > { %v755_v1 = vpop.xlane.xlu0 %754 }
 0x3c2   : > { %3492 = vrcp.f32 %v755_v1  ;;  %v3478_v1 = vunpack.i.h.bf16 %v3877_v22  ;;  %v375_v22 = vld [vmem:[%s5786_s3] sm:$0xff] }
 0x3c4   : > { %v3487_v44 = vpop.eup %3486 }
 0x3c8   : > { %v3489_v46 = vpop.eup %3488 }
 0x3c9   : > { %v3491_v33 = vpop.eup %3490  ;;  %v758_v55 = vsel %vm619_vm2, %v3487_v44, %v3489_v46  ;;  %v376_v44 = vld [vmem:[%s5786_s3 + $0x8] sm:$0xff]  ;;  %vm6008_vm2 = vcmask 261120  }
 0x3ca   : > { %v759_v35 = vsel %vm623_vm4, %v758_v55, %v3491_v33  ;;  %v3344_v55 = vpack.c.bf16 %v376_v44, %v375_v22  ;;  %vm6009_vm4 = vmmov %vm6008_vm2  ;;  %v368_v22 = vld [vmem:[%s4331_s26 + $0x18] sm:$0xff]  ;;  %v369_v44 = vld [vmem:[%s4331_s26 + $0x20] sm:$0xff] }
 0x3cb   : > { %vm6010_vm5 = vmmov %vm6008_vm2 }
 0x3cc   : > { %v3493_v49 = vpop.eup %3492  ;;  %3345 = vmatprep.subr.bf16.mxu0 %v3344_v55  ;;  %vm6011_vm7 = vmmov %vm6008_vm2 }
 0x3cd   : > { %v760_v40 = vsel %vm6007_vm0, %v759_v35, %v3493_v49  ;;  %3347 = vmatpush3.bf16.msra.mxu0 %v3344_v55  ;;  %v377_v35 = vld [vmem:[%s5786_s3 + $0x10] sm:$0xff]  ;;  %vm6012_vm6 = vmmov %vm6008_vm2 }
 0x3ce   : > { %762 = vrot.lane.b32.xlu0 %v760_v40, %s3574_s24  ;;  %v378_v40 = vld [vmem:[%s5786_s3 + $0x18] sm:$0xff]  ;;  %vm6013_vm8 = vmmov %vm6008_vm2  ;;  %s5740_s24 = scalar_lea.hbm %s5792_s9, %s3209_s16 }
 0x3cf   : > { %vm6014_vm13 = vmmov %vm6008_vm2 }
 0x3d0   : > { %vm6015_vm14 = vmmov %vm6008_vm2 }
 0x3d1   : > { %vm6016_vm15 = vmmov %vm6008_vm2 }
 0x3d2   : > { %vm6017_vm10 = vmmov %vm6008_vm2 }
 0x440   : > { %v763_v11 = vpop.permute.xlu0 %762 }
 0x441   : > { %v4279_v59 = vmul.f32 %v4133_v29, %v763_v11  ;;  %v3348_v11 = vpack.c.bf16 %v378_v40, %v377_v35  ;;  %v370_v35 = vld [vmem:[%s4331_s26 + $0x28] sm:$0xff]  ;;  %v371_v40 = vld [vmem:[%s4331_s26 + $0x30] sm:$0xff] }
 0x443   : > { %v807_v0 = vmul.f32 %v3872_v19, %v4279_v59  ;;  %v1218_v46 = vmul.f32 %v3862_v14, %v4279_v59  ;;  %3349 = vmatprep.subr.bf16.mxu0 %v3348_v11  ;;  %v2068_v20 = vmul.f32 %v3864_v15, %v4279_v59 }
 0x444   : > { %3351 = vmatpush3.bf16.msra.mxu0 %v3348_v11  ;;  %v1644_v11 = vmul.f32 %v3866_v16, %v4279_v59 }
 0x445   : > { %v4284_v10 = vmul.f32 %v3477_v34, %v807_v0  ;;  %v4295_v29 = vmul.f32 %v3478_v1, %v1218_v46  ;;  %v365_v34 = vld [vmem:[%s4331_s26] sm:$0xff]  ;;  %v366_v46 = vld [vmem:[%s4331_s26 + $0x8] sm:$0xff]  ;;  %v367_v1 = vld [vmem:[%s4331_s26 + $0x10] sm:$0xff]  ;;  %v4439_v18 = vmul.f32 %v3483_v31, %v2068_v20 }
 0x446   : > { %3288 = vmatprep.mubr.msk.f32.mxu0 %vm6008_vm2, %v365_v34 }
 0x447   : > { %v4290_v33 = vrot.slane %v4284_v10, %v3719_v24  ;;  %v4299_v19 = vrot.slane %v4284_v10, %v3800_v43  ;;  %v4305_v14 = vrot.slane %v4295_v29, %v3719_v24  ;;  %v4318_v49 = vrot.slane %v4295_v29, %v3800_v43  ;;  %3289 = vmatmul.mubr.msk.f32.vlgmr.msra.gmra.mrb[0].mxu0 %vm6009_vm4, %v366_v46  ;;  %v372_v46 = vld [vmem:[%s4331_s26 + $0x38] sm:$0xff] }
 0x448   : > { %v4339_v0 = vrot.slane %v4284_v10, %v3811_v51  ;;  %3291 = vmatprep.mubr.msk.f32.mxu0 %vm6010_vm5, %v367_v1  ;;  %v4354_v55 = vrot.slane %v4295_v29, %v3811_v51  ;;  %v4366_v34 = vrot.slane %v4284_v10, %v3817_v53  ;;  %v3482_v1 = vunpack.i.l.bf16 %v3884_v26 }
 0x449   : > { %1013 = vbcast.lane.b32.xlu1 %v4290_v33, 336  ;;  %1009 = vbcast.lane.b32.xlu0 %v4290_v33, 328  ;;  %v4379_v16 = vrot.slane %v4295_v29, %v3817_v53  ;;  %v4430_v4 = vrot.slane %v4295_v29, %v3841_v61  ;;  %v4449_v50 = vrot.slane %v4439_v18, %v3719_v24 }
 0x44a   : > { %v4455_v15 = vrot.slane %v4439_v18, %v3800_v43  ;;  %v4487_v59 = vrot.slane %v4439_v18, %v3811_v51 }
 0x44b   : > { %3292 = vmatmul.mubr.msk.f32.gmra.mrb[2].mxu0 %vm6011_vm7, %v368_v22  ;;  %v373_v22 = vld [vmem:[%s4331_s26 + $0x40] sm:$0xff]  ;;  %6021 = vst [vmem:[#allocation109_spill] sm:$0xff] %v4430_v4  ;;  %6023 = vst [vmem:[#allocation111_spill] sm:$0xff] %v4449_v50 }
 0x44c   : > { %3294 = vmatprep.mubr.msk.f32.mxu0 %vm6012_vm6, %v369_v44  ;;  %v4375_v44 = vmul.f32 %v3482_v1, %v1644_v11  ;;  %v4406_v1 = vrot.slane %v4295_v29, %v3831_v58  ;;  %6024 = vst [vmem:[#allocation112_spill] sm:$0xff] %v4455_v15  ;;  %6028 = vst [vmem:[#allocation116_spill] sm:$0xff] %v4487_v59 }
 0x44d   : > { %1033 = vbcast.lane.b32.xlu1 %v4299_v19, 336  ;;  %1029 = vbcast.lane.b32.xlu0 %v4299_v19, 328 }
 0x44e   : > { %v4394_v11 = vrot.slane %v4375_v44, %v3800_v43  ;;  %6018 = vst [vmem:[#allocation106_spill] sm:$0xff] %v4406_v1  ;;  %v4443_v41 = vrot.slane %v4375_v44, %v3817_v53  ;;  %v4469_v43 = vrot.slane %v4295_v29, %v3847_v2  ;;  %v4475_v26 = vrot.slane %v4375_v44, %v3831_v58 }
 0x44f   : > { %3295 = vmatmul.mubr.msk.f32.gmra.mrb[4].mxu0 %vm6013_vm8, %v370_v35  ;;  %v374_v35 = vld [vmem:[%s4331_s26 + $0x48] sm:$0xff]  ;;  %s3494_s26 = scalar_lea.vmem %s5742_s21, 128 }
 0x450   : > { %3297 = vmatprep.mubr.msk.f32.mxu0 %vm6014_vm13, %v371_v40  ;;  %v4388_v40 = vrot.slane %v4375_v44, %v3719_v24  ;;  %6022 = vst [vmem:[#allocation110_spill] sm:$0xff] %v4443_v41  ;;  %v4463_v24 = vrot.slane %v4284_v10, %v3847_v2  ;;  %6026 = vst [vmem:[#allocation114_spill] sm:$0xff] %v4469_v43  ;;  %p3495_p11 = scmp.ne.s32.totalorder %s5742_s21, %s3494_s26 }
 0x451   : > { %1424 = vbcast.lane.b32.xlu1 %v4305_v14, 336  ;;  %1420 = vbcast.lane.b32.xlu0 %v4305_v14, 328  ;;  %6027 = vst [vmem:[#allocation115_spill] sm:$0xff] %v4475_v26 }
 0x452   : > { %6025 = vst [vmem:[#allocation113_spill] sm:$0xff] %v4463_v24  ;;  %p3496_p12 = pnand %p3495_p11, %p3667_p5 }
 0x453   : > { %3298 = vmatmul.mubr.msk.f32.gmra.mrb[6].mxu0 %vm6015_vm14, %v372_v46  ;;  %v4400_v46 = vrot.slane %v4284_v10, %v3831_v58 }
 0x454   : > { %3300 = vmatprep.mubr.msk.f32.mxu0 %vm6016_vm15, %v373_v22  ;;  %v4414_v22 = vrot.slane %v4375_v44, %v3811_v51  ;;  %v4503_v51 = vrot.slane %v4284_v10, %v3853_v8  ;;  %vm2484_vm15 = vcmask 654336   ;;  %p3497_p13 = pneg %p3496_p12 }
 0x455   : > { %1444 = vbcast.lane.b32.xlu1 %v4318_v49, 336  ;;  %1440 = vbcast.lane.b32.xlu0 %v4318_v49, 328 }
 0x456   : > { %6019 = vst [vmem:[#allocation107_spill] sm:$0xff] %v4414_v22  ;;  %6029 = vst [vmem:[#allocation117_spill] sm:$0xff] %v4503_v51 }
 0x457   : > { %3301 = vmatmul.mubr.msk.f32.gmra.mrb[8].mxu0 %vm6017_vm10, %v374_v35  ;;  %v4422_v35 = vrot.slane %v4284_v10, %v3841_v61  ;;  %v4519_v10 = vrot.slane %v4295_v29, %v3853_v8 }
 0x459   : > { %1017 = vbcast.lane.b32.xlu1 %v4290_v33, 344  ;;  %1037 = vbcast.lane.b32.xlu0 %v4299_v19, 344  ;;  %6020 = vst [vmem:[#allocation108_spill] sm:$0xff] %v4422_v35  ;;  %6032 = vst [vmem:[#allocation120_spill] sm:$0xff] %v4519_v10 }
 0x45d   : > { %1049 = vbcast.lane.b32.xlu1 %v4339_v0, 328  ;;  %1053 = vbcast.lane.b32.xlu0 %v4339_v0, 336 }
 0x461   : > { %1448 = vbcast.lane.b32.xlu1 %v4318_v49, 344  ;;  %1428 = vbcast.lane.b32.xlu0 %v4305_v14, 344 }
 0x465   : > { %1464 = vbcast.lane.b32.xlu1 %v4354_v55, 336  ;;  %1460 = vbcast.lane.b32.xlu0 %v4354_v55, 328 }
 0x469   : > { %1057 = vbcast.lane.b32.xlu1 %v4339_v0, 344  ;;  %1069 = vbcast.lane.b32.xlu0 %v4366_v34, 328 }
 0x46d   : > { %1073 = vbcast.lane.b32.xlu1 %v4366_v34, 336  ;;  %1480 = vbcast.lane.b32.xlu0 %v4379_v16, 328 }
 0x471   : > { %1468 = vbcast.lane.b32.xlu1 %v4354_v55, 344  ;;  %1846 = vbcast.lane.b32.xlu0 %v4388_v40, 328 }
 0x475   : > { %1484 = vbcast.lane.b32.xlu1 %v4379_v16, 336  ;;  %1866 = vbcast.lane.b32.xlu0 %v4394_v11, 328 }
 0x479   : > { %1850 = vbcast.lane.b32.xlu1 %v4388_v40, 336  ;;  %1089 = vbcast.lane.b32.xlu0 %v4400_v46, 328 }
 0x47d   : > { %1870 = vbcast.lane.b32.xlu1 %v4394_v11, 336  ;;  %1500 = vbcast.lane.b32.xlu0 %v4406_v1, 328 }
 0x481   : > { %1077 = vbcast.lane.b32.xlu1 %v4366_v34, 344  ;;  %1874 = vbcast.lane.b32.xlu0 %v4394_v11, 344 }
 0x485   : > { %1093 = vbcast.lane.b32.xlu1 %v4400_v46, 336  ;;  %1890 = vbcast.lane.b32.xlu0 %v4414_v22, 336 }
 0x489   : > { %1488 = vbcast.lane.b32.xlu1 %v4379_v16, 344  ;;  %1097 = vbcast.lane.b32.xlu0 %v4400_v46, 344 }
 0x48d   : > { %1504 = vbcast.lane.b32.xlu1 %v4406_v1, 336  ;;  %1113 = vbcast.lane.b32.xlu0 %v4422_v35, 336 }
 0x491   : > { %1854 = vbcast.lane.b32.xlu1 %v4388_v40, 344  ;;  %1508 = vbcast.lane.b32.xlu0 %v4406_v1, 344 }
 0x495   : > { %1886 = vbcast.lane.b32.xlu1 %v4414_v22, 328  ;;  %1524 = vbcast.lane.b32.xlu0 %v4430_v4, 336 }
 0x499   : > { %1109 = vbcast.lane.b32.xlu1 %v4422_v35, 328  ;;  %1894 = vbcast.lane.b32.xlu0 %v4414_v22, 344 }
 0x49d   : > { %1520 = vbcast.lane.b32.xlu1 %v4430_v4, 328  ;;  %1910 = vbcast.lane.b32.xlu0 %v4443_v41, 336 }
 0x4a1   : > { %1906 = vbcast.lane.b32.xlu1 %v4443_v41, 328  ;;  %2274 = vbcast.lane.b32.xlu0 %v4449_v50, 336 }
 0x4a5   : > { %2270 = vbcast.lane.b32.xlu1 %v4449_v50, 328  ;;  %2294 = vbcast.lane.b32.xlu0 %v4455_v15, 336 }
 0x4a9   : > { %2290 = vbcast.lane.b32.xlu1 %v4455_v15, 328  ;;  %1117 = vbcast.lane.b32.xlu0 %v4422_v35, 344 }
 0x4ad   : > { %1129 = vbcast.lane.b32.xlu1 %v4463_v24, 328  ;;  %1133 = vbcast.lane.b32.xlu0 %v4463_v24, 336 }
 0x4b1   : > { %1540 = vbcast.lane.b32.xlu1 %v4469_v43, 328  ;;  %1528 = vbcast.lane.b32.xlu0 %v4430_v4, 344 }
 0x4b5   : > { %1926 = vbcast.lane.b32.xlu1 %v4475_v26, 328  ;;  %1544 = vbcast.lane.b32.xlu0 %v4469_v43, 336 }
 0x4b9   : > { %2298 = vbcast.lane.b32.xlu1 %v4455_v15, 344  ;;  %1914 = vbcast.lane.b32.xlu0 %v4443_v41, 344 }
 0x4bb   : > { %v4481_v31 = vpop.permute.xlu1 %1013  ;;  %v4483_v20 = vpop.permute.xlu0 %1009 }
 0x4bd   : > { %2314 = vbcast.lane.b32.xlu1 %v4487_v59, 336  ;;  %1930 = vbcast.lane.b32.xlu0 %v4475_v26, 336 }
 0x4bf   : > { %v4491_v4 = vpop.permute.xlu1 %1033  ;;  %v4493_v35 = vpop.permute.xlu0 %1029 }
 0x4c1   : > { %1137 = vbcast.lane.b32.xlu1 %v4463_v24, 344  ;;  %2278 = vbcast.lane.b32.xlu0 %v4449_v50, 344 }
 0x4c3   : > { %v4497_v41 = vpop.permute.xlu1 %1424  ;;  %v4499_v22 = vpop.permute.xlu0 %1420 }
 0x4c5   : > { %1153 = vbcast.lane.b32.xlu1 %v4503_v51, 336  ;;  %2310 = vbcast.lane.b32.xlu0 %v4487_v59, 328 }
 0x4c7   : > { %v4507_v6 = vpop.permute.xlu1 %1444  ;;  %v4509_v15 = vpop.permute.xlu0 %1440 }
 0x4c9   : > { %1548 = vbcast.lane.b32.xlu1 %v4469_v43, 344  ;;  %1149 = vbcast.lane.b32.xlu0 %v4503_v51, 328  ;;  %v4529_v43 = vrot.slane %v4375_v44, %v3841_v61 }
 0x4cb   : > { %v4513_v50 = vpop.permute.xlu1 %1017  ;;  %v4515_v24 = vpop.permute.xlu0 %1037  ;;  %6035 = vst [vmem:[#allocation123_spill] sm:$0xff] %v4529_v43 }
 0x4cc   : > { %6030 = vst [vmem:[#allocation118_spill] sm:$0xff] %v4513_v50  ;;  %6031 = vst [vmem:[#allocation119_spill] sm:$0xff] %v4515_v24  ;;  %v4539_v24 = vrot.slane %v4439_v18, %v3817_v53  ;;  %v4555_v53 = vrot.slane %v4375_v44, %v3847_v2 }
 0x4cd   : > { %1564 = vbcast.lane.b32.xlu1 %v4519_v10, 336  ;;  %1560 = vbcast.lane.b32.xlu0 %v4519_v10, 328 }
 0x4ce   : > { %6037 = vst [vmem:[#allocation125_spill] sm:$0xff] %v4539_v24  ;;  %6042 = vst [vmem:[#allocation130_spill] sm:$0xff] %v4555_v53 }
 0x4cf   : > { %v4523_v1 = vpop.permute.xlu1 %1049  ;;  %v4525_v36 = vpop.permute.xlu0 %1053 }
 0x4d0   : > { %6033 = vst [vmem:[#allocation121_spill] sm:$0xff] %v4523_v1  ;;  %6034 = vst [vmem:[#allocation122_spill] sm:$0xff] %v4525_v36 }
 0x4d1   : > { %1934 = vbcast.lane.b32.xlu1 %v4475_v26, 344  ;;  %1946 = vbcast.lane.b32.xlu0 %v4529_v43, 328 }
 0x4d3   : > { %v4533_v50 = vpop.permute.xlu1 %1448  ;;  %v4535_v29 = vpop.permute.xlu0 %1428 }
 0x4d4   : > { %6036 = vst [vmem:[#allocation124_spill] sm:$0xff] %v4535_v29 }
 0x4d5   : > { %1950 = vbcast.lane.b32.xlu1 %v4529_v43, 336  ;;  %2330 = vbcast.lane.b32.xlu0 %v4539_v24, 328 }
 0x4d7   : > { %v4543_v1 = vpop.permute.xlu1 %1464  ;;  %v4545_v36 = vpop.permute.xlu0 %1460 }
 0x4d8   : > { %6038 = vst [vmem:[#allocation126_spill] sm:$0xff] %v4543_v1  ;;  %6039 = vst [vmem:[#allocation127_spill] sm:$0xff] %v4545_v36  ;;  %v4605_v36 = vrot.slane %v4439_v18, %v3847_v2  ;;  %v4621_v2 = vrot.slane %v4439_v18, %v3853_v8 }
 0x4d9   : > { %2318 = vbcast.lane.b32.xlu1 %v4487_v59, 344  ;;  %1157 = vbcast.lane.b32.xlu0 %v4503_v51, 344  ;;  %v4565_v59 = vrot.slane %v4439_v18, %v3831_v58 }
 0x4da   : > { %6056 = vst [vmem:[#allocation144_spill] sm:$0xff] %v4621_v2 }
 0x4db   : > { %v4549_v26 = vpop.permute.xlu1 %1057  ;;  %v4551_v5 = vpop.permute.xlu0 %1069  ;;  %6045 = vst [vmem:[#allocation133_spill] sm:$0xff] %v4565_v59 }
 0x4dc   : > { %6040 = vst [vmem:[#allocation128_spill] sm:$0xff] %v4549_v26  ;;  %6041 = vst [vmem:[#allocation129_spill] sm:$0xff] %v4551_v5  ;;  %v4575_v26 = vrot.slane %v4375_v44, %v3853_v8 }
 0x4dd   : > { %2334 = vbcast.lane.b32.xlu1 %v4539_v24, 336  ;;  %1966 = vbcast.lane.b32.xlu0 %v4555_v53, 328 }
 0x4de   : > { %6047 = vst [vmem:[#allocation135_spill] sm:$0xff] %v4575_v26 }
 0x4df   : > { %v4559_v29 = vpop.permute.xlu1 %1073  ;;  %v4561_v1 = vpop.permute.xlu0 %1480 }
 0x4e0   : > { %6043 = vst [vmem:[#allocation131_spill] sm:$0xff] %v4559_v29  ;;  %6044 = vst [vmem:[#allocation132_spill] sm:$0xff] %v4561_v1 }
 0x4e1   : > { %1568 = vbcast.lane.b32.xlu1 %v4519_v10, 344  ;;  %2350 = vbcast.lane.b32.xlu0 %v4565_v59, 328  ;;  %v4585_v10 = vrot.slane %v4439_v18, %v3841_v61 }
 0x4e3   : > { %v4569_v51 = vpop.permute.xlu1 %1468  ;;  %v4571_v5 = vpop.permute.xlu0 %1846  ;;  %6049 = vst [vmem:[#allocation137_spill] sm:$0xff] %v4585_v10 }
 0x4e4   : > { %6046 = vst [vmem:[#allocation134_spill] sm:$0xff] %v4569_v51 }
 0x4e5   : > { %1954 = vbcast.lane.b32.xlu1 %v4529_v43, 344  ;;  %1986 = vbcast.lane.b32.xlu0 %v4575_v26, 328 }
 0x4e7   : > { %v4579_v29 = vpop.permute.xlu1 %1484  ;;  %v4581_v58 = vpop.permute.xlu0 %1866 }
 0x4e8   : > { %6048 = vst [vmem:[#allocation136_spill] sm:$0xff] %v4579_v29 }
 0x4e9   : > { %1970 = vbcast.lane.b32.xlu1 %v4555_v53, 336  ;;  %2370 = vbcast.lane.b32.xlu0 %v4585_v10, 328 }
 0x4eb   : > { %v1851_v51 = vpop.permute.xlu1 %1850  ;;  %v4589_v1 = vpop.permute.xlu0 %1089 }
 0x4ec   : > { %6050 = vst [vmem:[#allocation138_spill] sm:$0xff] %v4589_v1 }
 0x4ed   : > { %2338 = vbcast.lane.b32.xlu1 %v4539_v24, 344  ;;  %1994 = vbcast.lane.b32.xlu0 %v4575_v26, 344 }
 0x4ef   : > { %v4593_v44 = vpop.permute.xlu1 %1870  ;;  %v4595_v43 = vpop.permute.xlu0 %1500 }
 0x4f0   : > { %6051 = vst [vmem:[#allocation139_spill] sm:$0xff] %v4595_v43 }
 0x4f1   : > { %2354 = vbcast.lane.b32.xlu1 %v4565_v59, 336  ;;  %2378 = vbcast.lane.b32.xlu0 %v4585_v10, 344 }
 0x4f3   : > { %v4599_v61 = vpop.permute.xlu1 %1077  ;;  %v4601_v29 = vpop.permute.xlu0 %1874 }
 0x4f4   : > { %6052 = vst [vmem:[#allocation140_spill] sm:$0xff] %v4599_v61 }
 0x4f5   : > { %1974 = vbcast.lane.b32.xlu1 %v4555_v53, 344  ;;  %2394 = vbcast.lane.b32.xlu0 %v4605_v36, 336 }
 0x4f7   : > { %v4609_v24 = vpop.permute.xlu1 %1093  ;;  %v4611_v1 = vpop.permute.xlu0 %1890 }
 0x4f8   : > { %6053 = vst [vmem:[#allocation141_spill] sm:$0xff] %v4609_v24 }
 0x4f9   : > { %1990 = vbcast.lane.b32.xlu1 %v4575_v26, 336  ;;  %2398 = vbcast.lane.b32.xlu0 %v4605_v36, 344 }
 0x4fb   : > { %v4615_v43 = vpop.permute.xlu1 %1488  ;;  %v4617_v61 = vpop.permute.xlu0 %1097 }
 0x4fc   : > { %6054 = vst [vmem:[#allocation142_spill] sm:$0xff] %v4615_v43  ;;  %6055 = vst [vmem:[#allocation143_spill] sm:$0xff] %v4617_v61 }
 0x4fd   : > { %2358 = vbcast.lane.b32.xlu1 %v4565_v59, 344  ;;  %2414 = vbcast.lane.b32.xlu0 %v4621_v2, 336  ;;  %v6057_v59 = vlaneseq }
 0x4ff   : > { %v4625_v53 = vpop.permute.xlu1 %1504  ;;  %v4627_v24 = vpop.permute.xlu0 %1113  ;;  %v4642_v61 = vand.u32 127, %v6057_v59 }
 0x501   : > { %2374 = vbcast.lane.b32.xlu1 %v4585_v10, 336  ;;  %2195 = vbcast.lane.b32.xlu0 %v4077_v7, 256  ;;  %vm968_vm12 = vcmp.eq.s32.totalorder %v3869_v17, %v4642_v61  ;;  %vm1380_vm9 = vcmp.eq.s32.totalorder %v4125_v52, %v4642_v61  ;;  %vm972_vm1 = vcmp.eq.s32.totalorder %v3882_v25, %v4642_v61 }
 0x502   : > { %vm969_vm11 = vcmp.eq.s32.totalorder %v3902_v32, %v4642_v61  ;;  %vm973_vm3 = vcmp.eq.s32.totalorder %v3916_v38, %v4642_v61  ;;  %vm1805_vm0 = vcmp.eq.s32.totalorder %v3918_v39, %v4642_v61  ;;  %vm1806_vm2 = vcmp.eq.s32.totalorder %v3948_v48, %v4642_v61 }
 0x503   : > { %v4631_v26 = vpop.permute.xlu1 %1854  ;;  %v4633_v43 = vpop.permute.xlu0 %1508  ;;  %vm1384_vm4 = vcmp.eq.s32.totalorder %v4131_v56, %v4642_v61  ;;  %vm988_vm5 = vcmp.eq.s32.totalorder %v3997_v9, %v4642_v61  ;;  %vm1399_vm7 = vcmp.eq.s32.totalorder %v4184_v37, %v4642_v61  ;;  %vm1379_vm6 = vcmp.eq.s32.totalorder %v4148_v12, %v4642_v61 }
 0x504   : > { %vm1810_vm8 = vcmp.eq.s32.totalorder %v3961_v54, %v4642_v61  ;;  %vm1383_vm13 = vcmp.eq.s32.totalorder %v4153_v45, %v4642_v61  ;;  %v1571_v9 = vsel %vm1379_vm6, %v4499_v22, 0.0  ;;  %v1576_v37 = vsel %vm1384_vm4, %v4507_v6, 0.0 }
 0x505   : > { %2390 = vbcast.lane.b32.xlu1 %v4605_v36, 328  ;;  %2214 = vbcast.lane.b32.xlu0 %v4087_v23, 256  ;;  %v1572_v23 = vsel %vm1380_vm9, %v4497_v41, 0.0  ;;  %vm2230_vm14 = vcmp.eq.s32.totalorder %v4178_v30, %v4642_v61  ;;  %v1165_v22 = vsel %vm973_vm3, %v4491_v4, 0.0  ;;  %v1997_v6 = vsel %vm1805_vm0, %v4571_v5, 0.0 }
 0x506   : > { %v2002_v17 = vsel %vm1810_vm8, %v4593_v44, 0.0  ;;  %vm1809_vm10 = vcmp.eq.s32.totalorder %v3928_v27, %v4642_v61  ;;  %v1575_v30 = vsel %vm1383_vm13, %v4509_v15, 0.0  ;;  %vm2234_vm9 = vcmp.eq.s32.totalorder %v4182_v63, %v4642_v61 }
 0x507   : > { %v4637_v8 = vpop.permute.xlu1 %1886  ;;  %v4639_v18 = vpop.permute.xlu0 %1524  ;;  %v1164_v38 = vsel %vm972_vm1, %v4493_v35, 0.0  ;;  %v2001_v45 = vsel %vm1809_vm10, %v4581_v58, 0.0  ;;  %vm2233_vm1 = vcmp.eq.s32.totalorder %v4192_v57, %v4642_v61  ;;  %vm1811_vm3 = vcmp.eq.s32.totalorder %v3981_v60, %v4642_v61  ;;  %v6068_v60 = vld [vmem:[#allocation7_spill] sm:$0xff] }
 0x508   : > { %vm990_vm0 = vcmp.eq.s32.totalorder %v4017_v3, %v4642_v61  ;;  %vm1385_vm4 = vcmp.eq.s32.totalorder %v4158_v62, %v4642_v61 }
 0x509   : > { %2410 = vbcast.lane.b32.xlu1 %v4621_v2, 328  ;;  %1005 = vbcast.lane.b32.xlu0 %v4290_v33, 320  ;;  %v1161_v33 = vsel %vm969_vm11, %v4481_v31, 0.0  ;;  %vm974_vm11 = vcmp.eq.s32.totalorder %v3886_v28, %v4642_v61 }
 0x50a   : > { %v1604_v48 = vadd.f32 %v1572_v23, %v1161_v33 }
 0x50b   : > { %v1110_v7 = vpop.permute.xlu1 %1109  ;;  %v4646_v10 = vpop.permute.xlu0 %1894 }
 0x50c   : > { %v1180_v59 = vsel %vm988_vm5, %v1110_v7, 0.0  ;;  %vm977_vm5 = vcmp.eq.s32.totalorder %v3932_v42, %v4642_v61  ;;  %v6085_v42 = vld [vmem:[#allocation12_spill] sm:$0xff] }
 0x50d   : > { %2418 = vbcast.lane.b32.xlu1 %v4621_v2, 344  ;;  %1436 = vbcast.lane.b32.xlu0 %v4318_v49, 320  ;;  %v1998_v49 = vsel %vm1806_vm2, %v1851_v51, 0.0  ;;  %vm992_vm2 = vcmp.eq.s32.totalorder %v4009_v13, %v4642_v61 }
 0x50e   : > { %v2030_v12 = vadd.f32 %v1998_v49, %v1604_v48 }
 0x50f   : > { %v1521_v32 = vpop.permute.xlu1 %1520  ;;  %v4671_v52 = vpop.permute.xlu0 %1910 }
 0x510   : > { %v1591_v41 = vsel %vm1399_vm7, %v1521_v32, 0.0  ;;  %vm5898_vm7 = vcmask 1041409  }
 0x511   : > { %v4676_v2 = vadd.f32 %v1591_v41, %v1180_v59  ;;  %2176 = vbcast.lane.b32.xlu1 %v4061_v21, 256  ;;  %1045 = vbcast.lane.b32.xlu0 %v4339_v0, 320  ;;  %v1160_v21 = vsel %vm968_vm12, %v4483_v20, 0.0  ;;  %v1608_v20 = vadd.f32 %v1576_v37, %v1165_v22  ;;  %vm2229_vm12 = vcmp.eq.s32.totalorder %v4188_v47, %v4642_v61 }
 0x512   : > { %v1603_v31 = vadd.f32 %v1571_v9, %v1160_v21  ;;  %v1607_v47 = vadd.f32 %v1575_v30, %v1164_v38 }
 0x513   : > { %v4693_v0 = vpop.permute.xlu1 %1906  ;;  %v2275_v54 = vpop.permute.xlu0 %2274  ;;  %v2034_v4 = vadd.f32 %v2002_v17, %v1608_v20  ;;  %v6058_v20 = vld [vmem:[#allocation66_spill] sm:$0xff] }
 0x514   : > { %v2422_v56 = vsel %vm2230_vm14, %v2275_v54, 0.0  ;;  %v2029_v39 = vadd.f32 %v1997_v6, %v1603_v31  ;;  %v2033_v63 = vadd.f32 %v2001_v45, %v1607_v47  ;;  %v1577_v31 = vsel %vm1385_vm4, %v4533_v50, 0.0  ;;  %v6062_v45 = vld [vmem:[#allocation112_spill] sm:$0xff] }
 0x515   : > { %v2454_v51 = vadd.f32 %v2422_v56, %v2030_v12  ;;  %1025 = vbcast.lane.b32.xlu1 %v4299_v19, 320  ;;  %1456 = vbcast.lane.b32.xlu0 %v4354_v55, 320  ;;  %vm1403_vm6 = vcmp.eq.s32.totalorder %v6058_v20, %v4642_v61 }
 0x517   : > { %v2499_v27 = vsel %vm2484_vm15, %v2454_v51, 0.0  ;;  %v2271_v5 = vpop.permute.xlu1 %2270  ;;  %v2295_v19 = vpop.permute.xlu0 %2294 }
 0x518   : > { %v2500_v55 = vrot.slane %v2499_v27, 4  ;;  %v2421_v15 = vsel %vm2229_vm12, %v2271_v5, 0.0  ;;  %v2426_v44 = vsel %vm2234_vm9, %v2295_v19, 0.0  ;;  %v6061_v19 = vld [vmem:[#allocation106_spill] sm:$0xff]  ;;  %vm976_vm9 = vcmp.eq.s32.totalorder %v6068_v60, %v4642_v61 }
 0x519   : > { %v2453_v7 = vadd.f32 %v2421_v15, %v2029_v39  ;;  %v2458_v23 = vadd.f32 %v2426_v44, %v2034_v4  ;;  %1416 = vbcast.lane.b32.xlu1 %v4305_v14, 320  ;;  %1065 = vbcast.lane.b32.xlu0 %v4366_v34, 320 }
 0x51a   : > { %v2501_v25 = vadd.f32 %v2500_v55, %v2499_v27  ;;  %v6063_v55 = vld [vmem:[#allocation5_spill] sm:$0xff] }
 0x51b   : > { %v2492_v35 = vsel %vm2484_vm15, %v2453_v7, 0.0  ;;  %v2527_v32 = vsel %vm2484_vm15, %v2458_v23, 0.0  ;;  %v2291_v58 = vpop.permute.xlu1 %2290  ;;  %v1118_v33 = vpop.permute.xlu0 %1117  ;;  %vm970_vm13 = vcmp.eq.s32.totalorder %v6063_v55, %v4642_v61  ;;  %v6064_v7 = vld [vmem:[#allocation119_spill] sm:$0xff]  ;;  %v2003_v23 = vsel %vm1811_vm3, %v4601_v29, 0.0  ;;  %v6069_v29 = vld [vmem:[#allocation60_spill] sm:$0xff] }
 0x51c   : > { %v2502_v49 = vrot.slane %v2501_v25, 2  ;;  %v2493_v59 = vrot.slane %v2492_v35, 4  ;;  %v2528_v41 = vrot.slane %v2527_v32, 4  ;;  %v2425_v48 = vsel %vm2233_vm1, %v2291_v58, 0.0 }
 0x51d   : > { %v2457_v9 = vadd.f32 %v2425_v48, %v2033_v63  ;;  %1862 = vbcast.lane.b32.xlu1 %v4394_v11, 320  ;;  %1476 = vbcast.lane.b32.xlu0 %v4379_v16, 320  ;;  %v1182_v50 = vsel %vm990_vm0, %v1118_v33, 0.0  ;;  %v1166_v3 = vsel %vm974_vm11, %v6064_v7, 0.0  ;;  %v6066_v63 = vld [vmem:[#allocation25_spill] sm:$0xff]  ;;  %vm1388_vm1 = vcmp.eq.s32.totalorder %v6069_v29, %v4642_v61  ;;  %v6094_v29 = vld [vmem:[#allocation59_spill] sm:$0xff] }
 0x51e   : > { %v2503_v14 = vadd.f32 %v2502_v49, %v2501_v25  ;;  %v2494_v34 = vadd.f32 %v2493_v59, %v2492_v35  ;;  %v2529_v37 = vadd.f32 %v2528_v41, %v2527_v32  ;;  %v6065_v25 = vld [vmem:[#allocation15_spill] sm:$0xff]  ;;  %vm993_vm10 = vcmp.eq.s32.totalorder %v6066_v63, %v4642_v61 }
 0x51f   : > { %v2520_v21 = vsel %vm2484_vm15, %v2457_v9, 0.0  ;;  %v1130_v12 = vpop.permute.xlu1 %1129  ;;  %v1134_v54 = vpop.permute.xlu0 %1133  ;;  %vm1807_vm14 = vcmp.eq.s32.totalorder %v6065_v25, %v4642_v61  ;;  %v6067_v32 = vld [vmem:[#allocation71_spill] sm:$0xff]  ;;  %v1609_v41 = vadd.f32 %v1577_v31, %v1166_v3  ;;  %v6091_v3 = vld [vmem:[#allocation58_spill] sm:$0xff] }
 0x520   : > { %v2495_v57 = vrot.slane %v2494_v34, 2  ;;  %v2530_v22 = vrot.slane %v2529_v37, 2  ;;  %v2521_v6 = vrot.slane %v2520_v21, 4  ;;  %v2504_v17 = vrot.slane %v2503_v14, 1  ;;  %v6070_v9 = vld [vmem:[#allocation107_spill] sm:$0xff]  ;;  %v6101_v25 = vld [vmem:[#allocation18_spill] sm:$0xff] }
 0x521   : > { %1085 = vbcast.lane.b32.xlu1 %v4400_v46, 320  ;;  %1842 = vbcast.lane.b32.xlu0 %v4388_v40, 320  ;;  %v6059_v46 = vld [vmem:[#allocation69_spill] sm:$0xff]  ;;  %v1184_v62 = vsel %vm992_vm2, %v1130_v12, 0.0  ;;  %vm1404_vm12 = vcmp.eq.s32.totalorder %v6067_v32, %v4642_v61  ;;  %v1185_v49 = vsel %vm993_vm10, %v1134_v54, 0.0  ;;  %v1999_v55 = vsel %vm1807_vm14, %v4631_v26, 0.0 }
 0x522   : > { %v2496_v16 = vadd.f32 %v2495_v57, %v2494_v34  ;;  %v2531_v11 = vadd.f32 %v2530_v22, %v2529_v37  ;;  %v2522_v56 = vadd.f32 %v2521_v6, %v2520_v21  ;;  %vm1401_vm8 = vcmp.eq.s32.totalorder %v6059_v46, %v4642_v61  ;;  %v6072_v34 = vld [vmem:[#allocation20_spill] sm:$0xff]  ;;  %v6073_v37 = vld [vmem:[#allocation126_spill] sm:$0xff]  ;;  %v6075_v22 = vld [vmem:[#allocation13_spill] sm:$0xff] }
 0x523   : > { %v1541_v51 = vpop.permute.xlu1 %1540  ;;  %v1529_v40 = vpop.permute.xlu0 %1528  ;;  %v2505_v4 = vadd.f32 %v2504_v17, %v2503_v14  ;;  %v6071_v14 = vld [vmem:[#allocation113_spill] sm:$0xff]  ;;  %vm1814_vm11 = vcmp.eq.s32.totalorder %v6072_v34, %v4642_v61  ;;  %v1580_v21 = vsel %vm1388_vm1, %v6073_v37, 0.0  ;;  %v6074_v57 = vld [vmem:[#allocation8_spill] sm:$0xff]  ;;  %vm980_vm0 = vcmp.eq.s32.totalorder %v6075_v22, %v4642_v61  ;;  %v6076_v6 = vld [vmem:[#allocation54_spill] sm:$0xff] }
 0x524   : > { %v2532_v30 = vrot.slane %v2531_v11, 1  ;;  %v2523_v38 = vrot.slane %v2522_v56, 2  ;;  %v1595_v39 = vsel %vm1403_vm6, %v1541_v51, 0.0  ;;  %v1593_v5 = vsel %vm1401_vm8, %v1529_v40, 0.0  ;;  %v6077_v17 = vld [vmem:[#allocation56_spill] sm:$0xff]  ;;  %v6080_v51 = vld [vmem:[#allocation122_spill] sm:$0xff] }
 0x525   : > { %v4758_v27 = vadd.f32 %v1595_v39, %v1184_v62  ;;  %1496 = vbcast.lane.b32.xlu1 %v6061_v19, 320  ;;  %2286 = vbcast.lane.b32.xlu0 %v6062_v45, 320  ;;  %v2497_v15 = vrot.slane %v2496_v16, 1  ;;  %v4764_v47 = vadd.f32 %v1593_v5, %v1182_v50  ;;  %vm978_vm3 = vcmp.eq.s32.totalorder %v6074_v57, %v4642_v61  ;;  %v6082_v39 = vld [vmem:[#allocation57_spill] sm:$0xff]  ;;  %v6083_v5 = vld [vmem:[#allocation108_spill] sm:$0xff]  ;;  %v6084_v19 = vld [vmem:[#allocation114_spill] sm:$0xff] }
 0x526   : > { %v2533_v44 = vadd.f32 %v2532_v30, %v2531_v11  ;;  %v2524_v13 = vadd.f32 %v2523_v38, %v2522_v56  ;;  %vm1381_vm2 = vcmp.eq.s32.totalorder %v6076_v6, %v4642_v61  ;;  %vm1387_vm4 = vcmp.eq.s32.totalorder %v6077_v17, %v4642_v61  ;;  %v6078_v56 = vld [vmem:[#allocation67_spill] sm:$0xff]  ;;  %v6081_v30 = vld [vmem:[#allocation16_spill] sm:$0xff]  ;;  %v6087_v45 = vld [vmem:[#allocation62_spill] sm:$0xff] }
 0x527   : > { %6060 = vst [vmem:[#allocation66_spill] sm:$0xff] %v4758_v27  ;;  %v4778_v35 = vpop.permute.xlu1 %1926  ;;  %v1545_v58 = vpop.permute.xlu0 %1544  ;;  %v2498_v12 = vadd.f32 %v2497_v15, %v2496_v16  ;;  %v2035_v11 = vadd.f32 %v2003_v23, %v1609_v41  ;;  %vm2235_vm6 = vcmp.eq.s32.totalorder %v6078_v56, %v4642_v61  ;;  %v6079_v16 = vld [vmem:[#allocation10_spill] sm:$0xff]  ;;  %v1169_v46 = vsel %vm977_vm5, %v6080_v51, 0.0  ;;  %v6088_v15 = vld [vmem:[#allocation64_spill] sm:$0xff]  ;;  %v6095_v41 = vld [vmem:[#allocation127_spill] sm:$0xff] }
 0x528   : > { %v4783_v28 = vsel %vm5898_vm7, %v2533_v44, %v2505_v4  ;;  %v2525_v33 = vrot.slane %v2524_v13, 1  ;;  %v1596_v59 = vsel %vm1404_vm12, %v1545_v58, 0.0  ;;  %vm981_vm8 = vcmp.eq.s32.totalorder %v6079_v16, %v4642_v61  ;;  %v6089_v44 = vld [vmem:[#allocation65_spill] sm:$0xff]  ;;  %v6092_v23 = vld [vmem:[#allocation118_spill] sm:$0xff]  ;;  %v6098_v6 = vld [vmem:[#allocation115_spill] sm:$0xff] }
 0x529   : > { %v4789_v48 = vadd.f32 %v1596_v59, %v1185_v49  ;;  %1882 = vbcast.lane.b32.xlu1 %v6070_v9, 320  ;;  %1125 = vbcast.lane.b32.xlu0 %v6071_v14, 320  ;;  %v2006_v40 = vsel %vm1814_vm11, %v4611_v1, 0.0  ;;  %vm1813_vm10 = vcmp.eq.s32.totalorder %v6081_v30, %v4642_v61  ;;  %vm1391_vm12 = vcmp.eq.s32.totalorder %v6082_v39, %v4642_v61  ;;  %v6086_v1 = vld [vmem:[#allocation17_spill] sm:$0xff]  ;;  %v6100_v17 = vld [vmem:[#allocation14_spill] sm:$0xff]  ;;  %v6114_v16 = vld [vmem:[#allocation136_spill] sm:$0xff] }
 0x52a   : > { %v2526_v54 = vadd.f32 %v2525_v33, %v2524_v13  ;;  %v1612_v4 = vadd.f32 %v1580_v21, %v1169_v46  ;;  %vm1389_vm11 = vcmp.eq.s32.totalorder %v6087_v45, %v4642_v61  ;;  %v6090_v13 = vld [vmem:[#allocation124_spill] sm:$0xff]  ;;  %vm1393_vm5 = vcmp.eq.s32.totalorder %v6091_v3, %v4642_v61  ;;  %v6096_v14 = vld [vmem:[#allocation61_spill] sm:$0xff] }
 0x52b   : > { %v2299_v31 = vpop.permute.xlu1 %2298  ;;  %v4806_v20 = vpop.permute.xlu0 %1914  ;;  %v1573_v7 = vsel %vm1381_vm2, %v6090_v13, 0.0  ;;  %v1162_v63 = vsel %vm970_vm13, %v6092_v23, 0.0  ;;  %v6093_v33 = vld [vmem:[#allocation68_spill] sm:$0xff]  ;;  %v1579_v9 = vsel %vm1387_vm4, %v6095_v41, 0.0  ;;  %vm1397_vm13 = vcmp.eq.s32.totalorder %v6096_v14, %v4642_v61  ;;  %v6102_v26 = vld [vmem:[#allocation121_spill] sm:$0xff] }
 0x52c   : > { %v4818_v38 = vsel %vm5898_vm7, %v2526_v54, %v2498_v12  ;;  %v2427_v62 = vsel %vm2235_vm6, %v2299_v31, 0.0  ;;  %vm1392_vm6 = vcmp.eq.s32.totalorder %v6088_v15, %v4642_v61  ;;  %vm1395_vm7 = vcmp.eq.s32.totalorder %v6089_v44, %v4642_v61  ;;  %v6097_v54 = vld [vmem:[#allocation109_spill] sm:$0xff]  ;;  %v6103_v31 = vld [vmem:[#allocation132_spill] sm:$0xff]  ;;  %v6124_v44 = vld [vmem:[#allocation27_spill] sm:$0xff] }
 0x52d   : > { %v2459_v50 = vadd.f32 %v2427_v62, %v2035_v11  ;;  %1105 = vbcast.lane.b32.xlu1 %v6083_v5, 320  ;;  %1536 = vbcast.lane.b32.xlu0 %v6084_v19, 320  ;;  %v2038_v32 = vadd.f32 %v2006_v40, %v1612_v4  ;;  %vm2238_vm1 = vcmp.eq.s32.totalorder %v6093_v33, %v4642_v61  ;;  %v6099_v11 = vld [vmem:[#allocation73_spill] sm:$0xff]  ;;  %v1168_v56 = vsel %vm976_vm9, %v6102_v26, 0.0  ;;  %v6104_v40 = vld [vmem:[#allocation75_spill] sm:$0xff]  ;;  %v6120_v15 = vld [vmem:[#allocation140_spill] sm:$0xff] }
 0x52e   : > { %v1605_v21 = vadd.f32 %v1573_v7, %v1162_v63  ;;  %vm2231_vm2 = vcmp.eq.s32.totalorder %v6099_v11, %v4642_v61  ;;  %vm986_vm14 = vcmp.eq.s32.totalorder %v6101_v25, %v4642_v61  ;;  %v1583_v51 = vsel %vm1391_vm12, %v6103_v31, 0.0  ;;  %v6105_v62 = vld [vmem:[#allocation19_spill] sm:$0xff]  ;;  %v6107_v7 = vld [vmem:[#allocation128_spill] sm:$0xff]  ;;  %v6108_v63 = vld [vmem:[#allocation129_spill] sm:$0xff] }
 0x52f   : > { %v2534_v58 = vsel %vm2484_vm15, %v2459_v50, 0.0  ;;  %v2315_v49 = vpop.permute.xlu1 %2314  ;;  %v4847_v59 = vpop.permute.xlu0 %1930  ;;  %vm989_vm4 = vcmp.eq.s32.totalorder %v6105_v62, %v4642_v61  ;;  %v1611_v4 = vadd.f32 %v1579_v9, %v1168_v56  ;;  %v6106_v50 = vld [vmem:[#allocation134_spill] sm:$0xff]  ;;  %v1170_v23 = vsel %vm978_vm3, %v6107_v7, 0.0  ;;  %v6111_v9 = vld [vmem:[#allocation21_spill] sm:$0xff]  ;;  %v6119_v56 = vld [vmem:[#allocation139_spill] sm:$0xff] }
 0x530   : > { %v2535_v34 = vrot.slane %v2534_v58, 4  ;;  %v2430_v37 = vsel %vm2238_vm1, %v2315_v49, 0.0  ;;  %vm2237_vm1 = vcmp.eq.s32.totalorder %v6104_v40, %v4642_v61  ;;  %v1581_v5 = vsel %vm1389_vm11, %v6106_v50, 0.0  ;;  %v6110_v49 = vld [vmem:[#allocation131_spill] sm:$0xff]  ;;  %v6117_v11 = vld [vmem:[#allocation138_spill] sm:$0xff]  ;;  %v6123_v7 = vld [vmem:[#allocation24_spill] sm:$0xff] }
 0x531   : > { %v2462_v12 = vadd.f32 %v2430_v37, %v2038_v32  ;;  %1516 = vbcast.lane.b32.xlu1 %v6097_v54, 320  ;;  %1922 = vbcast.lane.b32.xlu0 %v6098_v6, 320  ;;  %v2031_v60 = vadd.f32 %v1999_v55, %v1605_v21  ;;  %v1172_v32 = vsel %vm980_vm0, %v6108_v63, 0.0  ;;  %v1173_v41 = vsel %vm981_vm8, %v6110_v49, 0.0  ;;  %v6113_v37 = vld [vmem:[#allocation116_spill] sm:$0xff]  ;;  %v6115_v54 = vld [vmem:[#allocation22_spill] sm:$0xff] }
 0x532   : > { %v2536_v46 = vadd.f32 %v2535_v34, %v2534_v58  ;;  %v6109_v58 = vld [vmem:[#allocation63_spill] sm:$0xff]  ;;  %v4905_v57 = vadd.f32 %v1583_v51, %v1172_v32  ;;  %v2005_v22 = vsel %vm1813_vm10, %v4637_v8, 0.0  ;;  %vm1815_vm3 = vcmp.eq.s32.totalorder %v6111_v9, %v4642_v61  ;;  %v6112_v34 = vld [vmem:[#allocation110_spill] sm:$0xff]  ;;  %v6128_v49 = vld [vmem:[#allocation120_spill] sm:$0xff] }
 0x533   : > { %v2555_v19 = vsel %vm2484_vm15, %v2462_v12, 0.0  ;;  %v4886_v13 = vpop.permute.xlu1 %1137  ;;  %v2279_v39 = vpop.permute.xlu0 %2278  ;;  %vm1400_vm9 = vcmp.eq.s32.totalorder %v6109_v58, %v4642_v61  ;;  %vm2719_vm0 = vcmask 1042434   ;;  %v4915_v21 = vadd.f32 %v1581_v5, %v1170_v23  ;;  %v6116_v8 = vld [vmem:[#allocation23_spill] sm:$0xff]  ;;  %v6138_v62 = vld [vmem:[#allocation117_spill] sm:$0xff] }
 0x534   : > { %v2556_v45 = vrot.slane %v2555_v19, 4  ;;  %v2423_v33 = vsel %vm2231_vm2, %v2279_v39, 0.0  ;;  %v1584_v12 = vsel %vm1392_vm6, %v6114_v16, 0.0  ;;  %vm1818_vm8 = vcmp.eq.s32.totalorder %v6115_v54, %v4642_v61 }
 0x535   : > { %v2455_v55 = vadd.f32 %v2423_v33, %v2031_v60  ;;  %1902 = vbcast.lane.b32.xlu1 %v6112_v34, 320  ;;  %2306 = vbcast.lane.b32.xlu0 %v6113_v37, 320  ;;  %vm1817_vm10 = vcmp.eq.s32.totalorder %v6116_v8, %v4642_v61  ;;  %v2537_v30 = vrot.slane %v2536_v46, 2  ;;  %vm6118_vm12 = vcmp.eq.s32.totalorder %v6086_v1, %v4642_v61  ;;  %v6127_v33 = vld [vmem:[#allocation111_spill] sm:$0xff]  ;;  %v6129_v34 = vld [vmem:[#allocation77_spill] sm:$0xff] }
 0x536   : > { %v2557_v6 = vadd.f32 %v2556_v45, %v2555_v19  ;;  %v1176_v26 = vsel %vm6118_vm12, %v6117_v11, 0.0  ;;  %v1587_v31 = vsel %vm1395_vm7, %v6119_v56, 0.0  ;;  %vm6121_vm11 = vcmp.eq.s32.totalorder %v6085_v42, %v4642_v61  ;;  %v6122_v19 = vld [vmem:[#allocation142_spill] sm:$0xff]  ;;  %v6130_v37 = vld [vmem:[#allocation141_spill] sm:$0xff]  ;;  %v6135_v56 = vld [vmem:[#allocation31_spill] sm:$0xff] }
 0x537   : > { %v1174_v51 = vsel %vm6121_vm11, %v6120_v15, 0.0  ;;  %v2506_v50 = vsel %vm2484_vm15, %v2455_v55, 0.0  ;;  %v4938_v5 = vpop.permute.xlu1 %1153  ;;  %v2311_v60 = vpop.permute.xlu0 %2310  ;;  %v1585_v1 = vsel %vm1393_vm5, %v6122_v19, 0.0  ;;  %v2037_v39 = vadd.f32 %v2005_v22, %v1611_v4  ;;  %v6126_v4 = vld [vmem:[#allocation29_spill] sm:$0xff] }
 0x538   : > { %vm1821_vm6 = vcmp.eq.s32.totalorder %v6123_v7, %v4642_v61  ;;  %vm1819_vm7 = vcmp.eq.s32.totalorder %v6124_v44, %v4642_v61  ;;  %v2558_v23 = vrot.slane %v2557_v6, 2  ;;  %v2507_v42 = vrot.slane %v2506_v50, 4 }
 0x539   : > { %v4948_v63 = vadd.f32 %v1584_v12, %v1173_v41  ;;  %vm6125_vm2 = vcmp.eq.s32.totalorder %v6094_v29, %v4642_v61  ;;  %v1589_v3 = vsel %vm1397_vm13, %v4633_v43, 0.0  ;;  %vm1822_vm5 = vcmp.eq.s32.totalorder %v6126_v4, %v4642_v61  ;;  %2266 = vbcast.lane.b32.xlu1 %v6127_v33, 320  ;;  %1556 = vbcast.lane.b32.xlu0 %v6128_v49, 320  ;;  %v3290_v41 = vpop.f32.mrb[0].mxu0  ;;  %v6132_v12 = vld [vmem:[#allocation143_spill] sm:$0xff] }
 0x53a   : > { %v1588_v32 = vsel %vm6125_vm2, %v4625_v53, 0.0  ;;  %v2429_v45 = vsel %vm2237_vm1, %v2311_v60, 0.0  ;;  %v2538_v22 = vadd.f32 %v2537_v30, %v2536_v46  ;;  %v2559_v29 = vadd.f32 %v2558_v23, %v2557_v6  ;;  %v4967_v43 = vpop.f32.mrb[1].mxu0  ;;  %v5021_v33 = vld [vmem:[%s5787_s4] ss:$0 sm:$0xff] }
 0x53b   : > { %v2508_v53 = vadd.f32 %v2507_v42, %v2506_v50  ;;  %v2461_v55 = vadd.f32 %v2429_v45, %v2037_v39  ;;  %vm1405_vm12 = vcmp.eq.s32.totalorder %v6129_v34, %v4642_v61  ;;  %v1619_v14 = vadd.f32 %v1587_v31, %v1176_v26  ;;  %v1549_v30 = vpop.permute.xlu1 %1548  ;;  %v4977_v6 = vpop.permute.xlu0 %1149  ;;  %v6140_v42 = vld [vmem:[#allocation28_spill] sm:$0xff] }
 0x53c   : > { %vm6131_vm13 = vcmp.eq.s32.totalorder %v6100_v17, %v4642_v61  ;;  %v1617_v16 = vadd.f32 %v1585_v1, %v1174_v51  ;;  %v1178_v46 = vsel %vm986_vm14, %v6132_v12, 0.0  ;;  %6133 = vst [vmem:[#allocation69_spill] sm:$0xff] %v4977_v6  ;;  %v4983_v11 = vsel %vm989_vm4, %v4627_v24, 0.0  ;;  %v6139_v24 = vld [vmem:[#allocation123_spill] sm:$0xff]  ;;  %v3293_v60 = vpop.f32.mrb[2].mxu0  ;;  %v6142_v45 = vld [vmem:[#allocation72_spill] sm:$0xff] }
 0x53d   : > { %v1177_v40 = vsel %vm6131_vm13, %v6130_v37, 0.0  ;;  %6134 = vst [vmem:[#allocation106_spill] sm:$0xff] %v4983_v11  ;;  %v2560_v26 = vrot.slane %v2559_v29, 1  ;;  %vm994_vm1 = vcmp.eq.s32.totalorder %v6135_v56, %v4642_v61  ;;  %v2509_v17 = vrot.slane %v2508_v53, 2  ;;  %1145 = vbcast.lane.b32.xlu1 %v6138_v62, 320  ;;  %1942 = vbcast.lane.b32.xlu0 %v6139_v24, 320 }
 0x53e   : > { %v2548_v31 = vsel %vm2484_vm15, %v2461_v55, 0.0  ;;  %v1620_v15 = vadd.f32 %v1588_v32, %v1177_v40  ;;  %v4988_v51 = vadd.f32 %v1589_v3, %v1178_v46  ;;  %v4994_v25 = vsel %vm1400_vm9, %v4639_v18, 0.0  ;;  %v5004_v58 = vpop.f32.mrb[3].mxu0  ;;  %v6144_v55 = vld [vmem:[#allocation135_spill] sm:$0xff]  ;;  %v6145_v37 = vld [vmem:[#allocation125_spill] sm:$0xff]  ;;  %v6166_v11 = vld [vmem:[#allocation76_spill] sm:$0xff] }
 0x53f   : > { %6137 = vst [vmem:[#allocation5_spill] sm:$0xff] %v4994_v25  ;;  %v2549_v50 = vrot.slane %v2548_v31, 4  ;;  %v2007_v19 = vsel %vm1815_vm3, %v4646_v10, 0.0  ;;  %v2539_v1 = vrot.slane %v2538_v22, 1  ;;  %v2561_v39 = vadd.f32 %v2560_v26, %v2559_v29  ;;  %v1565_v10 = vpop.permute.xlu1 %1564  ;;  %v5014_v3 = vpop.permute.xlu0 %1560  ;;  %v6146_v40 = vld [vmem:[#allocation35_spill] sm:$0xff] }
 0x540   : > { %6136 = vst [vmem:[#allocation112_spill] sm:$0xff] %v4988_v51  ;;  %v2510_v23 = vadd.f32 %v2509_v17, %v2508_v53  ;;  %vm1825_vm4 = vcmp.eq.s32.totalorder %v6140_v42, %v4642_v61  ;;  %v2010_v18 = vsel %vm1818_vm8, %v4671_v52, 0.0  ;;  %v2009_v32 = vsel %vm1817_vm10, %v4693_v0, 0.0  ;;  %6141 = vst [vmem:[#allocation119_spill] sm:$0xff] %v5014_v3  ;;  %v6143_v0 = vld [vmem:[#allocation79_spill] sm:$0xff]  ;;  %v3296_v8 = vpop.f32.mrb[4].mxu0 }
 0x541   : > { %v2550_v9 = vadd.f32 %v2549_v50, %v2548_v31  ;;  %vm2241_vm14 = vcmp.eq.s32.totalorder %v6142_v45, %v4642_v61  ;;  %vm2791_vm9 = vcmp.lt.s32.totalorder %v4642_v61, 8  ;;  %v5026_v52 = vsel %vm2719_vm0, %v2561_v39, %v4783_v28  ;;  %1982 = vbcast.lane.b32.xlu1 %v6144_v55, 320  ;;  %2326 = vbcast.lane.b32.xlu0 %v6145_v37, 320  ;;  %v6147_v50 = vld [vmem:[#allocation81_spill] sm:$0xff]  ;;  %v6151_v39 = vld [vmem:[#allocation130_spill] sm:$0xff] }
 0x542   : > { %v2511_v54 = vrot.slane %v2510_v23, 1  ;;  %vm1408_vm3 = vcmp.eq.s32.totalorder %v6143_v0, %v4642_v61  ;;  %vm2805_vm8 = vcmp.ge.s32.totalorder %v4642_v61, 8  ;;  %vm2806_vm10 = vcmp.lt.s32.totalorder %v4642_v61, 16 }
 0x543   : > { %v5033_v49 = vadd.f32 %v2007_v19, %v4915_v21  ;;  %v2013_v29 = vsel %vm1821_vm6, %v4778_v35, 0.0  ;;  %v2011_v28 = vsel %vm1819_vm7, %v4806_v20, 0.0  ;;  %v2551_v53 = vrot.slane %v2550_v9, 2  ;;  %v503_v21 = vpop.f32.mrb[5].mxu0  ;;  %v1935_v31 = vpop.permute.xlu1 %1934  ;;  %vm2807_vm7 = vmand %vm2805_vm8, %vm2806_vm10 }
 0x544   : > { %vm1823_vm11 = vcmp.eq.s32.totalorder %v6146_v40, %v4642_v61  ;;  %v2540_v12 = vadd.f32 %v2539_v1, %v2538_v22  ;;  %v2014_v35 = vsel %vm1822_vm5, %v4847_v59, 0.0  ;;  %v2512_v7 = vadd.f32 %v2511_v54, %v2510_v23  ;;  %v3299_v20 = vpop.f32.mrb[6].mxu0  ;;  %v1947_v22 = vpop.permute.xlu0 %1946 }
 0x545   : > { %v5052_v46 = vadd.f32 %v3290_v41, %v5021_v33  ;;  %v5055_v44 = vadd.f32 %v2010_v18, %v4948_v63  ;;  %v2552_v26 = vadd.f32 %v2551_v53, %v2550_v9  ;;  %v1597_v17 = vsel %vm1405_vm12, %v1549_v30, 0.0  ;;  %v513_v62 = vpop.f32.mrb[7].mxu0  ;;  %1962 = vbcast.lane.b32.xlu0 %v6151_v39, 320 }
 0x546   : > { %vm2239_vm6 = vcmp.eq.s32.totalorder %v6147_v50, %v4642_v61  ;;  %v6148_v4 = vmov 0.0   ;;  %v2041_v63 = vadd.f32 %v2009_v32, %v4905_v57  ;;  %v5072_v41 = vadd.f32 %v2013_v29, %v1619_v14  ;;  %v6150_v14 = vld [vmem:[#allocation137_spill] sm:$0xff]  ;;  %v3302_v23 = vpop.f32.mrb[8].mxu0  ;;  %v6154_v29 = vld [vmem:[#allocation83_spill] sm:$0xff] }
 0x547   : > { %v5065_v59 = vsel %vm2791_vm9, 1.0, %v6148_v4  ;;  %vm6149_vm2 = vcmask 1041409   ;;  %v5079_v30 = vadd.f32 %v5021_v33, %v4967_v43  ;;  %v5081_v24 = vadd.f32 %v2011_v28, %v1617_v16  ;;  %2366 = vbcast.lane.b32.xlu1 %v6150_v14, 320  ;;  %v523_v56 = vpop.f32.mrb[9].mxu0  ;;  %v5106_v9 = vpop.permute.xlu1 %1950 }
 0x548   : > { %v5075_v34 = vsel %vm6149_vm2, %v2540_v12, %v2512_v7  ;;  %v5083_v19 = vadd.f32 %v2014_v35, %v1620_v15  ;;  %v1186_v1 = vsel %vm994_vm1, %v4886_v13, 0.0  ;;  %v2553_v57 = vrot.slane %v2552_v26, 1  ;;  %6153 = vst [vmem:[#allocation25_spill] sm:$0xff] %v5106_v9  ;;  %v2331_v54 = vpop.permute.xlu0 %2330  ;;  %v6156_v12 = vld [vmem:[#allocation133_spill] sm:$0xff] }
 0x549   : > { %v5091_v18 = vadd.f32 %v1597_v17, %v1186_v1  ;;  %v5095_v43 = vmul.f32 %v5065_v59, %v5052_v46  ;;  %v5098_v16 = vsel %vm2807_vm7, 1.0, %v6148_v4  ;;  %v5101_v15 = vadd.f32 %v3293_v60, %v5021_v33  ;;  %2346 = vbcast.lane.b32.xlu0 %v6156_v12, 320 }
 0x54a   : > { %v2554_v13 = vadd.f32 %v2553_v57, %v2552_v26  ;;  %v2017_v32 = vsel %vm1825_vm4, %v1947_v22, 0.0  ;;  %vm2242_vm5 = vcmp.eq.s32.totalorder %v6154_v29, %v4642_v61  ;;  %vm2835_vm12 = vcmp.ge.s32.totalorder %v4642_v61, 24  ;;  %v6159_v22 = vld [vmem:[#allocation85_spill] sm:$0xff]  ;;  %v6160_v57 = vld [vmem:[#allocation144_spill] sm:$0xff] }
 0x54b   : > { %6152 = vst [vmem:[#allocation15_spill] sm:$0xff] %v5091_v18  ;;  %vm2836_vm13 = vcmp.lt.s32.totalorder %v4642_v61, 32  ;;  %v2433_v60 = vsel %vm2241_vm14, %v2331_v54, 0.0  ;;  %v5117_v28 = vmul.f32 %v5098_v16, %v5052_v46  ;;  %v5121_v42 = vmul.f32 %v5065_v59, %v5079_v30  ;;  %2386 = vbcast.lane.b32.xlu1 %v4605_v36, 320  ;;  %v2319_v0 = vpop.permute.xlu1 %2318 }
 0x54c   : > { %v5125_v53 = vmul.f32 %v5098_v16, %v5079_v30  ;;  %v5129_v55 = vsel %vm2719_vm0, %v2554_v13, %v4818_v38  ;;  %v5134_v45 = vsel %vm1408_vm3, %v1565_v10, 0.0  ;;  %v2465_v37 = vadd.f32 %v2433_v60, %v2041_v63  ;;  %vm2837_vm1 = vmand %vm2835_vm12, %vm2836_vm13  ;;  %v5160_v26 = vpop.permute.xlu0 %1157 }
 0x54d   : > { %6155 = vst [vmem:[#allocation71_spill] sm:$0xff] %v5134_v45  ;;  %v5140_v35 = vadd.f32 %v5021_v33, %v5004_v58  ;;  %v5145_v7 = vsel %vm1823_vm11, %v1935_v31, 0.0  ;;  %v5148_v38 = vadd.f32 %v2017_v32, %v4676_v2  ;;  %v5152_v10 = vmul.f32 %v5065_v59, %v5101_v15  ;;  %6158 = vst [vmem:[#allocation60_spill] sm:$0xff] %v5160_v26 }
 0x54e   : > { %6157 = vst [vmem:[#allocation7_spill] sm:$0xff] %v5145_v7  ;;  %v5157_v36 = vadd.f32 %v3296_v8, %v5021_v33  ;;  %v2576_v58 = vsel %vm2484_vm15, %v2465_v37, 0.0  ;;  %v5164_v40 = vmul.f32 %v5098_v16, %v5101_v15  ;;  %v5167_v2 = vadd.f32 %v5021_v33, %v503_v21  ;;  %2406 = vbcast.lane.b32.xlu0 %v6160_v57, 320 }
 0x54f   : > { %v5170_v17 = vadd.f32 %v3299_v20, %v5021_v33  ;;  %v2577_v31 = vrot.slane %v2576_v58, 4  ;;  %v2431_v8 = vsel %vm2239_vm6, %v2319_v0, 0.0  ;;  %vm2245_vm4 = vcmp.eq.s32.totalorder %v6159_v22, %v4642_v61  ;;  %v2335_v13 = vpop.permute.xlu1 %2334 }
 0x550   : > { %v5178_v63 = vadd.f32 %v5021_v33, %v513_v62  ;;  %v5181_v1 = vadd.f32 %v3302_v23, %v5021_v33  ;;  %v2463_v21 = vadd.f32 %v2431_v8, %v5033_v49  ;;  %v5186_v20 = vsel %vm2837_vm1, 1.0, %v6148_v4  ;;  %v5206_v32 = vpop.permute.xlu0 %1966 }
 0x551   : > { %v5190_v50 = vmul.f32 %v5065_v59, %v5140_v35  ;;  %vm2820_vm14 = vcmp.ge.s32.totalorder %v4642_v61, 16  ;;  %v2578_v14 = vadd.f32 %v2577_v31, %v2576_v58  ;;  %vm2721_vm9 = vcmask 1043459   ;;  %6161 = vst [vmem:[#allocation107_spill] sm:$0xff] %v5206_v32  ;;  %v6163_v32 = vld [vmem:[#allocation32_spill] sm:$0xff] }
 0x552   : > { %v5195_v62 = vmul.f32 %v5186_v20, %v5101_v15  ;;  %v5199_v49 = vmul.f32 %v5098_v16, %v5140_v35  ;;  %v5203_v39 = vmul.f32 %v5065_v59, %v5157_v36  ;;  %v2562_v23 = vsel %vm2484_vm15, %v2463_v21, 0.0 }
 0x553   : > { %v5210_v54 = vmul.f32 %v5065_v59, %v5167_v2  ;;  %v5214_v60 = vmul.f32 %v5065_v59, %v5170_v17  ;;  %v5217_v37 = vadd.f32 %v5021_v33, %v523_v56  ;;  %v2579_v12 = vrot.slane %v2578_v14, 2 }
 0x554   : > { %v2563_v58 = vrot.slane %v2562_v23, 4  ;;  %v2434_v0 = vsel %vm2242_vm5, %v2335_v13, 0.0  ;;  %v5224_v31 = vmul.f32 %v5065_v59, %v5178_v63  ;;  %v5229_v21 = vmul.f32 %v5065_v59, %v5181_v1  ;;  %v2351_v26 = vpop.permute.xlu0 %2350 }
 0x555   : > { %v2466_v8 = vadd.f32 %v2434_v0, %v5055_v44  ;;  %v5233_v33 = vmul.f32 %v5065_v59, %v5217_v37  ;;  %v2816_v56 = vmul.f32 %v5098_v16, %v5178_v63  ;;  %v2580_v57 = vadd.f32 %v2579_v12, %v2578_v14  ;;  %v5242_v0 = vpop.permute.xlu1 %1568  ;;  %v6164_v59 = vld [vmem:[#allocation86_spill] sm:$0xff] }
 0x556   : > { %v2564_v29 = vadd.f32 %v2563_v58, %v2562_v23  ;;  %v2817_v13 = vmul.f32 %v5098_v16, %v5170_v17  ;;  %v3360_v27 = vpack.c.bf16 %v5095_v43, %v5121_v42  ;;  %6162 = vst [vmem:[#allocation113_spill] sm:$0xff] %v5242_v0  ;;  %vm1827_vm3 = vcmp.eq.s32.totalorder %v6163_v32, %v4642_v61 }
 0x557   : > { %v2583_v44 = vsel %vm2484_vm15, %v2466_v8, 0.0  ;;  %vm2249_vm8 = vcmp.eq.s32.totalorder %v6164_v59, %v4642_v61  ;;  %v2818_v14 = vmul.f32 %v5098_v16, %v5217_v37  ;;  %v2819_v23 = vmul.f32 %v5098_v16, %v5181_v1 }
 0x558   : > { %v3364_v43 = vpack.c.bf16 %v5152_v10, %v5190_v50  ;;  %v2581_v42 = vrot.slane %v2580_v57, 1  ;;  %v2565_v12 = vrot.slane %v2564_v29, 2  ;;  %v2584_v58 = vrot.slane %v2583_v44, 4  ;;  %v5266_v25 = vpop.permute.xlu0 %1986 }
 0x559   : > { %v5256_v8 = vmul.f32 %v5186_v20, %v5140_v35  ;;  %v2437_v0 = vsel %vm2245_vm4, %v2351_v26, 0.0  ;;  %v5263_v3 = vmul.f32 %v5098_v16, %v5157_v36  ;;  %v3358_v6 = vpack.c.bf16 %v2817_v13, %v2816_v56  ;;  %v1955_v45 = vpop.permute.xlu1 %1954  ;;  %6165 = vst [vmem:[#allocation20_spill] sm:$0xff] %v5266_v25  ;;  %v6167_v13 = vld [vmem:[#allocation34_spill] sm:$0xff] }
 0x55a   : > { %v3362_v9 = vpack.c.bf16 %v2819_v23, %v2818_v14  ;;  %v2582_v7 = vadd.f32 %v2581_v42, %v2580_v57  ;;  %v2566_v51 = vadd.f32 %v2565_v12, %v2564_v29  ;;  %v2585_v10 = vadd.f32 %v2584_v58, %v2583_v44  ;;  %v6169_v58 = vld [vmem:[#allocation84_spill] sm:$0xff] }
 0x55b   : > { %v2469_v50 = vadd.f32 %v2437_v0, %v5072_v41  ;;  %vm2243_vm10 = vcmp.eq.s32.totalorder %v6166_v11, %v4642_v61  ;;  %3359 = vmatprep.subr.bf16.mxu0 %v3358_v6  ;;  %vm2821_vm11 = vcmp.lt.s32.totalorder %v4642_v61, 24  ;;  %v3368_v26 = vpack.c.bf16 %v5203_v39, %v5210_v54 }
 0x55c   : > { %v2567_v57 = vrot.slane %v2566_v51, 1  ;;  %v2586_v41 = vrot.slane %v2585_v10, 2  ;;  %vm1830_vm6 = vcmp.eq.s32.totalorder %v6167_v13, %v4642_v61  ;;  %v5282_v6 = vmul.f32 %v5186_v20, %v5157_v36  ;;  %3361 = vmatpush3.bf16.msra.mxu0 %v3360_v27  ;;  %vm2822_vm7 = vmand %vm2820_vm14, %vm2821_vm11  ;;  %v2371_v12 = vpop.permute.xlu0 %2370 }
 0x55d   : > { %v2604_v29 = vsel %vm2484_vm15, %v2469_v50, 0.0  ;;  %v5288_v54 = vsel %vm2721_vm9, %v2582_v7, %v5129_v55  ;;  %v5292_v44 = vmul.f32 %v5098_v16, %v5167_v2  ;;  %v5296_v0 = vmul.f32 %v5186_v20, %v5167_v2  ;;  %3363 = vmatprep.subr.bf16.mxu0 %v3362_v9  ;;  %v1971_v7 = vpop.permute.xlu1 %1970  ;;  %v6168_v16 = vld [vmem:[#allocation78_spill] sm:$0xff] }
 0x55e   : > { %v2605_v39 = vrot.slane %v2604_v29, 4  ;;  %v2568_v14 = vadd.f32 %v2567_v57, %v2566_v51  ;;  %v2587_v23 = vadd.f32 %v2586_v41, %v2585_v10  ;;  %vm5903_vm2 = vcmask 1044484  }
 0x55f   : > { %v5300_v27 = vmul.f32 %v5186_v20, %v5170_v17  ;;  %v3203_v42 = vsel %vm2822_vm7, 1.0, %v6148_v4  ;;  %vm2246_vm5 = vcmp.eq.s32.totalorder %v6168_v16, %v4642_v61  ;;  %vm2251_vm12 = vcmp.eq.s32.totalorder %v6169_v58, %v4642_v61 }
 0x560   : > { %v2606_v55 = vadd.f32 %v2605_v39, %v2604_v29  ;;  %v5309_v51 = vmul.f32 %v5186_v20, %v5178_v63  ;;  %v2825_v9 = vmul.f32 %v3203_v42, %v5079_v30  ;;  %v2826_v10 = vmul.f32 %v3203_v42, %v5052_v46  ;;  %3365 = vmatpush3.bf16.msra.mxu0 %v3364_v43  ;;  %v5329_v59 = vpop.permute.xlu0 %1994 }
 0x561   : > { %v5315_v50 = vsel %vm2719_vm0, %v2568_v14, %v5075_v34  ;;  %v2588_v57 = vrot.slane %v2587_v23, 1  ;;  %v2019_v41 = vsel %vm1827_vm3, %v1955_v45, 0.0  ;;  %v2441_v29 = vsel %vm2249_vm8, %v2371_v12, 0.0  ;;  %v2339_v18 = vpop.permute.xlu1 %2338 }
 0x562   : > { %6170 = vst [vmem:[#allocation126_spill] sm:$0xff] %v5315_v50  ;;  %v2607_v39 = vrot.slane %v2606_v55, 2  ;;  %v2473_v56 = vadd.f32 %v2441_v29, %v5148_v38  ;;  %v3366_v22 = vpack.c.bf16 %v2826_v10, %v2825_v9  ;;  %v2827_v4 = vmul.f32 %v3203_v42, %v5140_v35  ;;  %v6173_v9 = vld [vmem:[#allocation33_spill] sm:$0xff]  ;;  %v6175_v29 = vld [vmem:[#allocation90_spill] sm:$0xff] }
 0x563   : > { %v2589_v25 = vadd.f32 %v2588_v57, %v2587_v23  ;;  %v2828_v34 = vmul.f32 %v3203_v42, %v5101_v15  ;;  %v2829_v14 = vmul.f32 %v3203_v42, %v5167_v2  ;;  %v2830_v50 = vmul.f32 %v3203_v42, %v5157_v36  ;;  %v6171_v36 = vld [vmem:[#allocation36_spill] sm:$0xff]  ;;  %v6172_v2 = vld [vmem:[#allocation87_spill] sm:$0xff] }
 0x564   : > { %v2608_v32 = vadd.f32 %v2607_v39, %v2606_v55  ;;  %v2632_v45 = vsel %vm2484_vm15, %v2473_v56, 0.0  ;;  %3367 = vmatprep.subr.bf16.mxu0 %v3366_v22  ;;  %v2831_v43 = vmul.f32 %v3203_v42, %v5178_v63  ;;  %v2832_v38 = vmul.f32 %v3203_v42, %v5170_v17  ;;  %v2379_v10 = vpop.permute.xlu0 %2378 }
 0x565   : > { %v2051_v35 = vadd.f32 %v2019_v41, %v4764_v47  ;;  %v2633_v23 = vrot.slane %v2632_v45, 4  ;;  %v2435_v15 = vsel %vm2243_vm10, %v2339_v18, 0.0  ;;  %vm1831_vm13 = vcmp.eq.s32.totalorder %v6171_v36, %v4642_v61  ;;  %3369 = vmatpush3.bf16.msra.mxu0 %v3368_v26  ;;  %v2355_v26 = vpop.permute.xlu1 %2354  ;;  %v6174_v41 = vld [vmem:[#allocation38_spill] sm:$0xff] }
 0x566   : > { %vm2254_vm1 = vcmp.eq.s32.totalorder %v6172_v2, %v4642_v61  ;;  %v5343_v22 = vsel %vm2721_vm9, %v2589_v25, %v5026_v52  ;;  %v2609_v63 = vrot.slane %v2608_v32, 1  ;;  %v2022_v47 = vsel %vm1830_vm6, %v1971_v7, 0.0 }
 0x567   : > { %v2467_v17 = vadd.f32 %v2435_v15, %v5081_v24  ;;  %v3370_v11 = vpack.c.bf16 %v2828_v34, %v2827_v4  ;;  %v2634_v18 = vadd.f32 %v2633_v23, %v2632_v45  ;;  %vm5902_vm4 = vcmask 1045509  }
 0x568   : > { %v3374_v56 = vpack.c.bf16 %v2830_v50, %v2829_v14  ;;  %v3378_v55 = vpack.c.bf16 %v2832_v38, %v2831_v43  ;;  %v3380_v12 = vpack.c.bf16 %v5117_v28, %v5125_v53  ;;  %vm997_vm14 = vcmp.eq.s32.totalorder %v6173_v9, %v4642_v61  ;;  %v6177_v14 = vld [vmem:[#allocation37_spill] sm:$0xff]  ;;  %v2395_v38 = vpop.permute.xlu0 %2394  ;;  %v6189_v28 = vld [vmem:[#allocation71_spill] sm:$0xff] }
 0x569   : > { %v2610_v25 = vadd.f32 %v2609_v63, %v2608_v32  ;;  %v2590_v52 = vsel %vm2484_vm15, %v2467_v17, 0.0  ;;  %3371 = vmatprep.subr.bf16.mxu0 %v3370_v11  ;;  %v5355_v13 = vmul.f32 %v3203_v42, %v5217_v37  ;;  %v2834_v4 = vmul.f32 %v3203_v42, %v5181_v1 }
 0x56a   : > { %v2635_v24 = vrot.slane %v2634_v18, 2  ;;  %v2591_v7 = vrot.slane %v2590_v52, 4  ;;  %v2438_v50 = vsel %vm2246_vm5, %v2355_v26, 0.0  ;;  %v2443_v57 = vsel %vm2251_vm12, %v2379_v10, 0.0 }
 0x56b   : > { %vm1834_vm3 = vcmp.eq.s32.totalorder %v6174_v41, %v4642_v61  ;;  %vm2255_vm8 = vcmp.eq.s32.totalorder %v6175_v29, %v4642_v61  ;;  %v6176_v39 = vpack.c.bf16 %v5214_v60, %v5224_v31  ;;  %v2470_v42 = vadd.f32 %v2438_v50, %v5083_v19  ;;  %v6192_v41 = vld [vmem:[#allocation30_spill] sm:$0xff] }
 0x56c   : > { %v2475_v34 = vadd.f32 %v2443_v57, %v2051_v35  ;;  %v2743_v16 = vsel %vm5903_vm2, %v2610_v25, %v5288_v54  ;;  %v3382_v58 = vpack.c.bf16 %v2834_v4, %v5355_v13  ;;  %vm1826_vm10 = vcmp.eq.s32.totalorder %v6177_v14, %v4642_v61  ;;  %v1975_v54 = vpop.permute.xlu1 %1974  ;;  %v6178_v35 = vld [vmem:[#allocation80_spill] sm:$0xff]  ;;  %v2399_v4 = vpop.permute.xlu0 %2398  ;;  %v6186_v57 = vld [vmem:[#allocation15_spill] sm:$0xff] }
 0x56d   : > { %3373 = vmatpush3.bf16.msra.mxu0 %v6176_v39  ;;  %v2636_v32 = vadd.f32 %v2635_v24, %v2634_v18  ;;  %v2592_v45 = vadd.f32 %v2591_v7, %v2590_v52  ;;  %v3384_v43 = vpack.c.bf16 %v5164_v40, %v5199_v49  ;;  %v5381_v60 = vmul.f32 %v5186_v20, %v5079_v30  ;;  %v6181_v18 = vld [vmem:[#allocation26_spill] sm:$0xff]  ;;  %v6198_v40 = vld [vmem:[#allocation119_spill] sm:$0xff] }
 0x56e   : > { %3375 = vmatprep.subr.bf16.mxu0 %v3374_v56  ;;  %v2054_v19 = vadd.f32 %v2022_v47, %v4789_v48  ;;  %v2611_v31 = vsel %vm2484_vm15, %v2470_v42, 0.0  ;;  %vm2247_vm11 = vcmp.eq.s32.totalorder %v6178_v35, %v4642_v61  ;;  %v5389_v23 = vmul.f32 %v5186_v20, %v5052_v46  ;;  %v6179_v48 = vld [vmem:[#allocation91_spill] sm:$0xff]  ;;  %v6182_v46 = vld [vmem:[#allocation70_spill] sm:$0xff] }
 0x56f   : > { %v3391_v15 = vpack.c.bf16 %v5195_v62, %v5256_v8  ;;  %v2637_v63 = vrot.slane %v2636_v32, 1  ;;  %v2593_v17 = vrot.slane %v2592_v45, 2  ;;  %v2612_v30 = vrot.slane %v2611_v31, 4  ;;  %v6185_v24 = vld [vmem:[#allocation82_spill] sm:$0xff] }
 0x570   : > { %v2646_v11 = vsel %vm2484_vm15, %v2475_v34, 0.0  ;;  %vm2258_vm6 = vcmp.eq.s32.totalorder %v6179_v48, %v4642_v61  ;;  %v6180_v47 = vpack.c.bf16 %v5229_v21, %v5233_v33  ;;  %vm996_vm7 = vcmp.eq.s32.totalorder %v6181_v18, %v4642_v61  ;;  %v6183_v33 = vld [vmem:[#allocation39_spill] sm:$0xff]  ;;  %v1991_v13 = vpop.permute.xlu1 %1990 }
 0x571   : > { %vm1407_vm5 = vcmp.eq.s32.totalorder %v6182_v46, %v4642_v61  ;;  %v2023_v62 = vsel %vm1831_vm13, %v1975_v54, 0.0  ;;  %v2446_v8 = vsel %vm2254_vm1, %v2395_v38, 0.0  ;;  %v3386_v56 = vpack.c.bf16 %v5389_v23, %v5381_v60  ;;  %3392 = vmatpush3.bf16.msra.mxu1 %v3391_v15  ;;  %v6191_v34 = vld [vmem:[#allocation7_spill] sm:$0xff]  ;;  %v6195_v60 = vld [vmem:[#allocation41_spill] sm:$0xff]  ;;  %v2415_v38 = vpop.permute.xlu0 %2414 }
 0x572   : > { %3377 = vmatpush3.bf16.msra.mxu0 %v6180_v47  ;;  %v3388_v21 = vpack.c.bf16 %v5263_v3, %v5292_v44  ;;  %vm1829_vm12 = vcmp.eq.s32.totalorder %v6183_v33, %v4642_v61  ;;  %v2638_v25 = vadd.f32 %v2637_v63, %v2636_v32  ;;  %v2594_v52 = vadd.f32 %v2593_v17, %v2592_v45  ;;  %v6193_v45 = vld [vmem:[#allocation74_spill] sm:$0xff]  ;;  %v6205_v44 = vld [vmem:[#allocation113_spill] sm:$0xff] }
 0x573   : > { %3379 = vmatprep.subr.bf16.mxu0 %v3378_v55  ;;  %v5417_v36 = vmul.f32 %v5186_v20, %v5181_v1  ;;  %v5421_v2 = vmul.f32 %v5186_v20, %v5217_v37  ;;  %v6184_v55 = vmov 0.0|0.0   ;;  %v2647_v26 = vrot.slane %v2646_v11, 4 }
 0x574   : > { %3393 = vmatprep.subr.bf16.mxu1 %v6184_v55  ;;  %v2478_v10 = vadd.f32 %v2446_v8, %v2054_v19  ;;  %vm2250_vm13 = vcmp.eq.s32.totalorder %v6185_v24, %v4642_v61  ;;  %v3394_v7 = vpack.c.bf16 %v5282_v6, %v5296_v0  ;;  %v3397_v1 = vpack.c.bf16 %v5300_v27, %v5309_v51  ;;  %v6187_v27 = vld [vmem:[#allocation106_spill] sm:$0xff]  ;;  %v6188_v51 = vld [vmem:[#allocation5_spill] sm:$0xff]  ;;  %v2359_v54 = vpop.permute.xlu1 %2358  ;;  %v6203_v24 = vld [vmem:[#allocation60_spill] sm:$0xff] }
 0x575   : > { %v1189_v20 = vsel %vm997_vm14, %v4938_v5, 0.0  ;;  %v2595_v37 = vrot.slane %v2594_v52, 1  ;;  %v2613_v50 = vadd.f32 %v2612_v30, %v2611_v31  ;;  %v2055_v39 = vadd.f32 %v2023_v62, %v6186_v57  ;;  %v6196_v62 = vld [vmem:[#allocation126_spill] sm:$0xff] }
 0x576   : > { %3381 = vmatpush3.bf16.msra.mxu0 %v3380_v12  ;;  %v2667_v42 = vsel %vm2484_vm15, %v2478_v10, 0.0  ;;  %v2026_v6 = vsel %vm1834_vm3, %v1991_v13, 0.0  ;;  %v2447_v0 = vsel %vm2255_vm8, %v2399_v4, 0.0  ;;  %v5446_v5 = vsel %vm5902_vm4, %v2638_v25, %v2743_v16  ;;  %3395 = vmatpush3.bf16.msra.mxu1 %v3394_v7  ;;  %v6190_v12 = vld [vmem:[#allocation112_spill] sm:$0xff]  ;;  %v6194_v16 = vld [vmem:[#allocation25_spill] sm:$0xff]  ;;  %v5498_v10 = vpop.permute.xlu0 %2195 }
 0x577   : > { %3383 = vmatprep.subr.bf16.mxu0 %v3382_v58  ;;  %v1624_v9 = vadd.f32 %v6188_v51, %v6187_v27  ;;  %v1632_v53 = vadd.f32 %v6189_v28, %v1189_v20  ;;  %v2047_v32 = vadd.f32 %v6191_v34, %v6190_v12  ;;  %vm998_vm1 = vcmp.eq.s32.totalorder %v6192_v41, %v4642_v61  ;;  %v6197_v25 = vld [vmem:[#allocation69_spill] sm:$0xff]  ;;  %v6207_v34 = vld [vmem:[#allocation20_spill] sm:$0xff] }
 0x578   : > { %vm1409_vm14 = vcmp.eq.s32.totalorder %v6193_v45, %v4642_v61  ;;  %v2596_v29 = vadd.f32 %v2595_v37, %v2594_v52  ;;  %3396 = vmatprep.subr.bf16.mxu1 %v6184_v55  ;;  %v2018_v58 = vsel %vm1826_vm10, %v6194_v16, 0.0  ;;  %vm1833_vm3 = vcmp.eq.s32.totalorder %v6195_v60, %v4642_v61  ;;  %v6200_v52 = vld [vmem:[#allocation88_spill] sm:$0xff]  ;;  %v2375_v46 = vpop.permute.xlu1 %2374  ;;  %v6202_v20 = vld [vmem:[#allocation89_spill] sm:$0xff] }
 0x579   : > { %v2648_v19 = vadd.f32 %v2647_v26, %v2646_v11  ;;  %v2479_v31 = vadd.f32 %v2447_v0, %v2055_v39  ;;  %v3400_v23 = vpack.c.bf16 %v5417_v36, %v5421_v2  ;;  %v2614_v15 = vrot.slane %v2613_v50, 2  ;;  %v6201_v36 = vld [vmem:[#allocation107_spill] sm:$0xff]  ;;  %v6206_v12 = vld [vmem:[#allocation93_spill] sm:$0xff] }
 0x57a   : > { %v2668_v63 = vrot.slane %v2667_v42, 4  ;;  %v2058_v17 = vadd.f32 %v2026_v6, %v1632_v53  ;;  %v2439_v30 = vsel %vm2247_vm11, %v2359_v54, 0.0  ;;  %3385 = vmatpush3.bf16.msra.mxu0 %v3384_v43  ;;  %v2450_v47 = vsel %vm2258_vm6, %v2415_v38, 0.0  ;;  %3398 = vmatpush3.bf16.msra.mxu1 %v3397_v1  ;;  %v6199_v43 = vld [vmem:[#allocation40_spill] sm:$0xff]  ;;  %v5520_v53 = vpop.permute.xlu0 %2214 }
 0x57b   : > { %v2674_v14 = vsel %vm2484_vm15, %v2479_v31, 0.0  ;;  %v2471_v11 = vadd.f32 %v2439_v30, %v2047_v32  ;;  %v5478_v8 = vsel %vm2721_vm9, %v2596_v29, %v6196_v62  ;;  %3387 = vmatprep.subr.bf16.mxu0 %v3386_v56  ;;  %v1188_v35 = vsel %vm996_vm7, %v6197_v25, 0.0  ;;  %3399 = vmatprep.subr.bf16.mxu1 %v6184_v55 }
 0x57c   : > { %v1599_v49 = vsel %vm1407_vm5, %v6198_v40, 0.0  ;;  %vm1835_vm8 = vcmp.eq.s32.totalorder %v6199_v43, %v4642_v61  ;;  %v2675_v48 = vrot.slane %v2674_v14, 4  ;;  %vm2253_vm10 = vcmp.eq.s32.totalorder %v6200_v52, %v4642_v61  ;;  %v2391_v28 = vpop.permute.xlu1 %2390 }
 0x57d   : > { %v2050_v56 = vadd.f32 %v2018_v58, %v1624_v9  ;;  %v2021_v18 = vsel %vm1829_vm12, %v6201_v36, 0.0  ;;  %v2618_v2 = vsel %vm2484_vm15, %v2471_v11, 0.0  ;;  %v2482_v26 = vadd.f32 %v2450_v47, %v2058_v17  ;;  %v6204_v9 = vld [vmem:[#allocation66_spill] sm:$0xff] }
 0x57e   : > { %v2669_v13 = vadd.f32 %v2668_v63, %v2667_v42  ;;  %v2676_v4 = vadd.f32 %v2675_v48, %v2674_v14  ;;  %v2619_v7 = vrot.slane %v2618_v2, 4  ;;  %v2442_v1 = vsel %vm2250_vm13, %v2375_v46, 0.0  ;;  %3389 = vmatpush3.bf16.msra.mxu0 %v3388_v21  ;;  %3401 = vmatpush3.bf16.msra.mxu1 %v3400_v23 }
 0x57f   : > { %vm2257_vm11 = vcmp.eq.s32.totalorder %v6202_v20, %v4642_v61  ;;  %v2615_v33 = vadd.f32 %v2614_v15, %v2613_v50  ;;  %v2649_v37 = vrot.slane %v2648_v19, 2  ;;  %v2695_v57 = vsel %vm2484_vm15, %v2482_v26, 0.0  ;;  %3402 = vmatprep.subr.bf16.mxu1 %v6184_v55 }
 0x580   : > { %v2474_v39 = vadd.f32 %v2442_v1, %v2050_v56  ;;  %v1631_v42 = vadd.f32 %v1599_v49, %v1188_v35  ;;  %v2677_v6 = vrot.slane %v2676_v4, 2  ;;  %v2620_v0 = vadd.f32 %v2619_v7, %v2618_v2  ;;  %v2411_v11 = vpop.permute.xlu1 %2410 }
 0x581   : > { %v2696_v27 = vrot.slane %v2695_v57, 4  ;;  %v1190_v51 = vsel %vm998_vm1, %v6203_v24, 0.0  ;;  %v2053_v3 = vadd.f32 %v2021_v18, %v6204_v9  ;;  %v1601_v21 = vsel %vm1409_vm14, %v6205_v44, 0.0 }
 0x582   : > { %v2639_v50 = vsel %vm2484_vm15, %v2474_v39, 0.0  ;;  %vm2259_vm6 = vcmp.eq.s32.totalorder %v6206_v12, %v4642_v61  ;;  %v2025_v32 = vsel %vm1833_vm3, %v6207_v34, 0.0  ;;  %v2670_v41 = vrot.slane %v2669_v13, 2 }
 0x583   : > { %v2621_v29 = vrot.slane %v2620_v0, 2  ;;  %v2697_v16 = vadd.f32 %v2696_v27, %v2695_v57  ;;  %v2616_v58 = vrot.slane %v2615_v33, 1  ;;  %v2650_v31 = vadd.f32 %v2649_v37, %v2648_v19  ;;  %v5535_v19 = vpop.permute.xlu0 %1005 }
 0x584   : > { %v2640_v45 = vrot.slane %v2639_v50, 4  ;;  %v2445_v54 = vsel %vm2253_vm10, %v2391_v28, 0.0  ;;  %v2678_v38 = vadd.f32 %v2677_v6, %v2676_v4  ;;  %vm5901_vm7 = vcmask 1046534   ;;  %v2419_v46 = vpop.permute.xlu1 %2418 }
 0x585   : > { %v2622_v23 = vadd.f32 %v2621_v29, %v2620_v0  ;;  %v2698_v15 = vrot.slane %v2697_v16, 2  ;;  %v2477_v63 = vadd.f32 %v2445_v54, %v2053_v3  ;;  %v1633_v17 = vadd.f32 %v1601_v21, %v1190_v51 }
 0x586   : > { %v2057_v30 = vadd.f32 %v2025_v32, %v1631_v42  ;;  %v2027_v60 = vsel %vm1835_vm8, %v5329_v59, 0.0  ;;  %v2641_v14 = vadd.f32 %v2640_v45, %v2639_v50  ;;  %v2671_v47 = vadd.f32 %v2670_v41, %v2669_v13 }
 0x587   : > { %v2623_v62 = vrot.slane %v2622_v23, 1  ;;  %v2699_v25 = vadd.f32 %v2698_v15, %v2697_v16  ;;  %v2660_v35 = vsel %vm2484_vm15, %v2477_v63, 0.0  ;;  %v2651_v40 = vrot.slane %v2650_v31, 1  ;;  %v5541_v13 = vpop.permute.xlu0 %1436 }
 0x588   : > { %v2642_v49 = vrot.slane %v2641_v14, 2  ;;  %v2661_v48 = vrot.slane %v2660_v35, 4  ;;  %v2449_v52 = vsel %vm2257_vm11, %v2411_v11, 0.0  ;;  %v2617_v56 = vadd.f32 %v2616_v58, %v2615_v33  ;;  %v5552_v44 = vpop.permute.xlu1 %2176 }
 0x589   : > { %v2679_v36 = vrot.slane %v2678_v38, 1  ;;  %v2624_v43 = vadd.f32 %v2623_v62, %v2622_v23  ;;  %v2481_v59 = vadd.f32 %v2449_v52, %v2057_v30  ;;  %v2059_v18 = vadd.f32 %v2027_v60, %v1633_v17 }
 0x58a   : > { %v2643_v2 = vadd.f32 %v2642_v49, %v2641_v14  ;;  %v2662_v26 = vadd.f32 %v2661_v48, %v2660_v35  ;;  %vm5900_vm5 = vcmask 1047559   ;;  %v2672_v4 = vrot.slane %v2671_v47, 1 }
 0x58b   : > { %v2700_v7 = vrot.slane %v2699_v25, 1  ;;  %v2688_v1 = vsel %vm2484_vm15, %v2481_v59, 0.0  ;;  %v2451_v20 = vsel %vm2259_vm6, %v2419_v46, 0.0  ;;  %v2652_v42 = vadd.f32 %v2651_v40, %v2650_v31  ;;  %v5554_v21 = vpop.permute.xlu0 %1045  ;;  %v6209_v46 = vld [vmem:[#allocation6_spill] sm:$0xff] }
 0x58c   : > { %v2644_v37 = vrot.slane %v2643_v2, 1  ;;  %v2663_v33 = vrot.slane %v2662_v26, 2  ;;  %v2689_v57 = vrot.slane %v2688_v1, 4  ;;  %v2483_v39 = vadd.f32 %v2451_v20, %v2059_v18  ;;  %v1026_v45 = vpop.permute.xlu1 %1025  ;;  %v6208_v18 = vld [vmem:[#allocation9_spill] sm:$0xff]  ;;  %v6212_v20 = vld [vmem:[#allocation92_spill] sm:$0xff] }
 0x58d   : > { %v2680_v6 = vadd.f32 %v2679_v36, %v2678_v38  ;;  %v2761_v0 = vsel %vm5903_vm2, %v2617_v56, %v5343_v22  ;;  %v2779_v27 = vsel %vm5903_vm2, %v2624_v43, %v5478_v8  ;;  %v2673_v50 = vadd.f32 %v2672_v4, %v2671_v47 }
 0x58e   : > { %v2645_v24 = vadd.f32 %v2644_v37, %v2643_v2  ;;  %v2664_v51 = vadd.f32 %v2663_v33, %v2662_v26  ;;  %v2690_v9 = vadd.f32 %v2689_v57, %v2688_v1  ;;  %v2702_v3 = vsel %vm2484_vm15, %v2483_v39, 0.0  ;;  %v6211_v1 = vld [vmem:[#allocation11_spill] sm:$0xff]  ;;  %v6213_v37 = vld [vmem:[#allocation42_spill] sm:$0xff] }
 0x58f   : > { %v2703_v28 = vrot.slane %v2702_v3, 4  ;;  %v2701_v12 = vadd.f32 %v2700_v7, %v2699_v25  ;;  %v2780_v34 = vsel %vm5902_vm4, %v2652_v42, %v2779_v27  ;;  %v1457_v38 = vpop.permute.xlu0 %1456  ;;  %vm971_vm12 = vcmp.eq.s32.totalorder %v6208_v18, %v4642_v61  ;;  %v6210_v7 = vld [vmem:[#allocation95_spill] sm:$0xff]  ;;  %v6214_v57 = vld [vmem:[#allocation94_spill] sm:$0xff]  ;;  %v6215_v27 = vld [vmem:[#allocation45_spill] sm:$0xff] }
 0x590   : > { %v2665_v32 = vrot.slane %v2664_v51, 1  ;;  %v2691_v41 = vrot.slane %v2690_v9, 2  ;;  %v2762_v22 = vsel %vm5902_vm4, %v2645_v24, %v2761_v0  ;;  %v2781_v8 = vsel %vm5901_vm7, %v2680_v6, %v2780_v34  ;;  %v1417_v30 = vpop.permute.xlu1 %1416  ;;  %v6216_v24 = vld [vmem:[#allocation100_spill] sm:$0xff] }
 0x591   : > { %v2704_v29 = vadd.f32 %v2703_v28, %v2702_v3  ;;  %v2763_v16 = vsel %vm5901_vm7, %v2673_v50, %v2762_v22  ;;  %vm967_vm13 = vcmp.eq.s32.totalorder %v6209_v46, %v4642_v61  ;;  %v1163_v4 = vsel %vm971_vm12, %v1026_v45, 0.0  ;;  %v6217_v28 = vld [vmem:[#allocation49_spill] sm:$0xff] }
 0x592   : > { %v2666_v58 = vadd.f32 %v2665_v32, %v2664_v51  ;;  %v2692_v31 = vadd.f32 %v2691_v41, %v2690_v9  ;;  %v2764_v54 = vsel %vm5900_vm5, %v2701_v12, %v2763_v16  ;;  %vm1382_vm1 = vcmp.eq.s32.totalorder %v6210_v7, %v4642_v61 }
 0x593   : > { %v2705_v23 = vrot.slane %v2704_v29, 2  ;;  %2765 = vrot.lane.b32.xlu0 %v2764_v54, %s3566_s25  ;;  %v5564_v60 = vpop.permute.xlu0 %1065  ;;  %s3577_s25 = smov 112   ;;  %vm975_vm14 = vcmp.eq.s32.totalorder %v6211_v1, %v4642_v61  ;;  %vm1378_vm3 = vcmp.eq.s32.totalorder %v6212_v20, %v4642_v61  ;;  %vm1808_vm8 = vcmp.eq.s32.totalorder %v6213_v37, %v4642_v61  ;;  %v6229_v1 = vld [vmem:[#allocation98_spill] sm:$0xff]  ;;  %v6231_v37 = vld [vmem:[#allocation97_spill] sm:$0xff] }
 0x594   : > { %v2693_v15 = vrot.slane %v2692_v31, 1  ;;  %v2745_v63 = vsel %vm5901_vm7, %v2666_v58, %v5446_v5  ;;  %v1863_v25 = vpop.permute.xlu1 %1862  ;;  %v1574_v33 = vsel %vm1382_vm1, %v5541_v13, 0.0  ;;  %vm1386_vm10 = vcmp.eq.s32.totalorder %v6214_v57, %v4642_v61  ;;  %v6219_v58 = vld [vmem:[#allocation99_spill] sm:$0xff]  ;;  %v6230_v20 = vld [vmem:[#allocation102_spill] sm:$0xff] }
 0x595   : > { %v2706_v17 = vadd.f32 %v2705_v23, %v2704_v29  ;;  %v1570_v39 = vsel %vm1378_vm3, %v1417_v30, 0.0  ;;  %v2000_v42 = vsel %vm1808_vm8, %v1863_v25, 0.0  ;;  %v1606_v6 = vadd.f32 %v1574_v33, %v1163_v4  ;;  %v6221_v23 = vld [vmem:[#allocation96_spill] sm:$0xff]  ;;  %v6223_v30 = vld [vmem:[#allocation47_spill] sm:$0xff]  ;;  %v6226_v25 = vld [vmem:[#allocation50_spill] sm:$0xff] }
 0x596   : > { %v2694_v14 = vadd.f32 %v2693_v15, %v2692_v31  ;;  %v1578_v0 = vsel %vm1386_vm10, %v1457_v38, 0.0  ;;  %vm1804_vm11 = vcmp.eq.s32.totalorder %v6215_v27, %v4642_v61  ;;  %vm2232_vm6 = vcmp.eq.s32.totalorder %v6216_v24, %v4642_v61  ;;  %v6222_v15 = vld [vmem:[#allocation44_spill] sm:$0xff]  ;;  %v6228_v4 = vld [vmem:[#allocation53_spill] sm:$0xff]  ;;  %v6232_v33 = vld [vmem:[#allocation51_spill] sm:$0xff] }
 0x597   : > { %v2707_v11 = vrot.slane %v2706_v17, 1  ;;  %v1477_v35 = vpop.permute.xlu0 %1476  ;;  %v1159_v13 = vsel %vm967_vm13, %v5535_v19, 0.0  ;;  %vm1812_vm12 = vcmp.eq.s32.totalorder %v6217_v28, %v4642_v61  ;;  %v1167_v12 = vsel %vm975_vm14, %v5554_v21, 0.0  ;;  %v6220_v21 = vld [vmem:[#allocation43_spill] sm:$0xff] }
 0x598   : > { %v2746_v47 = vsel %vm5900_vm5, %v2694_v14, %v2745_v63  ;;  %v5568_v49 = vpop.permute.xlu1 %1085  ;;  %v1602_v34 = vadd.f32 %v1570_v39, %v1159_v13  ;;  %v2032_v32 = vadd.f32 %v2000_v42, %v1606_v6  ;;  %v1610_v22 = vadd.f32 %v1578_v0, %v1167_v12  ;;  %v6224_v14 = vld [vmem:[#allocation46_spill] sm:$0xff]  ;;  %v6233_v42 = vld [vmem:[#allocation101_spill] sm:$0xff]  ;;  %v6234_v24 = vld [vmem:[#allocation55_spill] sm:$0xff] }
 0x599   : > { %2747 = vrot.lane.b32.xlu1 %v2746_v47, %s3576_s14  ;;  %v2708_v62 = vadd.f32 %v2707_v11, %v2706_v17  ;;  %vm2228_vm13 = vcmp.eq.s32.totalorder %v6219_v58, %v4642_v61  ;;  %vm979_vm14 = vcmp.eq.s32.totalorder %v6220_v21, %v4642_v61  ;;  %vm1390_vm3 = vcmp.eq.s32.totalorder %v6221_v23, %v4642_v61  ;;  %s3500_s14 = scalar_lea.vmem %s3499_s28, 256 }
 0x59a   : > { %vm987_vm8 = vcmp.eq.s32.totalorder %v6222_v15, %v4642_v61  ;;  %v1582_v17 = vsel %vm1390_vm3, %v1477_v35, 0.0  ;;  %vm983_vm10 = vcmp.eq.s32.totalorder %v6223_v30, %v4642_v61  ;;  %v6227_v35 = vld [vmem:[#allocation52_spill] sm:$0xff]  ;;  %vm1394_vm3 = vcmp.eq.s32.totalorder %v6229_v1, %v4642_v61  ;;  %p3502_p1 = scmp.lt.s32.totalorder %s3500_s14, %s3494_s26 }
 0x59b   : > { %v2782_v40 = vsel %vm5900_vm5, %v2708_v62, %v2781_v8  ;;  %v1843_v5 = vpop.permute.xlu0 %1842  ;;  %v6218_v8 = vld [vmem:[#allocation104_spill] sm:$0xff]  ;;  %vm1402_vm5 = vcmp.eq.s32.totalorder %v6230_v20, %v4642_v61  ;;  %vm1398_vm7 = vcmp.eq.s32.totalorder %v6231_v37, %v4642_v61  ;;  %vm995_vm4 = vcmp.eq.s32.totalorder %v6232_v33, %v4642_v61 }
 0x59c   : > { %v5570_v48 = vpop.permute.xlu1 %1496  ;;  %v1996_v3 = vsel %vm1804_vm11, %v1843_v5, 0.0  ;;  %vm2236_vm1 = vcmp.eq.s32.totalorder %v6218_v8, %v4642_v61  ;;  %vm1816_vm11 = vcmp.eq.s32.totalorder %v6224_v14, %v4642_v61  ;;  %v6225_v62 = vld [vmem:[#allocation48_spill] sm:$0xff]  ;;  %v1175_v28 = vsel %vm983_vm10, %v5568_v49, 0.0  ;;  %p3503_p2 = por %p3502_p1, %p3501_p0 }
 0x59d   : > { %2783 = vrot.lane.b32.xlu1 %v2782_v40, %s3577_s25  ;;  %v2028_v29 = vadd.f32 %v1996_v3, %v1602_v34  ;;  %v1586_v6 = vsel %vm1394_vm3, %v5570_v48, 0.0  ;;  %vm2248_vm3 = vcmp.eq.s32.totalorder %v5552_v44, %v4642_v61  ;;  %vm6239_vm10 = vcmask 1045509  }
 0x59e   : > { %p3504_p3 = pnand %p3503_p2, %p3497_p13 }
 0x59f   : > { %v2287_v52 = vpop.permute.xlu0 %2286 }
 0x5a0   : > { %v1883_v56 = vpop.permute.xlu1 %1882  ;;  %v2424_v50 = vsel %vm2232_vm6, %v2287_v52, 0.0  ;;  %vm991_vm6 = vcmp.eq.s32.totalorder %v6225_v62, %v4642_v61 }
 0x5a1   : > { %v2004_v41 = vsel %vm1812_vm12, %v1883_v56, 0.0  ;;  %v2456_v16 = vadd.f32 %v2424_v50, %v2032_v32  ;;  %vm1820_vm12 = vcmp.eq.s32.totalorder %v6226_v25, %v4642_v61  ;;  %v1171_v56 = vsel %vm979_vm14, %v5564_v60, 0.0  ;;  %v6236_v50 = vld [vmem:[#allocation105_spill] sm:$0xff] }
 0x5a2   : > { %v2036_v54 = vadd.f32 %v2004_v41, %v1610_v22  ;;  %v1614_v7 = vadd.f32 %v1582_v17, %v1171_v56  ;;  %vm1406_vm14 = vcmp.eq.s32.totalorder %v6233_v42, %v4642_v61 }
 0x5a3   : > { %v5572_v36 = vpop.permute.xlu0 %1125  ;;  %v2513_v47 = vsel %vm2484_vm15, %v2456_v16, 0.0 }
 0x5a4   : > { %v5574_v43 = vpop.permute.xlu1 %1105  ;;  %v2514_v57 = vrot.slane %v2513_v47, 4  ;;  %v1183_v44 = vsel %vm991_vm6, %v5572_v36, 0.0  ;;  %vm6240_vm6 = vcmask 1046534  }
 0x5a6   : > { %v2515_v41 = vadd.f32 %v2514_v57, %v2513_v47 }
 0x5a7   : > { %v5576_v59 = vpop.permute.xlu0 %1536 }
 0x5a8   : > { %v1517_v2 = vpop.permute.xlu1 %1516  ;;  %v1594_v22 = vsel %vm1402_vm5, %v5576_v59, 0.0  ;;  %v2516_v23 = vrot.slane %v2515_v41, 2  ;;  %vm6237_vm5 = vcmask 1041409  }
 0x5a9   : > { %v1590_v60 = vsel %vm1398_vm7, %v1517_v2, 0.0  ;;  %v1179_v2 = vsel %vm987_vm8, %v5574_v43, 0.0  ;;  %vm2244_vm7 = vcmp.eq.s32.totalorder %v6236_v50, %v4642_v61  ;;  %v1618_v43 = vadd.f32 %v1586_v6, %v1175_v28 }
 0x5aa   : > { %v1622_v12 = vadd.f32 %v1590_v60, %v1179_v2  ;;  %vm6238_vm8 = vcmask 1044484  }
 0x5ab   : > { %v5580_v26 = vpop.permute.xlu0 %1922 }
 0x5ac   : > { %v1903_v51 = vpop.permute.xlu1 %1902  ;;  %v2012_v8 = vsel %vm1820_vm12, %v5580_v26, 0.0  ;;  %v1626_v26 = vadd.f32 %v1594_v22, %v1183_v44  ;;  %vm6241_vm12 = vcmask 1047559  }
 0x5ad   : > { %v2008_v18 = vsel %vm1816_vm11, %v1903_v51, 0.0  ;;  %vm1832_vm11 = vcmp.eq.s32.totalorder %v6234_v24, %v4642_v61  ;;  %v2044_v15 = vadd.f32 %v2012_v8, %v1618_v43 }
 0x5ae   : > { %v2040_v0 = vadd.f32 %v2008_v18, %v1614_v7 }
 0x5af   : > { %v2307_v9 = vpop.permute.xlu0 %2306 }
 0x5b0   : > { %v2428_v19 = vsel %vm2236_vm1, %v2307_v9, 0.0  ;;  %v2267_v31 = vpop.permute.xlu1 %2266  ;;  %vm1824_vm1 = vcmp.eq.s32.totalorder %v6227_v35, %v4642_v61  ;;  %v6235_v9 = vld [vmem:[#allocation103_spill] sm:$0xff] }
 0x5b1   : > { %v2420_v38 = vsel %vm2228_vm13, %v2267_v31, 0.0  ;;  %v2460_v11 = vadd.f32 %v2428_v19, %v2036_v54  ;;  %vm1828_vm13 = vcmp.eq.s32.totalorder %v6228_v4, %v4642_v61  ;;  %vm2240_vm2 = vcmp.eq.s32.totalorder %v6235_v9, %v4642_v61 }
 0x5b2   : > { %v2452_v63 = vadd.f32 %v2420_v38, %v2028_v29 }
 0x5b3   : > { %v5613_v45 = vpop.permute.xlu0 %1556  ;;  %v2541_v39 = vsel %vm2484_vm15, %v2460_v11, 0.0 }
 0x5b4   : > { %v2485_v40 = vsel %vm2484_vm15, %v2452_v63, 0.0  ;;  %v1146_v5 = vpop.permute.xlu1 %1145  ;;  %v2542_v34 = vrot.slane %v2541_v39, 4  ;;  %v1598_v30 = vsel %vm1406_vm14, %v5613_v45, 0.0  ;;  %vm6242_vm14 = vcmask 261120  }
 0x5b5   : > { %v2486_v46 = vrot.slane %v2485_v40, 4  ;;  %v1187_v63 = vsel %vm995_vm4, %v1146_v5, 0.0  ;;  %vm2256_vm4 = vcmp.eq.s32.totalorder %v5520_v53, %v4642_v61 }
 0x5b6   : > { %v2543_v38 = vadd.f32 %v2542_v34, %v2541_v39  ;;  %v1630_v56 = vadd.f32 %v1598_v30, %v1187_v63 }
 0x5b7   : > { %v1943_v52 = vpop.permute.xlu0 %1942  ;;  %v2487_v27 = vadd.f32 %v2486_v46, %v2485_v40  ;;  %v2517_v46 = vadd.f32 %v2516_v23, %v2515_v41 }
 0x5b8   : > { %v1983_v51 = vpop.permute.xlu1 %1982  ;;  %v2016_v3 = vsel %vm1824_vm1, %v1943_v52, 0.0  ;;  %v2544_v52 = vrot.slane %v2543_v38, 2  ;;  %vm2850_vm1 = vcmask 523264  }
 0x5b9   : > { %v2488_v29 = vrot.slane %v2487_v27, 2  ;;  %v2048_v49 = vadd.f32 %v2016_v3, %v1622_v12  ;;  %v2024_v25 = vsel %vm1832_vm11, %v1983_v51, 0.0 }
 0x5ba   : > { %v2056_v20 = vadd.f32 %v2024_v25, %v1630_v56  ;;  %v2545_v42 = vadd.f32 %v2544_v52, %v2543_v38  ;;  %v6243_v25 = vmov 0.0   ;;  %v2995_v52 = vld [vmem:[%s5790_s7 + $0x10] sm:$0xff]  ;;  %v2996_v56 = vld [vmem:[%s5790_s7 + $0x18] sm:$0xff] }
 0x5bb   : > { %v2327_v13 = vpop.permute.xlu0 %2326  ;;  %v2489_v36 = vadd.f32 %v2488_v29, %v2487_v27  ;;  %v2518_v27 = vrot.slane %v2517_v46, 1 }
 0x5bc   : > { %v2432_v48 = vsel %vm2240_vm2, %v2327_v13, 0.0  ;;  %v2367_v19 = vpop.permute.xlu1 %2366  ;;  %vm2252_vm2 = vcmp.eq.s32.totalorder %v5498_v10, %v4642_v61 }
 0x5bd   : > { %v2464_v32 = vadd.f32 %v2432_v48, %v2040_v0  ;;  %v2440_v54 = vsel %vm2248_vm3, %v2367_v19, 0.0  ;;  %v2490_v1 = vrot.slane %v2489_v36, 1  ;;  %v2546_v48 = vrot.slane %v2545_v42, 1 }
 0x5be   : > { %v2472_v21 = vadd.f32 %v2440_v54, %v2048_v49  ;;  %v2519_v12 = vadd.f32 %v2518_v27, %v2517_v46 }
 0x5bf   : > { %v2569_v16 = vsel %vm2484_vm15, %v2464_v32, 0.0  ;;  %v1963_v58 = vpop.permute.xlu0 %1962  ;;  %v2491_v9 = vadd.f32 %v2490_v1, %v2489_v36  ;;  %v2547_v29 = vadd.f32 %v2546_v48, %v2545_v42 }
 0x5c0   : > { %v2570_v31 = vrot.slane %v2569_v16, 4  ;;  %v2020_v59 = vsel %vm1828_vm13, %v1963_v58, 0.0  ;;  %v2625_v14 = vsel %vm2484_vm15, %v2472_v21, 0.0  ;;  %v2387_v47 = vpop.permute.xlu1 %2386  ;;  %vm2788_vm13 = vcmask 916480  }
 0x5c1   : > { %v2052_v11 = vadd.f32 %v2020_v59, %v1626_v26  ;;  %v2626_v35 = vrot.slane %v2625_v14, 4  ;;  %v2444_v5 = vsel %vm2252_vm2, %v2387_v47, 0.0  ;;  %v2718_v41 = vsel %vm6237_vm5, %v2519_v12, %v2491_v9 }
 0x5c2   : > { %v2571_v17 = vadd.f32 %v2570_v31, %v2569_v16  ;;  %v2720_v31 = vsel %vm2719_vm0, %v2547_v29, %v2718_v41  ;;  %vm6244_vm0 = vmmov 0  }
 0x5c3   : > { %v2347_v62 = vpop.permute.xlu0 %2346  ;;  %v2476_v18 = vadd.f32 %v2444_v5, %v2052_v11  ;;  %v2627_v4 = vadd.f32 %v2626_v35, %v2625_v14  ;;  %v2994_v35 = vld [vmem:[%s5790_s7 + $0x8] sm:$0xff] }
 0x5c4   : > { %v2572_v40 = vrot.slane %v2571_v17, 2  ;;  %v2436_v45 = vsel %vm2244_vm7, %v2347_v62, 0.0 }
 0x5c5   : > { %v2468_v7 = vadd.f32 %v2436_v45, %v2044_v15  ;;  %v2653_v37 = vsel %vm2484_vm15, %v2476_v18, 0.0  ;;  %v2628_v57 = vrot.slane %v2627_v4, 2  ;;  %v3406_v18 = vpack.c.bf16 %v2996_v56, %v2995_v52 }
 0x5c6   : > { %v2573_v10 = vadd.f32 %v2572_v40, %v2571_v17  ;;  %v2654_v60 = vrot.slane %v2653_v37, 4  ;;  %v2993_v40 = vld [vmem:[%s5790_s7] sm:$0xff] }
 0x5c7   : > { %v2407_v33 = vpop.permute.xlu0 %2406  ;;  %v2597_v39 = vsel %vm2484_vm15, %v2468_v7, 0.0  ;;  %v2629_v61 = vadd.f32 %v2628_v57, %v2627_v4  ;;  %v3403_v5 = vpack.c.bf16 %v2994_v35, %v2993_v40 }
 0x5c8   : > { %v2598_v6 = vrot.slane %v2597_v39, 4  ;;  %v2448_v0 = vsel %vm2256_vm4, %v2407_v33, 0.0  ;;  %v2655_v24 = vadd.f32 %v2654_v60, %v2653_v37  ;;  %v2574_v2 = vrot.slane %v2573_v10, 1 }
 0x5c9   : > { %v2480_v51 = vadd.f32 %v2448_v0, %v2056_v20  ;;  %v2630_v8 = vrot.slane %v2629_v61, 1 }
 0x5ca   : > { %v2599_v13 = vadd.f32 %v2598_v6, %v2597_v39  ;;  %v2656_v53 = vrot.slane %v2655_v24, 2  ;;  %v2575_v22 = vadd.f32 %v2574_v2, %v2573_v10 }
 0x5cb   : > { %v2681_v3 = vsel %vm2484_vm15, %v2480_v51, 0.0  ;;  %v2631_v54 = vadd.f32 %v2630_v8, %v2629_v61 }
 0x5cc   : > { %v2600_v50 = vrot.slane %v2599_v13, 2  ;;  %v2682_v28 = vrot.slane %v2681_v3, 4  ;;  %v2657_v34 = vadd.f32 %v2656_v53, %v2655_v24  ;;  %v2722_v59 = vsel %vm2721_vm9, %v2575_v22, %v2720_v31  ;;  %vm6246_vm9 = vmmov %vm6242_vm14 }
 0x5ce   : > { %v2601_v32 = vadd.f32 %v2600_v50, %v2599_v13  ;;  %v2683_v43 = vadd.f32 %v2682_v28, %v2681_v3  ;;  %v2658_v49 = vrot.slane %v2657_v34, 1 }
 0x5d0   : > { %v2602_v16 = vrot.slane %v2601_v32, 1  ;;  %v2684_v19 = vrot.slane %v2683_v43, 2  ;;  %v2659_v26 = vadd.f32 %v2658_v49, %v2657_v34 }
 0x5d2   : > { %v2603_v58 = vadd.f32 %v2602_v16, %v2601_v32  ;;  %v2685_v44 = vadd.f32 %v2684_v19, %v2683_v43 }
 0x5d4   : > { %v2686_v38 = vrot.slane %v2685_v44, 1  ;;  %v2724_v21 = vsel %vm6238_vm8, %v2603_v58, %v2722_v59 }
 0x5d5   : > { %v2726_v23 = vsel %vm6239_vm10, %v2631_v54, %v2724_v21 }
 0x5d6   : > { %v2687_v15 = vadd.f32 %v2686_v38, %v2685_v44  ;;  %v2728_v63 = vsel %vm6240_vm6, %v2659_v26, %v2726_v23 }
 0x5d8   : > { %v2730_v17 = vsel %vm6241_vm12, %v2687_v15, %v2728_v63 }
 0x605   : > { %v2766_v30 = vpop.permute.xlu0 %2765 }
 0x60b   : > { %v2748_v36 = vpop.permute.xlu1 %2747 }
 0x60c   : > { %v2787_v14 = vsel %vm6242_vm14, %v2748_v36, %v2766_v30  ;;  %v2786_v62 = vsel %vm2484_vm15, %v2730_v17, %v2748_v36  ;;  %vm6245_vm15 = vmmov %vm6242_vm14 }
 0x60f   : > { %v2784_v11 = vpop.permute.xlu1 %2783 }
 0x610   : > { %3331 = vmatmul.mubr.msk.f32.vlgmr.msra.gmra.mrb[2].mxu1 %vm2850_vm1, %v2784_v11  ;;  %v2789_v47 = vsel %vm2788_vm13, %v2787_v14, %v2784_v11 }
 0x611   : > { %2917 = vmatprep.mubr.f32.mxu0 %v2789_v47  ;;  %3341 = vmatprep.mubr.msk.f32.mxu1 %vm6244_vm0, %v6243_v25 }
 0x612   : > { %2918 = vmatmul.mubr.f32.vlgmr.msra.gmra.mrb[10].mxu0 %v2786_v62  ;;  %3404 = vmatpush3.bf16.msra.mxu1 %v3403_v5 }
 0x613   : > { %3405 = vmatprep.subr.bf16.mxu1 %v6184_v55  ;;  %v3206_v55 = vld [vmem:[%s5791_s8] ss:$0 sm:$0xff] }
 0x616   : > { %3407 = vmatpush3.bf16.msra.mxu1 %v3406_v18 }
 0x6e3   : > { %v2989_v45 = vpop.f32.mrb[2].mxu1 }
 0x6e4   : > { %v3332_v46 = vpop.f32.mrb[3].mxu1 }
 0x6e5   : > { %v3263_v4 = vpop.f32.mrb[10].mxu0 }
 0x6e6   : > { %v3264_v7 = vpop.f32.mrb[11].mxu0 }
 0x6e7   : > { %v3265_v1 = vadd.f32 %v3264_v7, %v3263_v4 }
 0x6e9   : > { %v2990_v20 = vadd.f32 %v3265_v1, %v2989_v45 }
 0x6eb   : > { %3342 = vmatmul.mubr.msk.f32.vlgmr.msra.gmra.mrb[4].mxu1 %vm6245_vm15, %v2990_v20 }
 0x7be   : > { %v3073_v37 = vpop.f32.mrb[4].mxu1 }
 0x7bf   : > { %v3074_v33 = vadd.f32 %v3206_v55, %v3073_v37  ;;  %v3343_v10 = vpop.f32.mrb[5].mxu1 }
 0x7c1   : > { %3077 = vst.msk [vmem:[%s351_s17] sm:$0xff] %vm6246_vm9, %v3074_v33 }
 0x7c2   : > { %3507 = shalt.err (!%p3504_p3)
}
 0x7c3   : > { %s3508_s27 = scalar_lea.hbm %s5740_s24, 128  ;;  %s3512_s17 = scalar_lea.hbm %s5792_s9, 256 }
 0x7c4   : > { %p3509_p4 = scmp.ne.s32.totalorder %s5740_s24, %s3508_s27  ;;  %p3513_p9 = scmp.lt.u32.totalorder %s5740_s24, %s5792_s9 }
 0x7c5   : > { %p3514_p10 = scmp.lt.u32.totalorder %s3512_s17, %s3508_s27  ;;  %p3516_p12 = scmp.lt.u32.totalorder %s3508_s27, %s5740_s24 }
 0x7c6   : > { %p3510_p7 = pnand %p3509_p4, %p3667_p5 }
 0x7c7   : > { %p3515_p11 = por %p3514_p10, %p3513_p9 }
 0x7c8   : > { %p3511_p8 = pneg %p3510_p7 }
 0x7c9   : > { %p3517_p13 = por %p3516_p12, %p3515_p11 }
 0x7cb   : > { %p3518_p0 = pnand %p3517_p13, %p3511_p8 }
 0x7cd   : > { %3521 = shalt.err (!%p3518_p0)
}
 0x7ce   : > { %3411 = dma.vmem_to_hbm [thread:$0]  (%p3667_p5), %s5742_s21, 128, %s5740_s24, %s3079_s29  }
 0x7cf PF: > { %p3417_p1 = scmp.ge.s32.totalorder %s3556_s12, 2  ;;  %s3104_s26 = sand.u32 1, %s3544_s30  }
 0x7d0   : > { %s3105_s13 = scalar_lea.sflag [#allocation3], %s3104_s26 }
 0x7d1   : > { %p3414_p2 = pnand %p3417_p1, %p3671_p6 }
 0x7d3   : > { %3539 = dma.done.wait (!%p3414_p2), %s3105_s13, 128  }
 0x7d4   : > { %3541 = vsyncadd (!%p3414_p2), %s3105_s13, 4294967168  ;;  %p19_p3 = scmp.ge.s32.totalorder %s3654_s15, 4   ;;  %s6247_s30 = smov %s3548_s10 }
 0x7d5   : > { %s6248_s10 = smov %s3552_s11  ;;  %s6249_s11 = smov %s3665_s18 }
 0x7d6   : > { %s6250_s12 = smov %s3654_s15  ;;  %21 = sbr.rel (!%p19_p3) target bundleno = 3 (0x3), region = 97 }
 0x7dd   :  { %3110 = vsyncpa [#allocation3], 1 }
 0x7de   :  { %3112 = vsyncpa [#allocation3 + $0x1], 1 }

</bundles_post_ra>
